<compile_context>
chip_gen: v7x
topology: tpu7x:2x2x1
jax: 0.10.0
libtpu: 0.0.40
codegen_flags: <defaults>
</compile_context>

<pallas_src>
import jax
import jax.numpy as jnp
from jax import lax
from jax.experimental import pallas as pl
from jax.experimental.pallas import tpu as pltpu

# ---------------------------------------------------------------------------
# Model dimensions (fixed by the module's __init__)
# ---------------------------------------------------------------------------
FEAT = 1000       # backbone output dim (ImageNet head)
FEAT_PAD = 1024   # zero-padded feature dim used by the kernel (128-aligned)
HID = 512         # hidden dim of video_query / img_key MLPs
QK = 64           # query/key dim
NUM_CLASS = 2     # classifier output


# ---------------------------------------------------------------------------
# Pallas kernel: the whole DeiT_Attn2 head for a block of BB (img, video)
# pairs.  Weights are bf16 and grid-resident; activations are cast to bf16 at
# each dot so the MXU runs its native bf16 path with an f32 accumulator.
# ---------------------------------------------------------------------------
def deit_attn2_head_kernel(
    vv_ref,    # video_v  [BB, Nv, FEAT_PAD]  f32
    vq_ref,    # video_q  [BB, Nv, FEAT_PAD]  f32
    imf_ref,   # img      [BB, Ni, FEAT_PAD]  f32
    imk_ref,   # img_k    [BB, Ni, FEAT_PAD]  f32
    wq1_ref, bq1_ref,      # Linear(1000,512) of video_query   (w: bf16, b: f32)
    wq2_ref, bq2_ref,      # Linear(512,64)   of video_query
    wk1_ref, bk1_ref,      # Linear(1000,512) of img_key
    wk2_ref, bk2_ref,      # Linear(512,64)   of img_key
    wc_img_ref,            # classifier rows for img half,   transposed [2, FEAT_PAD] bf16
    wc_vid_ref,            # classifier rows for video half, transposed [2, FEAT_PAD] bf16
    bc_ref,                # classifier bias [1, 2] f32
    prob_ref,              # out: [BB, 2]
    attn_ref,              # out: [BB, Nv]
):
    f32 = jnp.float32
    bf16 = jnp.bfloat16

    bb, nv, feat = vq_ref.shape
    ni = imk_ref.shape[1]

    # ---- video_query MLP on all BB*Nv rows at once (MXU-friendly M dim) ----
    vq2d = vq_ref[...].reshape(bb * nv, feat).astype(bf16)
    hq = jnp.dot(vq2d, wq1_ref[...], preferred_element_type=f32) + bq1_ref[...]
    hq = jnp.maximum(hq, 0.0)
    q2d = jnp.dot(hq.astype(bf16), wq2_ref[...],
                  preferred_element_type=f32) + bq2_ref[...]
    Q = q2d.reshape(bb, nv, QK)                                   # [BB, Nv, QK]

    # ---- img_key first layer + ReLU on all BB*Ni rows ----
    imk2d = imk_ref[...].reshape(bb * ni, feat).astype(bf16)
    hk = jnp.dot(imk2d, wk1_ref[...], preferred_element_type=f32) + bk1_ref[...]
    hk = jnp.maximum(hk, 0.0)

    # Exact shrink: mean(K @ Q^T, axis=0) == (mean(relu(hk)) @ wk2 + bk2) @ Q^T
    hk_mean = jnp.mean(hk.reshape(bb, ni, HID), axis=1)           # [BB, HID]
    Kbar = jnp.dot(hk_mean.astype(bf16), wk2_ref[...],
                   preferred_element_type=f32) + bk2_ref[...]     # [BB, QK]

    # ---- attention logits + softmax per item (tiny; VPU/XLU work) ----
    logits = jnp.sum(Kbar[:, None, :] * Q, axis=-1)               # [BB, Nv]
    m = jnp.max(logits, axis=-1, keepdims=True)
    e = jnp.exp(logits - m)
    A = e * pl.reciprocal(jnp.sum(e, axis=-1, keepdims=True), approx=True)

    # ---- V = A @ video_v per item; img mean per item ----
    V = jnp.sum(A[:, :, None] * vv_ref[...], axis=1)              # [BB, FEAT_PAD]
    img_mean = jnp.mean(imf_ref[...], axis=1)                     # [BB, FEAT_PAD]

    # ---- classifier with lane-dense transposed bf16 weights ----
    prob = (
        lax.dot_general(img_mean.astype(bf16), wc_img_ref[...],
                        (((1,), (1,)), ((), ())), preferred_element_type=f32)
        + lax.dot_general(V.astype(bf16), wc_vid_ref[...],
                          (((1,), (1,)), ((), ())), preferred_element_type=f32)
        + bc_ref[...]
    )                                                             # [BB, 2]

    prob_ref[...] = prob
    attn_ref[...] = A


# ---------------------------------------------------------------------------
# Wrapper: grid over blocks of BB batch items.  Weights use constant
# index_maps + single buffering -> DMA'd once, resident in VMEM for the whole
# grid; per-block activations are pipelined.
# ---------------------------------------------------------------------------
def deit_attn2_head(video_v, video_q, img_feat, img_k, kparams, *, block_b=None):
    """video_*: [B, Nv, FEAT], img_*: [B, Ni, FEAT] (f32, unpadded).
    kparams: output of prepare_params().  Returns (prob [B,2], attn [B,Nv])."""
    B, Nv, F = video_v.shape
    Ni = img_feat.shape[1]
    assert F == FEAT and img_feat.shape[2] == FEAT

    if block_b is None:
        block_b = B if B <= 16 else (16 if B % 16 == 0 else (8 if B % 8 == 0 else 1))
    assert B % block_b == 0
    num_blocks = B // block_b

    # Zero-pad the feature (lane) axis 1000 -> 1024 once per call (tiny vs
    # the weight traffic); padded lanes are zero and meet zero weight rows.
    pad = FEAT_PAD - FEAT
    def pad_feat(x):
        return jnp.pad(x, ((0, 0), (0, 0), (0, pad))) if pad else x

    vv_p, vq_p = pad_feat(video_v), pad_feat(video_q)
    imf_p, imk_p = pad_feat(img_feat), pad_feat(img_k)

    def act_spec(n):
        return pl.BlockSpec((block_b, n, FEAT_PAD), lambda g: (g, 0, 0))

    def const_spec(shape):
        zeros = (0,) * len(shape)
        # Constant block index -> no pipelining benefit; single-buffer it.
        return pl.BlockSpec(shape, lambda g: zeros, pipeline_mode=pl.Buffered(1))

    in_specs = [
        act_spec(Nv), act_spec(Nv), act_spec(Ni), act_spec(Ni),
        const_spec((FEAT_PAD, HID)), const_spec((1, HID)),
        const_spec((HID, QK)),       const_spec((1, QK)),
        const_spec((FEAT_PAD, HID)), const_spec((1, HID)),
        const_spec((HID, QK)),       const_spec((1, QK)),
        const_spec((NUM_CLASS, FEAT_PAD)), const_spec((NUM_CLASS, FEAT_PAD)),
        const_spec((1, NUM_CLASS)),
    ]
    out_specs = (
        pl.BlockSpec((block_b, NUM_CLASS), lambda g: (g, 0)),
        pl.BlockSpec((block_b, Nv), lambda g: (g, 0)),
    )

    # For very small grids, don't shard across v7x's 2 TCs (it would duplicate
    # the dominant weight DMA); with several blocks the split pays off.
    semantics = ("parallel",) if num_blocks >= 4 else ("arbitrary",)

    prob, attn = pl.pallas_call(
        deit_attn2_head_kernel,
        grid=(num_blocks,),
        out_shape=(
            jax.ShapeDtypeStruct((B, NUM_CLASS), jnp.float32),
            jax.ShapeDtypeStruct((B, Nv), jnp.float32),
        ),
        in_specs=in_specs,
        out_specs=out_specs,
        compiler_params=pltpu.CompilerParams(dimension_semantics=semantics),
    )(
        vv_p, vq_p, imf_p, imk_p,
        kparams["wq1"], kparams["bq1"], kparams["wq2"], kparams["bq2"],
        kparams["wk1"], kparams["bk1"], kparams["wk2"], kparams["bk2"],
        kparams["wc_img"], kparams["wc_vid"], kparams["bc"],
    )
    return prob, attn


# ---------------------------------------------------------------------------
# Parameter init + one-time kernel-side preparation (bf16 + FEAT padding)
# ---------------------------------------------------------------------------
def init_params(key):
    ks = jax.random.split(key, 12)
    sc = 0.02

    def w(k, shape):
        return jax.random.normal(k, shape, dtype=jnp.float32) * sc

    params = {
        "wq1": w(ks[0], (FEAT, HID)),  "bq1": w(ks[1], (1, HID)),
        "wq2": w(ks[2], (HID, QK)),    "bq2": w(ks[3], (1, QK)),
        "wk1": w(ks[4], (FEAT, HID)),  "bk1": w(ks[5], (1, HID)),
        "wk2": w(ks[6], (HID, QK)),    "bk2": w(ks[7], (1, QK)),
        # classifier Linear(2000, 2), split into halves and stored TRANSPOSED
        # ([NUM_CLASS, FEAT]) so the lane axis is FEAT, not 2.
        "wc_img": w(ks[8], (NUM_CLASS, FEAT)),
        "wc_vid": w(ks[9], (NUM_CLASS, FEAT)),
        "bc": w(ks[10], (1, NUM_CLASS)),
    }
    return params, ks[11]


_BF16_KEYS = ("wq1", "wq2", "wk1", "wk2", "wc_img", "wc_vid")


def prepare_params(p):
    """bf16 storage for the heavy weights + zero-pad FEAT 1000 -> 1024."""
    pad = FEAT_PAD - FEAT
    q = {}
    q["wq1"] = jnp.pad(p["wq1"], ((0, pad), (0, 0))).astype(jnp.bfloat16)
    q["wk1"] = jnp.pad(p["wk1"], ((0, pad), (0, 0))).astype(jnp.bfloat16)
    q["wq2"] = p["wq2"].astype(jnp.bfloat16)
    q["wk2"] = p["wk2"].astype(jnp.bfloat16)
    q["wc_img"] = jnp.pad(p["wc_img"], ((0, 0), (0, pad))).astype(jnp.bfloat16)
    q["wc_vid"] = jnp.pad(p["wc_vid"], ((0, 0), (0, pad))).astype(jnp.bfloat16)
    for k in ("bq1", "bq2", "bk1", "bk2", "bc"):
        q[k] = p[k]
    return q


def reference_params(p):
    """f32 view of the bf16-rounded weights (so the reference isolates kernel
    error from quantization error)."""
    d = dict(p)
    for k in _BF16_KEYS:
        d[k] = p[k].astype(jnp.bfloat16).astype(jnp.float32)
    return d


def stub_backbone(x_nchw, w_cls, w_dist):
    # TODO(synk): real deit_tiny_distilled_patch16_224 (pretrained timm ViT) is
    # not re-implemented; this deterministic linear stub stands in for it.
    n = x_nchw.shape[0]
    flat = x_nchw.reshape(n, -1)
    return flat @ w_cls, flat @ w_dist


# ---------------------------------------------------------------------------
# Pure-JAX reference of the head (original op ordering, for a sanity check)
# ---------------------------------------------------------------------------
def head_reference(video_v, video_q, img_feat, img_k, p):
    Q = jnp.maximum(video_q @ p["wq1"] + p["bq1"], 0.0) @ p["wq2"] + p["bq2"]
    K = jnp.maximum(img_k @ p["wk1"] + p["bk1"], 0.0) @ p["wk2"] + p["bk2"]
    A = K @ Q.T
    A = jnp.mean(A, axis=0, keepdims=True)
    A = jax.nn.softmax(A, axis=1)
    V = A @ video_v
    img_mean = jnp.mean(img_feat, axis=0, keepdims=True)
    prob = img_mean @ p["wc_img"].T + V @ p["wc_vid"].T + p["bc"]
    return prob, A[0]


# ---------------------------------------------------------------------------
if __name__ == "__main__":
    key = jax.random.PRNGKey(0)
    params_f32, key = init_params(key)

    # Small, deterministic example inputs: B (img, video) pairs, NCHW.
    B, N_IMG, N_VID, C, H, W = 2, 8, 8, 3, 16, 16
    k_img, k_vid, k_b1, k_b2 = jax.random.split(key, 4)
    img = jax.random.normal(k_img, (B, N_IMG, C, H, W), dtype=jnp.float32)
    video = jax.random.normal(k_vid, (B, N_VID, C, H, W), dtype=jnp.float32)

    d_in = C * H * W
    wb_cls = jax.random.normal(k_b1, (d_in, FEAT), dtype=jnp.float32) * 0.02
    wb_dist = jax.random.normal(k_b2, (d_in, FEAT), dtype=jnp.float32) * 0.02

    # Backbones (stubbed): each returns (cls_head, distill_head) features.
    video_v, video_q = stub_backbone(video.reshape(B * N_VID, C, H, W), wb_cls, wb_dist)
    video_v = video_v.reshape(B, N_VID, FEAT)
    video_q = video_q.reshape(B, N_VID, FEAT)
    img_feat, img_k = stub_backbone(img.reshape(B * N_IMG, C, H, W), wb_cls, wb_dist)
    img_feat = img_feat.reshape(B, N_IMG, FEAT)
    img_k = img_k.reshape(B, N_IMG, FEAT)

    # One-time bf16 quantization + FEAT padding of the weights.
    kparams = prepare_params(params_f32)

    prob, attn = deit_attn2_head(video_v, video_q, img_feat, img_k, kparams)
    jax.block_until_ready((prob, attn))

    assert prob.shape == (B, NUM_CLASS) and attn.shape == (B, N_VID)

    # Sanity check against a pure-JAX f32 reference that uses the SAME
    # bf16-rounded weights, item by item.
    ref_p = reference_params(params_f32)
    for b in range(B):
        prob_ref, attn_ref = head_reference(
            video_v[b], video_q[b], img_feat[b], img_k[b], ref_p)
        assert jnp.allclose(prob[b:b + 1], prob_ref, rtol=2e-2, atol=2e-3), (
            prob[b:b + 1], prob_ref)
        assert jnp.allclose(attn[b], attn_ref, rtol=2e-2, atol=2e-3), (
            attn[b], attn_ref)

    print("KERNEL_OK")
</pallas_src>

<mosaic_0001>
module attributes {stable_mosaic.version = 11 : i64} {
  func.func @deit_attn2_head_kernel(%arg0: i32, %arg1: memref<2x8x1024xf32, #tpu.memory_space<vmem>>, %arg2: memref<2x8x1024xf32, #tpu.memory_space<vmem>>, %arg3: memref<2x8x1024xf32, #tpu.memory_space<vmem>>, %arg4: memref<2x8x1024xf32, #tpu.memory_space<vmem>>, %arg5: memref<1024x512xbf16, #tpu.memory_space<vmem>>, %arg6: memref<1x512xf32, #tpu.memory_space<vmem>>, %arg7: memref<512x64xbf16, #tpu.memory_space<vmem>>, %arg8: memref<1x64xf32, #tpu.memory_space<vmem>>, %arg9: memref<1024x512xbf16, #tpu.memory_space<vmem>>, %arg10: memref<1x512xf32, #tpu.memory_space<vmem>>, %arg11: memref<512x64xbf16, #tpu.memory_space<vmem>>, %arg12: memref<1x64xf32, #tpu.memory_space<vmem>>, %arg13: memref<2x1024xbf16, #tpu.memory_space<vmem>>, %arg14: memref<2x1024xbf16, #tpu.memory_space<vmem>>, %arg15: memref<1x2xf32, #tpu.memory_space<vmem>>, %arg16: memref<2x2xf32, #tpu.memory_space<vmem>>, %arg17: memref<2x8xf32, #tpu.memory_space<vmem>>) attributes {dimension_semantics = [#tpu.dimension_semantics<arbitrary>], iteration_bounds = array<i64: 1>, scalar_prefetch = 0 : i64, scratch_operands = 0 : i64, tpu.core_type = #tpu.core_type<tc>, window_params = [{transform_indices = @transform_0, window_bounds = array<i64: 2, 8, 1024>}, {transform_indices = @transform_1, window_bounds = array<i64: 2, 8, 1024>}, {transform_indices = @transform_2, window_bounds = array<i64: 2, 8, 1024>}, {transform_indices = @transform_3, window_bounds = array<i64: 2, 8, 1024>}, {pipeline_mode = #tpu.pipeline_mode<synchronous>, transform_indices = @transform_4, window_bounds = array<i64: 1024, 512>}, {pipeline_mode = #tpu.pipeline_mode<synchronous>, transform_indices = @transform_5, window_bounds = array<i64: 1, 512>}, {pipeline_mode = #tpu.pipeline_mode<synchronous>, transform_indices = @transform_6, window_bounds = array<i64: 512, 64>}, {pipeline_mode = #tpu.pipeline_mode<synchronous>, transform_indices = @transform_7, window_bounds = array<i64: 1, 64>}, {pipeline_mode = #tpu.pipeline_mode<synchronous>, transform_indices = @transform_8, window_bounds = array<i64: 1024, 512>}, {pipeline_mode = #tpu.pipeline_mode<synchronous>, transform_indices = @transform_9, window_bounds = array<i64: 1, 512>}, {pipeline_mode = #tpu.pipeline_mode<synchronous>, transform_indices = @transform_10, window_bounds = array<i64: 512, 64>}, {pipeline_mode = #tpu.pipeline_mode<synchronous>, transform_indices = @transform_11, window_bounds = array<i64: 1, 64>}, {pipeline_mode = #tpu.pipeline_mode<synchronous>, transform_indices = @transform_12, window_bounds = array<i64: 2, 1024>}, {pipeline_mode = #tpu.pipeline_mode<synchronous>, transform_indices = @transform_13, window_bounds = array<i64: 2, 1024>}, {pipeline_mode = #tpu.pipeline_mode<synchronous>, transform_indices = @transform_14, window_bounds = array<i64: 1, 2>}, {transform_indices = @transform_15, window_bounds = array<i64: 2, 2>}, {transform_indices = @transform_16, window_bounds = array<i64: 2, 8>}]} {
    %c0 = arith.constant 0 : index
    %c0_0 = arith.constant 0 : index
    %c0_1 = arith.constant 0 : index
    %0 = vector.load %arg2[%c0, %c0_0, %c0_1] : memref<2x8x1024xf32, #tpu.memory_space<vmem>>, vector<2x8x1024xf32>
    %1 = vector.shape_cast %0 : vector<2x8x1024xf32> to vector<16x1024xf32>
    %2 = arith.truncf %1 : vector<16x1024xf32> to vector<16x1024xbf16>
    %c0_2 = arith.constant 0 : index
    %c0_3 = arith.constant 0 : index
    %3 = vector.load %arg5[%c0_2, %c0_3] : memref<1024x512xbf16, #tpu.memory_space<vmem>>, vector<1024x512xbf16>
    %cst = arith.constant dense<0.000000e+00> : vector<16x512xf32>
    %4 = tpu.matmul %2, %3, %cst {dimension_numbers = #tpu.dot_dimension_numbers<[1], [0], [0], [1], [0, 0, 1, 1], [], []>} : vector<16x1024xbf16>, vector<1024x512xbf16>, vector<16x512xf32> -> vector<16x512xf32>
    %c0_4 = arith.constant 0 : index
    %c0_5 = arith.constant 0 : index
    %5 = vector.load %arg6[%c0_4, %c0_5] : memref<1x512xf32, #tpu.memory_space<vmem>>, vector<1x512xf32>
    %6 = vector.broadcast %5 : vector<1x512xf32> to vector<16x512xf32>
    %7 = arith.addf %4, %6 : vector<16x512xf32>
    %cst_6 = arith.constant 0.000000e+00 : f32
    %8 = vector.broadcast %cst_6 : f32 to vector<16x512xf32>
    %9 = arith.maximumf %7, %8 : vector<16x512xf32>
    %10 = arith.truncf %9 : vector<16x512xf32> to vector<16x512xbf16>
    %c0_7 = arith.constant 0 : index
    %c0_8 = arith.constant 0 : index
    %11 = vector.load %arg7[%c0_7, %c0_8] : memref<512x64xbf16, #tpu.memory_space<vmem>>, vector<512x64xbf16>
    %cst_9 = arith.constant dense<0.000000e+00> : vector<16x64xf32>
    %12 = tpu.matmul %10, %11, %cst_9 {dimension_numbers = #tpu.dot_dimension_numbers<[1], [0], [0], [1], [0, 0, 1, 1], [], []>} : vector<16x512xbf16>, vector<512x64xbf16>, vector<16x64xf32> -> vector<16x64xf32>
    %c0_10 = arith.constant 0 : index
    %c0_11 = arith.constant 0 : index
    %13 = vector.load %arg8[%c0_10, %c0_11] : memref<1x64xf32, #tpu.memory_space<vmem>>, vector<1x64xf32>
    %14 = vector.broadcast %13 : vector<1x64xf32> to vector<16x64xf32>
    %15 = arith.addf %12, %14 : vector<16x64xf32>
    %16 = vector.shape_cast %15 : vector<16x64xf32> to vector<2x8x64xf32>
    %c0_12 = arith.constant 0 : index
    %c0_13 = arith.constant 0 : index
    %c0_14 = arith.constant 0 : index
    %17 = vector.load %arg4[%c0_12, %c0_13, %c0_14] : memref<2x8x1024xf32, #tpu.memory_space<vmem>>, vector<2x8x1024xf32>
    %18 = vector.shape_cast %17 : vector<2x8x1024xf32> to vector<16x1024xf32>
    %19 = arith.truncf %18 : vector<16x1024xf32> to vector<16x1024xbf16>
    %c0_15 = arith.constant 0 : index
    %c0_16 = arith.constant 0 : index
    %20 = vector.load %arg9[%c0_15, %c0_16] : memref<1024x512xbf16, #tpu.memory_space<vmem>>, vector<1024x512xbf16>
    %cst_17 = arith.constant dense<0.000000e+00> : vector<16x512xf32>
    %21 = tpu.matmul %19, %20, %cst_17 {dimension_numbers = #tpu.dot_dimension_numbers<[1], [0], [0], [1], [0, 0, 1, 1], [], []>} : vector<16x1024xbf16>, vector<1024x512xbf16>, vector<16x512xf32> -> vector<16x512xf32>
    %c0_18 = arith.constant 0 : index
    %c0_19 = arith.constant 0 : index
    %22 = vector.load %arg10[%c0_18, %c0_19] : memref<1x512xf32, #tpu.memory_space<vmem>>, vector<1x512xf32>
    %23 = vector.broadcast %22 : vector<1x512xf32> to vector<16x512xf32>
    %24 = arith.addf %21, %23 : vector<16x512xf32>
    %cst_20 = arith.constant 0.000000e+00 : f32
    %25 = vector.broadcast %cst_20 : f32 to vector<16x512xf32>
    %26 = arith.maximumf %24, %25 : vector<16x512xf32>
    %27 = vector.shape_cast %26 : vector<16x512xf32> to vector<2x8x512xf32>
    %cst_21 = arith.constant dense<0.000000e+00> : vector<2x512xf32>
    %28 = vector.multi_reduction <add>, %27, %cst_21 [1] : vector<2x8x512xf32> to vector<2x512xf32>
    %cst_22 = arith.constant 8.000000e+00 : f32
    %29 = vector.broadcast %cst_22 : f32 to vector<2x512xf32>
    %30 = arith.divf %28, %29 : vector<2x512xf32>
    %31 = arith.truncf %30 : vector<2x512xf32> to vector<2x512xbf16>
    %c0_23 = arith.constant 0 : index
    %c0_24 = arith.constant 0 : index
    %32 = vector.load %arg11[%c0_23, %c0_24] : memref<512x64xbf16, #tpu.memory_space<vmem>>, vector<512x64xbf16>
    %cst_25 = arith.constant dense<0.000000e+00> : vector<2x64xf32>
    %33 = tpu.matmul %31, %32, %cst_25 {dimension_numbers = #tpu.dot_dimension_numbers<[1], [0], [0], [1], [0, 0, 1, 1], [], []>} : vector<2x512xbf16>, vector<512x64xbf16>, vector<2x64xf32> -> vector<2x64xf32>
    %c0_26 = arith.constant 0 : index
    %c0_27 = arith.constant 0 : index
    %34 = vector.load %arg12[%c0_26, %c0_27] : memref<1x64xf32, #tpu.memory_space<vmem>>, vector<1x64xf32>
    %35 = vector.broadcast %34 : vector<1x64xf32> to vector<2x64xf32>
    %36 = arith.addf %33, %35 : vector<2x64xf32>
    %37 = vector.shape_cast %36 : vector<2x64xf32> to vector<2x1x64xf32>
    %38 = vector.broadcast %37 : vector<2x1x64xf32> to vector<2x8x64xf32>
    %39 = arith.mulf %38, %16 : vector<2x8x64xf32>
    %cst_28 = arith.constant dense<0.000000e+00> : vector<2x8xf32>
    %40 = vector.multi_reduction <add>, %39, %cst_28 [2] : vector<2x8x64xf32> to vector<2x8xf32>
    %cst_29 = arith.constant dense<0xFF800000> : vector<2xf32>
    %41 = vector.multi_reduction <maximumf>, %40, %cst_29 [1] : vector<2x8xf32> to vector<2xf32>
    %42 = vector.shape_cast %41 : vector<2xf32> to vector<2x1xf32>
    %43 = vector.broadcast %42 : vector<2x1xf32> to vector<2x8xf32>
    %44 = arith.subf %40, %43 : vector<2x8xf32>
    %45 = math.exp %44 : vector<2x8xf32>
    %cst_30 = arith.constant dense<0.000000e+00> : vector<2xf32>
    %46 = vector.multi_reduction <add>, %45, %cst_30 [1] : vector<2x8xf32> to vector<2xf32>
    %47 = vector.shape_cast %46 : vector<2xf32> to vector<2x1xf32>
    %48 = tpu.reciprocal %47 {approx = true} : vector<2x1xf32> -> vector<2x1xf32>
    %49 = vector.broadcast %48 : vector<2x1xf32> to vector<2x8xf32>
    %50 = arith.mulf %45, %49 : vector<2x8xf32>
    %51 = vector.shape_cast %50 : vector<2x8xf32> to vector<2x8x1xf32>
    %c0_31 = arith.constant 0 : index
    %c0_32 = arith.constant 0 : index
    %c0_33 = arith.constant 0 : index
    %52 = vector.load %arg1[%c0_31, %c0_32, %c0_33] : memref<2x8x1024xf32, #tpu.memory_space<vmem>>, vector<2x8x1024xf32>
    %53 = vector.broadcast %51 : vector<2x8x1xf32> to vector<2x8x1024xf32>
    %54 = arith.mulf %53, %52 : vector<2x8x1024xf32>
    %cst_34 = arith.constant dense<0.000000e+00> : vector<2x1024xf32>
    %55 = vector.multi_reduction <add>, %54, %cst_34 [1] : vector<2x8x1024xf32> to vector<2x1024xf32>
    %c0_35 = arith.constant 0 : index
    %c0_36 = arith.constant 0 : index
    %c0_37 = arith.constant 0 : index
    %56 = vector.load %arg3[%c0_35, %c0_36, %c0_37] : memref<2x8x1024xf32, #tpu.memory_space<vmem>>, vector<2x8x1024xf32>
    %cst_38 = arith.constant dense<0.000000e+00> : vector<2x1024xf32>
    %57 = vector.multi_reduction <add>, %56, %cst_38 [1] : vector<2x8x1024xf32> to vector<2x1024xf32>
    %cst_39 = arith.constant 8.000000e+00 : f32
    %58 = vector.broadcast %cst_39 : f32 to vector<2x1024xf32>
    %59 = arith.divf %57, %58 : vector<2x1024xf32>
    %60 = arith.truncf %59 : vector<2x1024xf32> to vector<2x1024xbf16>
    %c0_40 = arith.constant 0 : index
    %c0_41 = arith.constant 0 : index
    %61 = vector.load %arg13[%c0_40, %c0_41] : memref<2x1024xbf16, #tpu.memory_space<vmem>>, vector<2x1024xbf16>
    %cst_42 = arith.constant dense<0.000000e+00> : vector<2x2xf32>
    %62 = tpu.matmul %60, %61, %cst_42 {dimension_numbers = #tpu.dot_dimension_numbers<[1], [1], [0], [0], [0, 0, 1, 0], [], []>} : vector<2x1024xbf16>, vector<2x1024xbf16>, vector<2x2xf32> -> vector<2x2xf32>
    %63 = arith.truncf %55 : vector<2x1024xf32> to vector<2x1024xbf16>
    %c0_43 = arith.constant 0 : index
    %c0_44 = arith.constant 0 : index
    %64 = vector.load %arg14[%c0_43, %c0_44] : memref<2x1024xbf16, #tpu.memory_space<vmem>>, vector<2x1024xbf16>
    %cst_45 = arith.constant dense<0.000000e+00> : vector<2x2xf32>
    %65 = tpu.matmul %63, %64, %cst_45 {dimension_numbers = #tpu.dot_dimension_numbers<[1], [1], [0], [0], [0, 0, 1, 0], [], []>} : vector<2x1024xbf16>, vector<2x1024xbf16>, vector<2x2xf32> -> vector<2x2xf32>
    %66 = arith.addf %62, %65 : vector<2x2xf32>
    %c0_46 = arith.constant 0 : index
    %c0_47 = arith.constant 0 : index
    %67 = vector.load %arg15[%c0_46, %c0_47] : memref<1x2xf32, #tpu.memory_space<vmem>>, vector<1x2xf32>
    %68 = vector.broadcast %67 : vector<1x2xf32> to vector<2x2xf32>
    %69 = arith.addf %66, %68 : vector<2x2xf32>
    %c0_48 = arith.constant 0 : index
    %c0_49 = arith.constant 0 : index
    %70 = vector.load %arg16[%c0_48, %c0_49] : memref<2x2xf32, #tpu.memory_space<vmem>>, vector<2x2xf32>
    tpu.vector_store %arg16[%c0_48, %c0_49], %69 {strides = array<i32>} : memref<2x2xf32, #tpu.memory_space<vmem>>, vector<2x2xf32>,
    %c0_50 = arith.constant 0 : index
    %c0_51 = arith.constant 0 : index
    %71 = vector.load %arg17[%c0_50, %c0_51] : memref<2x8xf32, #tpu.memory_space<vmem>>, vector<2x8xf32>
    tpu.vector_store %arg17[%c0_50, %c0_51], %50 {strides = array<i32>} : memref<2x8xf32, #tpu.memory_space<vmem>>, vector<2x8xf32>,
    return
  }
  func.func @transform_0(%arg0: i32) -> (i32, i32, i32) {
    %c0_i32 = arith.constant 0 : i32
    %c0_i32_0 = arith.constant 0 : i32
    %c0_i32_1 = arith.constant 0 : i32
    return %arg0, %c0_i32, %c0_i32_0 : i32, i32, i32
  }
  func.func @transform_1(%arg0: i32) -> (i32, i32, i32) {
    %c0_i32 = arith.constant 0 : i32
    %c0_i32_0 = arith.constant 0 : i32
    %c0_i32_1 = arith.constant 0 : i32
    return %arg0, %c0_i32, %c0_i32_0 : i32, i32, i32
  }
  func.func @transform_2(%arg0: i32) -> (i32, i32, i32) {
    %c0_i32 = arith.constant 0 : i32
    %c0_i32_0 = arith.constant 0 : i32
    %c0_i32_1 = arith.constant 0 : i32
    return %arg0, %c0_i32, %c0_i32_0 : i32, i32, i32
  }
  func.func @transform_3(%arg0: i32) -> (i32, i32, i32) {
    %c0_i32 = arith.constant 0 : i32
    %c0_i32_0 = arith.constant 0 : i32
    %c0_i32_1 = arith.constant 0 : i32
    return %arg0, %c0_i32, %c0_i32_0 : i32, i32, i32
  }
  func.func @transform_4(%arg0: i32) -> (i32, i32) {
    %c0_i32 = arith.constant 0 : i32
    %c0_i32_0 = arith.constant 0 : i32
    %c0_i32_1 = arith.constant 0 : i32
    return %c0_i32, %c0_i32_0 : i32, i32
  }
  func.func @transform_5(%arg0: i32) -> (i32, i32) {
    %c0_i32 = arith.constant 0 : i32
    %c0_i32_0 = arith.constant 0 : i32
    %c0_i32_1 = arith.constant 0 : i32
    return %c0_i32, %c0_i32_0 : i32, i32
  }
  func.func @transform_6(%arg0: i32) -> (i32, i32) {
    %c0_i32 = arith.constant 0 : i32
    %c0_i32_0 = arith.constant 0 : i32
    %c0_i32_1 = arith.constant 0 : i32
    return %c0_i32, %c0_i32_0 : i32, i32
  }
  func.func @transform_7(%arg0: i32) -> (i32, i32) {
    %c0_i32 = arith.constant 0 : i32
    %c0_i32_0 = arith.constant 0 : i32
    %c0_i32_1 = arith.constant 0 : i32
    return %c0_i32, %c0_i32_0 : i32, i32
  }
  func.func @transform_8(%arg0: i32) -> (i32, i32) {
    %c0_i32 = arith.constant 0 : i32
    %c0_i32_0 = arith.constant 0 : i32
    %c0_i32_1 = arith.constant 0 : i32
    return %c0_i32, %c0_i32_0 : i32, i32
  }
  func.func @transform_9(%arg0: i32) -> (i32, i32) {
    %c0_i32 = arith.constant 0 : i32
    %c0_i32_0 = arith.constant 0 : i32
    %c0_i32_1 = arith.constant 0 : i32
    return %c0_i32, %c0_i32_0 : i32, i32
  }
  func.func @transform_10(%arg0: i32) -> (i32, i32) {
    %c0_i32 = arith.constant 0 : i32
    %c0_i32_0 = arith.constant 0 : i32
    %c0_i32_1 = arith.constant 0 : i32
    return %c0_i32, %c0_i32_0 : i32, i32
  }
  func.func @transform_11(%arg0: i32) -> (i32, i32) {
    %c0_i32 = arith.constant 0 : i32
    %c0_i32_0 = arith.constant 0 : i32
    %c0_i32_1 = arith.constant 0 : i32
    return %c0_i32, %c0_i32_0 : i32, i32
  }
  func.func @transform_12(%arg0: i32) -> (i32, i32) {
    %c0_i32 = arith.constant 0 : i32
    %c0_i32_0 = arith.constant 0 : i32
    %c0_i32_1 = arith.constant 0 : i32
    return %c0_i32, %c0_i32_0 : i32, i32
  }
  func.func @transform_13(%arg0: i32) -> (i32, i32) {
    %c0_i32 = arith.constant 0 : i32
    %c0_i32_0 = arith.constant 0 : i32
    %c0_i32_1 = arith.constant 0 : i32
    return %c0_i32, %c0_i32_0 : i32, i32
  }
  func.func @transform_14(%arg0: i32) -> (i32, i32) {
    %c0_i32 = arith.constant 0 : i32
    %c0_i32_0 = arith.constant 0 : i32
    %c0_i32_1 = arith.constant 0 : i32
    return %c0_i32, %c0_i32_0 : i32, i32
  }
  func.func @transform_15(%arg0: i32) -> (i32, i32) {
    %c0_i32 = arith.constant 0 : i32
    %c0_i32_0 = arith.constant 0 : i32
    return %arg0, %c0_i32 : i32, i32
  }
  func.func @transform_16(%arg0: i32) -> (i32, i32) {
    %c0_i32 = arith.constant 0 : i32
    %c0_i32_0 = arith.constant 0 : i32
    return %arg0, %c0_i32 : i32, i32
  }
}

</mosaic_0001>

<bundles_post_ra>
// kernel: tpu_custom_call.1
= control target key start
LH: loop header
LB: loop body
LE: loop exit
PB: predicated region body
PF: predicated region fallthrough
CT: control target
= control target key end

     0   :  { %s8208_s0 = inlined_call_operand.vmem [shape: f32[2,8,1024], index: 0, kind: input, shape index: {}]   ;;  %s8209_s1 = inlined_call_operand.vmem [shape: f32[2,8,1024], index: 1, kind: input, shape index: {}]   ;;  %s8210_s2 = inlined_call_operand.vmem [shape: f32[2,8,1024], index: 2, kind: input, shape index: {}]   ;;  %s8211_s3 = inlined_call_operand.vmem [shape: f32[2,8,1024], index: 3, kind: input, shape index: {}]   ;;  %s8212_s4 = inlined_call_operand.hbm [shape: bf16[1024,512], index: 4, kind: input, shape index: {}]   ;;  %s8213_s5 = inlined_call_operand.vmem [shape: f32[1,512], index: 5, kind: input, shape index: {}]   ;;  %s8214_s6 = inlined_call_operand.vmem [shape: bf16[512,64], index: 6, kind: input, shape index: {}]   ;;  %s8215_s7 = inlined_call_operand.vmem [shape: f32[1,64], index: 7, kind: input, shape index: {}]   ;;  %s8216_s8 = inlined_call_operand.hbm [shape: bf16[1024,512], index: 8, kind: input, shape index: {}]   ;;  %s8217_s9 = inlined_call_operand.vmem [shape: f32[1,512], index: 9, kind: input, shape index: {}]   ;;  %s8218_s10 = inlined_call_operand.vmem [shape: bf16[512,64], index: 10, kind: input, shape index: {}]   ;;  %s8219_s11 = inlined_call_operand.vmem [shape: f32[1,64], index: 11, kind: input, shape index: {}]   ;;  %s8220_s12 = inlined_call_operand.vmem [shape: bf16[2,1024], index: 12, kind: input, shape index: {}]   ;;  %s8221_s13 = inlined_call_operand.vmem [shape: bf16[2,1024], index: 13, kind: input, shape index: {}]   ;;  %s8222_s14 = inlined_call_operand.vmem [shape: f32[1,2], index: 14, kind: input, shape index: {}]   ;;  %s8223_s15 = inlined_call_operand.hbm [shape: f32[2,2], index: 15, kind: output, shape index: {0}]   ;;  %s8224_s16 = inlined_call_operand.hbm [shape: f32[2,8], index: 16, kind: output, shape index: {1}]  }
   0x1   :  { %8226 = sst [smem:[#allocation14_spill]] %s8208_s0 }
   0x2   :  { %22 = vsyncpa [#allocation3], 0 }
   0x3   :  { %23 = vsyncpa [#allocation6], 0 }
   0x4   :  { %24 = vsyncpa [#allocation4], 0 }
   0x5   :  { %25 = vsyncpa [#allocation9], 0  ;;  %s7425_s21 = smov [#allocation2]   ;;  %s7329_s25 = scalar_lea.hbm %s8212_s4, 32768 }
   0x6   :  { %s39_s22 = sshll.u32 %s7425_s21, 4  ;;  %p7330_p0 = scmp.ne.s32.totalorder %s8212_s4, %s7329_s25  ;;  %s40_s22 = int_to_ptr.vmem [resolvable:$true] %s39_s22 }
   0x7   :  { %p7333_p1 = scmp.lt.u32.totalorder %s7329_s25, %s8212_s4 }
   0x9   :  { %p7335_p2 = pnand %p7333_p1, %p7330_p0 }
   0xb   :  { %7338 = shalt.err (!%p7335_p2)
}
   0xc   :  { %s7339_s30 = scalar_lea.vmem %s40_s22, 32768  ;;  %p7344_p4 = scmp.lt.s32.totalorder %s40_s22, %s40_s22 }
   0xd   :  { %p7340_p3 = scmp.ne.s32.totalorder %s40_s22, %s7339_s30  ;;  %p7345_p5 = scmp.lt.s32.totalorder %s7339_s30, %s7339_s30 }
   0xf   :  { %p7346_p6 = por %p7345_p5, %p7344_p4 }
  0x11   :  { %p7347_p7 = pnand %p7346_p6, %p7340_p3 }
  0x13   :  { %7350 = shalt.err (!%p7347_p7)
}
  0x14   :  { %s7426_s0 = smov 256   ;;  %s7427_s17 = smov 16  }
  0x15   :  { %45 = dma.hbm_to_vmem [thread:$0]  %s8212_s4, 32768, %s40_s22, [#allocation3], %s7426_s0, %s7426_s0, %s7427_s17  }
  0x16   :  { %s7428_s20 = smov [#allocation5]   ;;  %s7351_s25 = scalar_lea.hbm %s8216_s8, 32768 }
  0x17   :  { %s57_s21 = sshll.u32 %s7428_s20, 4  ;;  %p7352_p8 = scmp.ne.s32.totalorder %s8216_s8, %s7351_s25  ;;  %s58_s21 = int_to_ptr.vmem [resolvable:$true] %s57_s21 }
  0x18   :  { %p7355_p9 = scmp.lt.u32.totalorder %s7351_s25, %s8216_s8 }
  0x1a   :  { %p7357_p10 = pnand %p7355_p9, %p7352_p8 }
  0x1c   :  { %7360 = shalt.err (!%p7357_p10)
}
  0x1d   :  { %s7361_s30 = scalar_lea.vmem %s58_s21, 32768  ;;  %p7366_p12 = scmp.lt.s32.totalorder %s58_s21, %s58_s21 }
  0x1e   :  { %p7362_p11 = scmp.ne.s32.totalorder %s58_s21, %s7361_s30  ;;  %p7367_p13 = scmp.lt.s32.totalorder %s7361_s30, %s7361_s30 }
  0x20   :  { %p7368_p0 = por %p7367_p13, %p7366_p12 }
  0x22   :  { %p7369_p1 = pnand %p7368_p0, %p7362_p11 }
  0x24   :  { %7372 = shalt.err (!%p7369_p1)
}
  0x25   :  { %63 = dma.hbm_to_vmem [thread:$0]  %s8216_s8, 32768, %s58_s21, [#allocation6], %s7426_s0, %s7426_s0, %s7427_s17  }
  0x26   :  { %7417 = dma.done.wait [#allocation3], 32768  }
  0x27   :  { %7418 = vsyncadd [#allocation3], 4294934528 }
  0x28   :  { %7419 = dma.done.wait [#allocation6], 32768  }
  0x29   :  { %7420 = vsyncadd [#allocation6], 4294934528  ;;  %v6489_v0 = vld [vmem:[#allocation2 + $0x4] ss:$16 sps:$4 sm:$0xff]   ;;  %v6491_v1 = vld [vmem:[#allocation2 + $0xc] ss:$16 sps:$4 sm:$0xff]  }
  0x2a   :  { %1665 = vmatprep.subr.bf16.mxu0 %v6489_v0  ;;  %v6493_v2 = vld [vmem:[#allocation2] ss:$16 sps:$4 sm:$0xff]   ;;  %v6494_v3 = vld [vmem:[#allocation2 + $0x8] ss:$16 sps:$4 sm:$0xff]   ;;  %1837 = vmatprep.subr.bf16.mxu1 %v6491_v1  ;;  %v6495_v4 = vld [vmem:[#allocation2 + $0x24] ss:$16 sps:$4 sm:$0xff]  }
  0x2b   :  { %1666 = vmatpush1.bf16.msra.mxu0 %v6493_v2  ;;  %1838 = vmatpush1.bf16.msra.mxu1 %v6494_v3  ;;  %v6497_v5 = vld [vmem:[#allocation2 + $0x2c] ss:$16 sps:$4 sm:$0xff]   ;;  %v6499_v6 = vld [vmem:[#allocation2 + $0x20] ss:$16 sps:$4 sm:$0xff]   ;;  %v6500_v7 = vld [vmem:[#allocation2 + $0x28] ss:$16 sps:$4 sm:$0xff]  }
  0x2c   :  { %1667 = vmatprep.subr.bf16.mxu0 %v6495_v4  ;;  %1839 = vmatprep.subr.bf16.mxu1 %v6497_v5  ;;  %v6501_v8 = vld [vmem:[#allocation2 + $0x44] ss:$16 sps:$4 sm:$0xff]   ;;  %v6503_v9 = vld [vmem:[#allocation2 + $0x4c] ss:$16 sps:$4 sm:$0xff]   ;;  %v6505_v10 = vld [vmem:[#allocation2 + $0x40] ss:$16 sps:$4 sm:$0xff]  }
  0x2d   :  { %v6506_v11 = vld [vmem:[#allocation2 + $0x48] ss:$16 sps:$4 sm:$0xff]   ;;  %v6507_v12 = vld [vmem:[#allocation2 + $0x64] ss:$16 sps:$4 sm:$0xff]   ;;  %v6509_v13 = vld [vmem:[#allocation2 + $0x6c] ss:$16 sps:$4 sm:$0xff]  }
  0x2e   :  { %v6511_v14 = vld [vmem:[#allocation2 + $0x60] ss:$16 sps:$4 sm:$0xff]   ;;  %v6512_v15 = vld [vmem:[#allocation2 + $0x68] ss:$16 sps:$4 sm:$0xff]   ;;  %v6513_v16 = vld [vmem:[#allocation2 + $0x84] ss:$16 sps:$4 sm:$0xff]  }
  0x2f   :  { %1668 = vmatpush1.bf16.msra.mxu0 %v6499_v6  ;;  %1840 = vmatpush1.bf16.msra.mxu1 %v6500_v7  ;;  %v6515_v17 = vld [vmem:[#allocation2 + $0x8c] ss:$16 sps:$4 sm:$0xff]   ;;  %v6517_v18 = vld [vmem:[#allocation2 + $0x80] ss:$16 sps:$4 sm:$0xff]   ;;  %v6518_v19 = vld [vmem:[#allocation2 + $0x88] ss:$16 sps:$4 sm:$0xff]  }
  0x30   :  { %1669 = vmatprep.subr.bf16.mxu0 %v6501_v8  ;;  %1841 = vmatprep.subr.bf16.mxu1 %v6503_v9  ;;  %v6519_v20 = vld [vmem:[#allocation2 + $0xa4] ss:$16 sps:$4 sm:$0xff]   ;;  %v6521_v21 = vld [vmem:[#allocation2 + $0xac] ss:$16 sps:$4 sm:$0xff]   ;;  %v6523_v22 = vld [vmem:[#allocation2 + $0xa0] ss:$16 sps:$4 sm:$0xff]  }
  0x31   :  { %v6524_v23 = vld [vmem:[#allocation2 + $0xa8] ss:$16 sps:$4 sm:$0xff]   ;;  %v6525_v24 = vld [vmem:[#allocation2 + $0xc4] ss:$16 sps:$4 sm:$0xff]   ;;  %v6527_v25 = vld [vmem:[#allocation2 + $0xcc] ss:$16 sps:$4 sm:$0xff]  }
  0x32   :  { %v6529_v26 = vld [vmem:[#allocation2 + $0xc0] ss:$16 sps:$4 sm:$0xff]   ;;  %v6530_v27 = vld [vmem:[#allocation2 + $0xc8] ss:$16 sps:$4 sm:$0xff]   ;;  %v6531_v28 = vld [vmem:[#allocation2 + $0xe4] ss:$16 sps:$4 sm:$0xff]  }
  0x33   :  { %1670 = vmatpush1.bf16.msra.mxu0 %v6505_v10  ;;  %1842 = vmatpush1.bf16.msra.mxu1 %v6506_v11  ;;  %v6533_v29 = vld [vmem:[#allocation2 + $0xec] ss:$16 sps:$4 sm:$0xff]   ;;  %v6535_v30 = vld [vmem:[#allocation2 + $0xe0] ss:$16 sps:$4 sm:$0xff]   ;;  %v6536_v31 = vld [vmem:[#allocation2 + $0xe8] ss:$16 sps:$4 sm:$0xff]  }
  0x34   :  { %1671 = vmatprep.subr.bf16.mxu0 %v6507_v12  ;;  %1843 = vmatprep.subr.bf16.mxu1 %v6509_v13  ;;  %v6537_v32 = vld [vmem:[#allocation2 + $0x104] ss:$16 sps:$4 sm:$0xff]   ;;  %v6539_v33 = vld [vmem:[#allocation2 + $0x10c] ss:$16 sps:$4 sm:$0xff]   ;;  %v6541_v34 = vld [vmem:[#allocation2 + $0x100] ss:$16 sps:$4 sm:$0xff]  }
  0x35   :  { %v6542_v35 = vld [vmem:[#allocation2 + $0x108] ss:$16 sps:$4 sm:$0xff]   ;;  %v6543_v36 = vld [vmem:[#allocation2 + $0x124] ss:$16 sps:$4 sm:$0xff]   ;;  %v6545_v37 = vld [vmem:[#allocation2 + $0x12c] ss:$16 sps:$4 sm:$0xff]  }
  0x36   :  { %v6547_v38 = vld [vmem:[#allocation2 + $0x120] ss:$16 sps:$4 sm:$0xff]   ;;  %v6548_v39 = vld [vmem:[#allocation2 + $0x128] ss:$16 sps:$4 sm:$0xff]   ;;  %v6549_v40 = vld [vmem:[#allocation2 + $0x144] ss:$16 sps:$4 sm:$0xff]  }
  0x37   :  { %1672 = vmatpush1.bf16.msra.mxu0 %v6511_v14  ;;  %1844 = vmatpush1.bf16.msra.mxu1 %v6512_v15  ;;  %v6551_v41 = vld [vmem:[#allocation2 + $0x14c] ss:$16 sps:$4 sm:$0xff]   ;;  %v6553_v42 = vld [vmem:[#allocation2 + $0x140] ss:$16 sps:$4 sm:$0xff]   ;;  %v6554_v43 = vld [vmem:[#allocation2 + $0x148] ss:$16 sps:$4 sm:$0xff]  }
  0x38   :  { %1673 = vmatprep.subr.bf16.mxu0 %v6513_v16  ;;  %1845 = vmatprep.subr.bf16.mxu1 %v6515_v17  ;;  %v6555_v44 = vld [vmem:[#allocation2 + $0x164] ss:$16 sps:$4 sm:$0xff]   ;;  %v6557_v45 = vld [vmem:[#allocation2 + $0x16c] ss:$16 sps:$4 sm:$0xff]   ;;  %v6559_v48 = vld [vmem:[#allocation2 + $0x160] ss:$16 sps:$4 sm:$0xff]  }
  0x39   :  { %v84_v46 = vld [vmem:[%s8209_s1 + $0x8] sm:$0xff]  ;;  %v6561_v51 = vld [vmem:[#allocation2 + $0x184] ss:$16 sps:$4 sm:$0xff]   ;;  %v6565_v53 = vld [vmem:[#allocation2 + $0x180] ss:$16 sps:$4 sm:$0xff]   ;;  %vm4452_vm0 = vcmask 1041409  }
  0x3a   :  { %v92_v47 = vld [vmem:[%s8209_s1 + $0x48] sm:$0xff]  ;;  %v6567_v55 = vld [vmem:[#allocation2 + $0x1a4] ss:$16 sps:$4 sm:$0xff]   ;;  %v6571_v57 = vld [vmem:[#allocation2 + $0x1a0] ss:$16 sps:$4 sm:$0xff]   ;;  %vm4772_vm1 = vcmask 523264  }
  0x3b   :  { %1674 = vmatpush1.bf16.msra.mxu0 %v6517_v18  ;;  %1846 = vmatpush1.bf16.msra.mxu1 %v6518_v19  ;;  %v6560_v49 = vld [vmem:[#allocation2 + $0x168] ss:$16 sps:$4 sm:$0xff]   ;;  %v100_v50 = vpack.c.bf16 %v92_v47, %v84_v46  ;;  %v6563_v52 = vld [vmem:[#allocation2 + $0x18c] ss:$16 sps:$4 sm:$0xff]   ;;  %v6573_v59 = vld [vmem:[#allocation2 + $0x1c4] ss:$16 sps:$4 sm:$0xff]  }
  0x3c   :  { %1675 = vmatprep.subr.bf16.mxu0 %v6519_v20  ;;  %1847 = vmatprep.subr.bf16.mxu1 %v6521_v21  ;;  %v6566_v54 = vld [vmem:[#allocation2 + $0x188] ss:$16 sps:$4 sm:$0xff]   ;;  %v6569_v56 = vld [vmem:[#allocation2 + $0x1ac] ss:$16 sps:$4 sm:$0xff]   ;;  %v6577_v61 = vld [vmem:[#allocation2 + $0x1c0] ss:$16 sps:$4 sm:$0xff]  }
  0x3d   :  { %1697 = vmatprep.mubr.bf16.mxu0 %v100_v50  ;;  %1869 = vmatprep.mubr.bf16.mxu1 %v100_v50  ;;  %v6572_v58 = vld [vmem:[#allocation2 + $0x1a8] ss:$16 sps:$4 sm:$0xff]   ;;  %v6575_v60 = vld [vmem:[#allocation2 + $0x1cc] ss:$16 sps:$4 sm:$0xff]   ;;  %v6579_v63 = vld [vmem:[#allocation2 + $0x1e4] ss:$16 sps:$4 sm:$0xff]  }
  0x3e   :  { %v6578_v62 = vld [vmem:[#allocation2 + $0x1c8] ss:$16 sps:$4 sm:$0xff]   ;;  %v6581_v0 = vld [vmem:[#allocation2 + $0x1ec] ss:$16 sps:$4 sm:$0xff]   ;;  %v6583_v1 = vld [vmem:[#allocation2 + $0x1e0] ss:$16 sps:$4 sm:$0xff]  }
  0x3f   :  { %1676 = vmatpush1.bf16.msra.mxu0 %v6523_v22  ;;  %1848 = vmatpush1.bf16.msra.mxu1 %v6524_v23  ;;  %v6584_v2 = vld [vmem:[#allocation2 + $0x1e8] ss:$16 sps:$4 sm:$0xff]   ;;  %v6587_v3 = vld [vmem:[#allocation2 + $0x204] ss:$16 sps:$4 sm:$0xff]   ;;  %v6590_v6 = vld [vmem:[#allocation2 + $0x20c] ss:$16 sps:$4 sm:$0xff]  }
  0x40   :  { %1677 = vmatprep.subr.bf16.mxu0 %v6525_v24  ;;  %1849 = vmatprep.subr.bf16.mxu1 %v6527_v25  ;;  %v83_v4 = vld [vmem:[%s8209_s1] sm:$0xff]  ;;  %v6588_v8 = vld [vmem:[#allocation2 + $0x208] ss:$16 sps:$4 sm:$0xff]   ;;  %v6596_v11 = vld [vmem:[#allocation2 + $0x22c] ss:$16 sps:$4 sm:$0xff]   ;;  %vm4793_vm2 = vcmask 58368  }
  0x41   :  { %v91_v5 = vld [vmem:[%s8209_s1 + $0x40] sm:$0xff]  ;;  %v6594_v13 = vld [vmem:[#allocation2 + $0x228] ss:$16 sps:$4 sm:$0xff]   ;;  %v6602_v15 = vld [vmem:[#allocation2 + $0x24c] ss:$16 sps:$4 sm:$0xff]  }
  0x42   :  { %v6585_v7 = vld [vmem:[#allocation2 + $0x200] ss:$16 sps:$4 sm:$0xff]   ;;  %v99_v9 = vpack.c.bf16 %v91_v5, %v83_v4  ;;  %v6593_v10 = vld [vmem:[#allocation2 + $0x224] ss:$16 sps:$4 sm:$0xff]   ;;  %v6600_v17 = vld [vmem:[#allocation2 + $0x248] ss:$16 sps:$4 sm:$0xff]  }
  0x43   :  { %1678 = vmatpush1.bf16.msra.mxu0 %v6529_v26  ;;  %1850 = vmatpush1.bf16.msra.mxu1 %v6530_v27  ;;  %v6591_v12 = vld [vmem:[#allocation2 + $0x220] ss:$16 sps:$4 sm:$0xff]   ;;  %v6599_v14 = vld [vmem:[#allocation2 + $0x244] ss:$16 sps:$4 sm:$0xff]   ;;  %v6608_v19 = vld [vmem:[#allocation2 + $0x26c] ss:$16 sps:$4 sm:$0xff]  }
  0x44   :  { %1679 = vmatprep.subr.bf16.mxu0 %v6531_v28  ;;  %1851 = vmatprep.subr.bf16.mxu1 %v6533_v29  ;;  %v6597_v16 = vld [vmem:[#allocation2 + $0x240] ss:$16 sps:$4 sm:$0xff]   ;;  %v6605_v18 = vld [vmem:[#allocation2 + $0x264] ss:$16 sps:$4 sm:$0xff]   ;;  %v6606_v21 = vld [vmem:[#allocation2 + $0x268] ss:$16 sps:$4 sm:$0xff]  }
  0x45   :  { %v6603_v20 = vld [vmem:[#allocation2 + $0x260] ss:$16 sps:$4 sm:$0xff]   ;;  %v6611_v22 = vld [vmem:[#allocation2 + $0x284] ss:$16 sps:$4 sm:$0xff]   ;;  %v6614_v23 = vld [vmem:[#allocation2 + $0x28c] ss:$16 sps:$4 sm:$0xff]  }
  0x46   :  { %v6609_v24 = vld [vmem:[#allocation2 + $0x280] ss:$16 sps:$4 sm:$0xff]   ;;  %v6612_v25 = vld [vmem:[#allocation2 + $0x288] ss:$16 sps:$4 sm:$0xff]   ;;  %v6617_v26 = vld [vmem:[#allocation2 + $0x2a4] ss:$16 sps:$4 sm:$0xff]  }
  0x47   :  { %1680 = vmatpush1.bf16.msra.mxu0 %v6535_v30  ;;  %1852 = vmatpush1.bf16.msra.mxu1 %v6536_v31  ;;  %v6620_v27 = vld [vmem:[#allocation2 + $0x2ac] ss:$16 sps:$4 sm:$0xff]   ;;  %v6615_v28 = vld [vmem:[#allocation2 + $0x2a0] ss:$16 sps:$4 sm:$0xff]   ;;  %v6618_v29 = vld [vmem:[#allocation2 + $0x2a8] ss:$16 sps:$4 sm:$0xff]  }
  0x48   :  { %1681 = vmatprep.subr.bf16.mxu0 %v6537_v32  ;;  %1853 = vmatprep.subr.bf16.mxu1 %v6539_v33  ;;  %v6623_v30 = vld [vmem:[#allocation2 + $0x2c4] ss:$16 sps:$4 sm:$0xff]   ;;  %v6626_v31 = vld [vmem:[#allocation2 + $0x2cc] ss:$16 sps:$4 sm:$0xff]   ;;  %v6639_v47 = vld [vmem:[#allocation2 + $0x320] ss:$16 sps:$4 sm:$0xff]  }
  0x49   :  { %v86_v32 = vld [vmem:[%s8209_s1 + $0x18] sm:$0xff]  ;;  %v6677_v5 = vld [vmem:[#allocation2 + $0x3e4] ss:$16 sps:$4 sm:$0xff]  }
  0x4a   :  { %v94_v33 = vld [vmem:[%s8209_s1 + $0x58] sm:$0xff] }
  0x4b   :  { %1682 = vmatpush1.bf16.msra.mxu0 %v6541_v34  ;;  %1854 = vmatpush1.bf16.msra.mxu1 %v6542_v35  ;;  %v6621_v34 = vld [vmem:[#allocation2 + $0x2c0] ss:$16 sps:$4 sm:$0xff]   ;;  %v6624_v35 = vld [vmem:[#allocation2 + $0x2c8] ss:$16 sps:$4 sm:$0xff]   ;;  %v6644_v46 = vld [vmem:[#allocation2 + $0x32c] ss:$16 sps:$4 sm:$0xff]  }
  0x4c   :  { %1683 = vmatprep.subr.bf16.mxu0 %v6543_v36  ;;  %1855 = vmatprep.subr.bf16.mxu1 %v6545_v37  ;;  %v102_v36 = vpack.c.bf16 %v94_v33, %v86_v32  ;;  %v6629_v37 = vld [vmem:[#allocation2 + $0x2e4] ss:$16 sps:$4 sm:$0xff]   ;;  %v6650_v50 = vld [vmem:[#allocation2 + $0x34c] ss:$16 sps:$4 sm:$0xff]   ;;  %v6672_v4 = vld [vmem:[#allocation2 + $0x3c8] ss:$16 sps:$4 sm:$0xff]  }
  0x4d   :  { %v6710_v32 = vld [vmem:[#allocation2 + $0x48c] ss:$16 sps:$4 sm:$0xff]   ;;  %v6705_v33 = vld [vmem:[#allocation2 + $0x480] ss:$16 sps:$4 sm:$0xff]  }
  0x4f   :  { %1684 = vmatpush1.bf16.msra.mxu0 %v6547_v38  ;;  %1856 = vmatpush1.bf16.msra.mxu1 %v6548_v39  ;;  %v6632_v38 = vld [vmem:[#allocation2 + $0x2ec] ss:$16 sps:$4 sm:$0xff]   ;;  %v6627_v39 = vld [vmem:[#allocation2 + $0x2e0] ss:$16 sps:$4 sm:$0xff]  }
  0x50   :  { %1685 = vmatprep.subr.bf16.mxu0 %v6549_v40  ;;  %1857 = vmatprep.subr.bf16.mxu1 %v6551_v41  ;;  %v6630_v40 = vld [vmem:[#allocation2 + $0x2e8] ss:$16 sps:$4 sm:$0xff]   ;;  %v6635_v41 = vld [vmem:[#allocation2 + $0x304] ss:$16 sps:$4 sm:$0xff]  }
  0x53   :  { %1686 = vmatpush1.bf16.msra.mxu0 %v6553_v42  ;;  %1858 = vmatpush1.bf16.msra.mxu1 %v6554_v43  ;;  %v6638_v42 = vld [vmem:[#allocation2 + $0x30c] ss:$16 sps:$4 sm:$0xff]   ;;  %v6633_v43 = vld [vmem:[#allocation2 + $0x300] ss:$16 sps:$4 sm:$0xff]  }
  0x54   :  { %1687 = vmatprep.subr.bf16.mxu0 %v6555_v44  ;;  %1859 = vmatprep.subr.bf16.mxu1 %v6557_v45  ;;  %v6636_v44 = vld [vmem:[#allocation2 + $0x308] ss:$16 sps:$4 sm:$0xff]   ;;  %v6641_v45 = vld [vmem:[#allocation2 + $0x324] ss:$16 sps:$4 sm:$0xff]  }
  0x57   :  { %1688 = vmatpush1.bf16.msra.mxu0 %v6559_v48  ;;  %1860 = vmatpush1.bf16.msra.mxu1 %v6560_v49  ;;  %v6642_v48 = vld [vmem:[#allocation2 + $0x328] ss:$16 sps:$4 sm:$0xff]   ;;  %v6647_v49 = vld [vmem:[#allocation2 + $0x344] ss:$16 sps:$4 sm:$0xff]  }
  0x58   :  { %1689 = vmatprep.subr.bf16.mxu0 %v6561_v51  ;;  %1861 = vmatprep.subr.bf16.mxu1 %v6563_v52  ;;  %v6645_v51 = vld [vmem:[#allocation2 + $0x340] ss:$16 sps:$4 sm:$0xff]   ;;  %v6648_v52 = vld [vmem:[#allocation2 + $0x348] ss:$16 sps:$4 sm:$0xff]  }
  0x5b   :  { %1690 = vmatpush1.bf16.msra.mxu0 %v6565_v53  ;;  %1862 = vmatpush1.bf16.msra.mxu1 %v6566_v54  ;;  %v6653_v53 = vld [vmem:[#allocation2 + $0x364] ss:$16 sps:$4 sm:$0xff]   ;;  %v6656_v54 = vld [vmem:[#allocation2 + $0x36c] ss:$16 sps:$4 sm:$0xff]  }
  0x5c   :  { %1691 = vmatprep.subr.bf16.mxu0 %v6567_v55  ;;  %1863 = vmatprep.subr.bf16.mxu1 %v6569_v56  ;;  %v6651_v55 = vld [vmem:[#allocation2 + $0x360] ss:$16 sps:$4 sm:$0xff]   ;;  %v6654_v56 = vld [vmem:[#allocation2 + $0x368] ss:$16 sps:$4 sm:$0xff]  }
  0x5f   :  { %1692 = vmatpush1.bf16.msra.mxu0 %v6571_v57  ;;  %1864 = vmatpush1.bf16.msra.mxu1 %v6572_v58  ;;  %v6659_v57 = vld [vmem:[#allocation2 + $0x384] ss:$16 sps:$4 sm:$0xff]   ;;  %v6662_v58 = vld [vmem:[#allocation2 + $0x38c] ss:$16 sps:$4 sm:$0xff]  }
  0x60   :  { %1693 = vmatprep.subr.bf16.mxu0 %v6573_v59  ;;  %1865 = vmatprep.subr.bf16.mxu1 %v6575_v60  ;;  %v6657_v59 = vld [vmem:[#allocation2 + $0x380] ss:$16 sps:$4 sm:$0xff]   ;;  %v6660_v60 = vld [vmem:[#allocation2 + $0x388] ss:$16 sps:$4 sm:$0xff]  }
  0x63   :  { %1694 = vmatpush1.bf16.msra.mxu0 %v6577_v61  ;;  %1866 = vmatpush1.bf16.msra.mxu1 %v6578_v62  ;;  %v6665_v61 = vld [vmem:[#allocation2 + $0x3a4] ss:$16 sps:$4 sm:$0xff]   ;;  %v6668_v62 = vld [vmem:[#allocation2 + $0x3ac] ss:$16 sps:$4 sm:$0xff]  }
  0x64   :  { %1695 = vmatprep.subr.bf16.mxu0 %v6579_v63  ;;  %1867 = vmatprep.subr.bf16.mxu1 %v6581_v0  ;;  %v6663_v63 = vld [vmem:[#allocation2 + $0x3a0] ss:$16 sps:$4 sm:$0xff]   ;;  %v6666_v0 = vld [vmem:[#allocation2 + $0x3a8] ss:$16 sps:$4 sm:$0xff]  }
  0x67   :  { %1696 = vmatpush1.bf16.msra.mxu0 %v6583_v1  ;;  %1868 = vmatpush1.bf16.msra.mxu1 %v6584_v2  ;;  %v6671_v1 = vld [vmem:[#allocation2 + $0x3c4] ss:$16 sps:$4 sm:$0xff]   ;;  %v6674_v2 = vld [vmem:[#allocation2 + $0x3cc] ss:$16 sps:$4 sm:$0xff]  }
  0x68   :  { %1708 = vmatprep.subr.bf16.mxu0 %v6587_v3  ;;  %1880 = vmatprep.subr.bf16.mxu1 %v6590_v6  ;;  %v6669_v3 = vld [vmem:[#allocation2 + $0x3c0] ss:$16 sps:$4 sm:$0xff]   ;;  %v6680_v6 = vld [vmem:[#allocation2 + $0x3ec] ss:$16 sps:$4 sm:$0xff]  }
  0x6a   :  { %1698 = vmatmul.mubr.bf16.vlgmr.msra.gmra.mrb[0].mxu0 %v99_v9  ;;  %1870 = vmatmul.mubr.bf16.vlgmr.msra.gmra.mrb[0].mxu1 %v99_v9  ;;  %v6683_v9 = vld [vmem:[#allocation2 + $0x404] ss:$16 sps:$4 sm:$0xff]  }
  0x6b   :  { %1709 = vmatpush1.bf16.msra.mxu0 %v6585_v7  ;;  %1881 = vmatpush1.bf16.msra.mxu1 %v6588_v8  ;;  %v6675_v7 = vld [vmem:[#allocation2 + $0x3e0] ss:$16 sps:$4 sm:$0xff]   ;;  %v6678_v8 = vld [vmem:[#allocation2 + $0x3e8] ss:$16 sps:$4 sm:$0xff]  }
  0x6c   :  { %1710 = vmatprep.subr.bf16.mxu0 %v6593_v10  ;;  %1882 = vmatprep.subr.bf16.mxu1 %v6596_v11  ;;  %v85_v10 = vld [vmem:[%s8209_s1 + $0x10] sm:$0xff] }
  0x6d   :  { %1740 = vmatprep.mubr.bf16.mxu0 %v102_v36  ;;  %1912 = vmatprep.mubr.bf16.mxu1 %v102_v36  ;;  %v93_v11 = vld [vmem:[%s8209_s1 + $0x50] sm:$0xff]  ;;  %v6716_v36 = vld [vmem:[#allocation2 + $0x4ac] ss:$16 sps:$4 sm:$0xff]  }
  0x6f   :  { %1711 = vmatpush1.bf16.msra.mxu0 %v6591_v12  ;;  %1883 = vmatpush1.bf16.msra.mxu1 %v6594_v13  ;;  %v6686_v12 = vld [vmem:[#allocation2 + $0x40c] ss:$16 sps:$4 sm:$0xff]   ;;  %v6681_v13 = vld [vmem:[#allocation2 + $0x400] ss:$16 sps:$4 sm:$0xff]  }
  0x70   :  { %1712 = vmatprep.subr.bf16.mxu0 %v6599_v14  ;;  %1884 = vmatprep.subr.bf16.mxu1 %v6602_v15  ;;  %v6684_v14 = vld [vmem:[#allocation2 + $0x408] ss:$16 sps:$4 sm:$0xff]   ;;  %v101_v15 = vpack.c.bf16 %v93_v11, %v85_v10  ;;  %v6773_v11 = vld [vmem:[#allocation2 + $0x5e4] ss:$16 sps:$4 sm:$0xff]  }
  0x71   :  { %v6768_v10 = vld [vmem:[#allocation2 + $0x5c8] ss:$16 sps:$4 sm:$0xff]  }
  0x73   :  { %1713 = vmatpush1.bf16.msra.mxu0 %v6597_v16  ;;  %1885 = vmatpush1.bf16.msra.mxu1 %v6600_v17  ;;  %v6689_v16 = vld [vmem:[#allocation2 + $0x424] ss:$16 sps:$4 sm:$0xff]   ;;  %v6692_v17 = vld [vmem:[#allocation2 + $0x42c] ss:$16 sps:$4 sm:$0xff]  }
  0x74   :  { %1714 = vmatprep.subr.bf16.mxu0 %v6605_v18  ;;  %1886 = vmatprep.subr.bf16.mxu1 %v6608_v19  ;;  %v88_v18 = vld [vmem:[%s8209_s1 + $0x28] sm:$0xff] }
  0x75   :  { %v96_v19 = vld [vmem:[%s8209_s1 + $0x68] sm:$0xff] }
  0x77   :  { %1715 = vmatpush1.bf16.msra.mxu0 %v6603_v20  ;;  %1887 = vmatpush1.bf16.msra.mxu1 %v6606_v21  ;;  %v6687_v20 = vld [vmem:[#allocation2 + $0x420] ss:$16 sps:$4 sm:$0xff]   ;;  %v6690_v21 = vld [vmem:[#allocation2 + $0x428] ss:$16 sps:$4 sm:$0xff]  }
  0x78   :  { %1716 = vmatprep.subr.bf16.mxu0 %v6611_v22  ;;  %1888 = vmatprep.subr.bf16.mxu1 %v6614_v23  ;;  %v104_v22 = vpack.c.bf16 %v96_v19, %v88_v18  ;;  %v6695_v23 = vld [vmem:[#allocation2 + $0x444] ss:$16 sps:$4 sm:$0xff]   ;;  %v6782_v18 = vld [vmem:[#allocation2 + $0x60c] ss:$16 sps:$4 sm:$0xff]   ;;  %v6777_v19 = vld [vmem:[#allocation2 + $0x600] ss:$16 sps:$4 sm:$0xff]  }
  0x7b   :  { %1717 = vmatpush1.bf16.msra.mxu0 %v6609_v24  ;;  %1889 = vmatpush1.bf16.msra.mxu1 %v6612_v25  ;;  %v6698_v24 = vld [vmem:[#allocation2 + $0x44c] ss:$16 sps:$4 sm:$0xff]   ;;  %v6693_v25 = vld [vmem:[#allocation2 + $0x440] ss:$16 sps:$4 sm:$0xff]  }
  0x7c   :  { %1718 = vmatprep.subr.bf16.mxu0 %v6617_v26  ;;  %1890 = vmatprep.subr.bf16.mxu1 %v6620_v27  ;;  %v6696_v26 = vld [vmem:[#allocation2 + $0x448] ss:$16 sps:$4 sm:$0xff]   ;;  %v6701_v27 = vld [vmem:[#allocation2 + $0x464] ss:$16 sps:$4 sm:$0xff]  }
  0x7f   :  { %1719 = vmatpush1.bf16.msra.mxu0 %v6615_v28  ;;  %1891 = vmatpush1.bf16.msra.mxu1 %v6618_v29  ;;  %v6704_v28 = vld [vmem:[#allocation2 + $0x46c] ss:$16 sps:$4 sm:$0xff]   ;;  %v6699_v29 = vld [vmem:[#allocation2 + $0x460] ss:$16 sps:$4 sm:$0xff]  }
  0x80   :  { %1720 = vmatprep.subr.bf16.mxu0 %v6623_v30  ;;  %1892 = vmatprep.subr.bf16.mxu1 %v6626_v31  ;;  %v6702_v30 = vld [vmem:[#allocation2 + $0x468] ss:$16 sps:$4 sm:$0xff]   ;;  %v6707_v31 = vld [vmem:[#allocation2 + $0x484] ss:$16 sps:$4 sm:$0xff]  }
  0x83   :  { %1721 = vmatpush1.bf16.msra.mxu0 %v6621_v34  ;;  %1893 = vmatpush1.bf16.msra.mxu1 %v6624_v35  ;;  %v6708_v34 = vld [vmem:[#allocation2 + $0x488] ss:$16 sps:$4 sm:$0xff]   ;;  %v6713_v35 = vld [vmem:[#allocation2 + $0x4a4] ss:$16 sps:$4 sm:$0xff]  }
  0x84   :  { %1722 = vmatprep.subr.bf16.mxu0 %v6629_v37  ;;  %1894 = vmatprep.subr.bf16.mxu1 %v6632_v38  ;;  %v6711_v37 = vld [vmem:[#allocation2 + $0x4a0] ss:$16 sps:$4 sm:$0xff]   ;;  %v6714_v38 = vld [vmem:[#allocation2 + $0x4a8] ss:$16 sps:$4 sm:$0xff]  }
  0x87   :  { %1723 = vmatpush1.bf16.msra.mxu0 %v6627_v39  ;;  %1895 = vmatpush1.bf16.msra.mxu1 %v6630_v40  ;;  %v6719_v39 = vld [vmem:[#allocation2 + $0x4c4] ss:$16 sps:$4 sm:$0xff]   ;;  %v6722_v40 = vld [vmem:[#allocation2 + $0x4cc] ss:$16 sps:$4 sm:$0xff]  }
  0x88   :  { %1724 = vmatprep.subr.bf16.mxu0 %v6635_v41  ;;  %1896 = vmatprep.subr.bf16.mxu1 %v6638_v42  ;;  %v6717_v41 = vld [vmem:[#allocation2 + $0x4c0] ss:$16 sps:$4 sm:$0xff]   ;;  %v6720_v42 = vld [vmem:[#allocation2 + $0x4c8] ss:$16 sps:$4 sm:$0xff]  }
  0x8b   :  { %1725 = vmatpush1.bf16.msra.mxu0 %v6633_v43  ;;  %1897 = vmatpush1.bf16.msra.mxu1 %v6636_v44  ;;  %v6725_v43 = vld [vmem:[#allocation2 + $0x4e4] ss:$16 sps:$4 sm:$0xff]   ;;  %v6728_v44 = vld [vmem:[#allocation2 + $0x4ec] ss:$16 sps:$4 sm:$0xff]  }
  0x8c   :  { %1726 = vmatprep.subr.bf16.mxu0 %v6641_v45  ;;  %1898 = vmatprep.subr.bf16.mxu1 %v6644_v46  ;;  %v6723_v45 = vld [vmem:[#allocation2 + $0x4e0] ss:$16 sps:$4 sm:$0xff]   ;;  %v6726_v46 = vld [vmem:[#allocation2 + $0x4e8] ss:$16 sps:$4 sm:$0xff]  }
  0x8f   :  { %1727 = vmatpush1.bf16.msra.mxu0 %v6639_v47  ;;  %1899 = vmatpush1.bf16.msra.mxu1 %v6642_v48  ;;  %v6731_v47 = vld [vmem:[#allocation2 + $0x504] ss:$16 sps:$4 sm:$0xff]   ;;  %v6734_v48 = vld [vmem:[#allocation2 + $0x50c] ss:$16 sps:$4 sm:$0xff]  }
  0x90   :  { %1728 = vmatprep.subr.bf16.mxu0 %v6647_v49  ;;  %1900 = vmatprep.subr.bf16.mxu1 %v6650_v50  ;;  %v6729_v49 = vld [vmem:[#allocation2 + $0x500] ss:$16 sps:$4 sm:$0xff]   ;;  %v6732_v50 = vld [vmem:[#allocation2 + $0x508] ss:$16 sps:$4 sm:$0xff]  }
  0x93   :  { %1729 = vmatpush1.bf16.msra.mxu0 %v6645_v51  ;;  %1901 = vmatpush1.bf16.msra.mxu1 %v6648_v52  ;;  %v6737_v51 = vld [vmem:[#allocation2 + $0x524] ss:$16 sps:$4 sm:$0xff]   ;;  %v6740_v52 = vld [vmem:[#allocation2 + $0x52c] ss:$16 sps:$4 sm:$0xff]  }
  0x94   :  { %1730 = vmatprep.subr.bf16.mxu0 %v6653_v53  ;;  %1902 = vmatprep.subr.bf16.mxu1 %v6656_v54  ;;  %v6735_v53 = vld [vmem:[#allocation2 + $0x520] ss:$16 sps:$4 sm:$0xff]   ;;  %v6738_v54 = vld [vmem:[#allocation2 + $0x528] ss:$16 sps:$4 sm:$0xff]  }
  0x97   :  { %1731 = vmatpush1.bf16.msra.mxu0 %v6651_v55  ;;  %1903 = vmatpush1.bf16.msra.mxu1 %v6654_v56  ;;  %v6743_v55 = vld [vmem:[#allocation2 + $0x544] ss:$16 sps:$4 sm:$0xff]   ;;  %v6746_v56 = vld [vmem:[#allocation2 + $0x54c] ss:$16 sps:$4 sm:$0xff]  }
  0x98   :  { %1732 = vmatprep.subr.bf16.mxu0 %v6659_v57  ;;  %1904 = vmatprep.subr.bf16.mxu1 %v6662_v58  ;;  %v6741_v57 = vld [vmem:[#allocation2 + $0x540] ss:$16 sps:$4 sm:$0xff]   ;;  %v6744_v58 = vld [vmem:[#allocation2 + $0x548] ss:$16 sps:$4 sm:$0xff]  }
  0x9b   :  { %1733 = vmatpush1.bf16.msra.mxu0 %v6657_v59  ;;  %1905 = vmatpush1.bf16.msra.mxu1 %v6660_v60  ;;  %v6749_v59 = vld [vmem:[#allocation2 + $0x564] ss:$16 sps:$4 sm:$0xff]   ;;  %v6752_v60 = vld [vmem:[#allocation2 + $0x56c] ss:$16 sps:$4 sm:$0xff]  }
  0x9c   :  { %1734 = vmatprep.subr.bf16.mxu0 %v6665_v61  ;;  %1906 = vmatprep.subr.bf16.mxu1 %v6668_v62  ;;  %v6747_v61 = vld [vmem:[#allocation2 + $0x560] ss:$16 sps:$4 sm:$0xff]   ;;  %v6750_v62 = vld [vmem:[#allocation2 + $0x568] ss:$16 sps:$4 sm:$0xff]  }
  0x9f   :  { %1735 = vmatpush1.bf16.msra.mxu0 %v6663_v63  ;;  %1907 = vmatpush1.bf16.msra.mxu1 %v6666_v0  ;;  %v6755_v63 = vld [vmem:[#allocation2 + $0x584] ss:$16 sps:$4 sm:$0xff]   ;;  %v6758_v0 = vld [vmem:[#allocation2 + $0x58c] ss:$16 sps:$4 sm:$0xff]  }
  0xa0   :  { %1736 = vmatprep.subr.bf16.mxu0 %v6671_v1  ;;  %1908 = vmatprep.subr.bf16.mxu1 %v6674_v2  ;;  %v6753_v1 = vld [vmem:[#allocation2 + $0x580] ss:$16 sps:$4 sm:$0xff]   ;;  %v6756_v2 = vld [vmem:[#allocation2 + $0x588] ss:$16 sps:$4 sm:$0xff]  }
  0xa3   :  { %1737 = vmatpush1.bf16.msra.mxu0 %v6669_v3  ;;  %1909 = vmatpush1.bf16.msra.mxu1 %v6672_v4  ;;  %v6761_v3 = vld [vmem:[#allocation2 + $0x5a4] ss:$16 sps:$4 sm:$0xff]   ;;  %v6764_v4 = vld [vmem:[#allocation2 + $0x5ac] ss:$16 sps:$4 sm:$0xff]  }
  0xa4   :  { %1738 = vmatprep.subr.bf16.mxu0 %v6677_v5  ;;  %1910 = vmatprep.subr.bf16.mxu1 %v6680_v6  ;;  %v6759_v5 = vld [vmem:[#allocation2 + $0x5a0] ss:$16 sps:$4 sm:$0xff]   ;;  %v6762_v6 = vld [vmem:[#allocation2 + $0x5a8] ss:$16 sps:$4 sm:$0xff]  }
  0xa7   :  { %1739 = vmatpush1.bf16.msra.mxu0 %v6675_v7  ;;  %1911 = vmatpush1.bf16.msra.mxu1 %v6678_v8  ;;  %v6767_v7 = vld [vmem:[#allocation2 + $0x5c4] ss:$16 sps:$4 sm:$0xff]   ;;  %v6770_v8 = vld [vmem:[#allocation2 + $0x5cc] ss:$16 sps:$4 sm:$0xff]  }
  0xa8   :  { %1751 = vmatprep.subr.bf16.mxu0 %v6683_v9  ;;  %1923 = vmatprep.subr.bf16.mxu1 %v6686_v12  ;;  %v6765_v9 = vld [vmem:[#allocation2 + $0x5c0] ss:$16 sps:$4 sm:$0xff]   ;;  %v6776_v12 = vld [vmem:[#allocation2 + $0x5ec] ss:$16 sps:$4 sm:$0xff]  }
  0xaa   :  { %1741 = vmatmul.mubr.bf16.vlgmr.msra.gmra.mrb[0].mxu0 %v101_v15  ;;  %1913 = vmatmul.mubr.bf16.vlgmr.msra.gmra.mrb[0].mxu1 %v101_v15  ;;  %v6779_v15 = vld [vmem:[#allocation2 + $0x604] ss:$16 sps:$4 sm:$0xff]  }
  0xab   :  { %1752 = vmatpush1.bf16.msra.mxu0 %v6681_v13  ;;  %1924 = vmatpush1.bf16.msra.mxu1 %v6684_v14  ;;  %v6771_v13 = vld [vmem:[#allocation2 + $0x5e0] ss:$16 sps:$4 sm:$0xff]   ;;  %v6774_v14 = vld [vmem:[#allocation2 + $0x5e8] ss:$16 sps:$4 sm:$0xff]  }
  0xac   :  { %1753 = vmatprep.subr.bf16.mxu0 %v6689_v16  ;;  %1925 = vmatprep.subr.bf16.mxu1 %v6692_v17  ;;  %v87_v16 = vld [vmem:[%s8209_s1 + $0x20] sm:$0xff] }
  0xad   :  { %1783 = vmatprep.mubr.bf16.mxu0 %v104_v22  ;;  %1955 = vmatprep.mubr.bf16.mxu1 %v104_v22  ;;  %v95_v17 = vld [vmem:[%s8209_s1 + $0x60] sm:$0xff] }
  0xae   :  { %v103_v22 = vpack.c.bf16 %v95_v17, %v87_v16  ;;  %v6864_v16 = vld [vmem:[#allocation2 + $0x7c8] ss:$16 sps:$4 sm:$0xff]   ;;  %v6869_v17 = vld [vmem:[#allocation2 + $0x7e4] ss:$16 sps:$4 sm:$0xff]  }
  0xaf   :  { %1754 = vmatpush1.bf16.msra.mxu0 %v6687_v20  ;;  %1926 = vmatpush1.bf16.msra.mxu1 %v6690_v21  ;;  %v6780_v20 = vld [vmem:[#allocation2 + $0x608] ss:$16 sps:$4 sm:$0xff]  }
  0xb0   :  { %1755 = vmatprep.subr.bf16.mxu0 %v6695_v23  ;;  %1927 = vmatprep.subr.bf16.mxu1 %v6698_v24  ;;  %v90_v21 = vld [vmem:[%s8209_s1 + $0x38] sm:$0xff]  ;;  %v6785_v24 = vld [vmem:[#allocation2 + $0x624] ss:$16 sps:$4 sm:$0xff]  }
  0xb1   :  { %v98_v23 = vld [vmem:[%s8209_s1 + $0x78] sm:$0xff] }
  0xb3   :  { %1756 = vmatpush1.bf16.msra.mxu0 %v6693_v25  ;;  %1928 = vmatpush1.bf16.msra.mxu1 %v6696_v26  ;;  %v6788_v25 = vld [vmem:[#allocation2 + $0x62c] ss:$16 sps:$4 sm:$0xff]   ;;  %v6783_v26 = vld [vmem:[#allocation2 + $0x620] ss:$16 sps:$4 sm:$0xff]  }
  0xb4   :  { %1757 = vmatprep.subr.bf16.mxu0 %v6701_v27  ;;  %1929 = vmatprep.subr.bf16.mxu1 %v6704_v28  ;;  %v106_v27 = vpack.c.bf16 %v98_v23, %v90_v21  ;;  %v6786_v28 = vld [vmem:[#allocation2 + $0x628] ss:$16 sps:$4 sm:$0xff]   ;;  %v89_v21 = vld [vmem:[%s8209_s1 + $0x30] sm:$0xff]  ;;  %v6873_v23 = vld [vmem:[%s8214_s6 + $0x40] sm:$0xff]  }
  0xb7   :  { %1758 = vmatpush1.bf16.msra.mxu0 %v6699_v29  ;;  %1930 = vmatpush1.bf16.msra.mxu1 %v6702_v30  ;;  %v6791_v29 = vld [vmem:[#allocation2 + $0x644] ss:$16 sps:$4 sm:$0xff]   ;;  %v6794_v30 = vld [vmem:[#allocation2 + $0x64c] ss:$16 sps:$4 sm:$0xff]  }
  0xb8   :  { %1759 = vmatprep.subr.bf16.mxu0 %v6707_v31  ;;  %1931 = vmatprep.subr.bf16.mxu1 %v6710_v32  ;;  %v6789_v31 = vld [vmem:[#allocation2 + $0x640] ss:$16 sps:$4 sm:$0xff]   ;;  %v6792_v32 = vld [vmem:[#allocation2 + $0x648] ss:$16 sps:$4 sm:$0xff]  }
  0xbb   :  { %1760 = vmatpush1.bf16.msra.mxu0 %v6705_v33  ;;  %1932 = vmatpush1.bf16.msra.mxu1 %v6708_v34  ;;  %v6797_v33 = vld [vmem:[#allocation2 + $0x664] ss:$16 sps:$4 sm:$0xff]   ;;  %v6800_v34 = vld [vmem:[#allocation2 + $0x66c] ss:$16 sps:$4 sm:$0xff]  }
  0xbc   :  { %1761 = vmatprep.subr.bf16.mxu0 %v6713_v35  ;;  %1933 = vmatprep.subr.bf16.mxu1 %v6716_v36  ;;  %v6795_v35 = vld [vmem:[#allocation2 + $0x660] ss:$16 sps:$4 sm:$0xff]   ;;  %v6798_v36 = vld [vmem:[#allocation2 + $0x668] ss:$16 sps:$4 sm:$0xff]  }
  0xbf   :  { %1762 = vmatpush1.bf16.msra.mxu0 %v6711_v37  ;;  %1934 = vmatpush1.bf16.msra.mxu1 %v6714_v38  ;;  %v6803_v37 = vld [vmem:[#allocation2 + $0x684] ss:$16 sps:$4 sm:$0xff]   ;;  %v6806_v38 = vld [vmem:[#allocation2 + $0x68c] ss:$16 sps:$4 sm:$0xff]  }
  0xc0   :  { %1763 = vmatprep.subr.bf16.mxu0 %v6719_v39  ;;  %1935 = vmatprep.subr.bf16.mxu1 %v6722_v40  ;;  %v6801_v39 = vld [vmem:[#allocation2 + $0x680] ss:$16 sps:$4 sm:$0xff]   ;;  %v6804_v40 = vld [vmem:[#allocation2 + $0x688] ss:$16 sps:$4 sm:$0xff]  }
  0xc3   :  { %1764 = vmatpush1.bf16.msra.mxu0 %v6717_v41  ;;  %1936 = vmatpush1.bf16.msra.mxu1 %v6720_v42  ;;  %v6809_v41 = vld [vmem:[#allocation2 + $0x6a4] ss:$16 sps:$4 sm:$0xff]   ;;  %v6812_v42 = vld [vmem:[#allocation2 + $0x6ac] ss:$16 sps:$4 sm:$0xff]  }
  0xc4   :  { %1765 = vmatprep.subr.bf16.mxu0 %v6725_v43  ;;  %1937 = vmatprep.subr.bf16.mxu1 %v6728_v44  ;;  %v6807_v43 = vld [vmem:[#allocation2 + $0x6a0] ss:$16 sps:$4 sm:$0xff]   ;;  %v6810_v44 = vld [vmem:[#allocation2 + $0x6a8] ss:$16 sps:$4 sm:$0xff]  }
  0xc7   :  { %1766 = vmatpush1.bf16.msra.mxu0 %v6723_v45  ;;  %1938 = vmatpush1.bf16.msra.mxu1 %v6726_v46  ;;  %v6815_v45 = vld [vmem:[#allocation2 + $0x6c4] ss:$16 sps:$4 sm:$0xff]   ;;  %v6818_v46 = vld [vmem:[#allocation2 + $0x6cc] ss:$16 sps:$4 sm:$0xff]  }
  0xc8   :  { %1767 = vmatprep.subr.bf16.mxu0 %v6731_v47  ;;  %1939 = vmatprep.subr.bf16.mxu1 %v6734_v48  ;;  %v6813_v47 = vld [vmem:[#allocation2 + $0x6c0] ss:$16 sps:$4 sm:$0xff]   ;;  %v6816_v48 = vld [vmem:[#allocation2 + $0x6c8] ss:$16 sps:$4 sm:$0xff]  }
  0xcb   :  { %1768 = vmatpush1.bf16.msra.mxu0 %v6729_v49  ;;  %1940 = vmatpush1.bf16.msra.mxu1 %v6732_v50  ;;  %v6821_v49 = vld [vmem:[#allocation2 + $0x6e4] ss:$16 sps:$4 sm:$0xff]   ;;  %v6824_v50 = vld [vmem:[#allocation2 + $0x6ec] ss:$16 sps:$4 sm:$0xff]  }
  0xcc   :  { %1769 = vmatprep.subr.bf16.mxu0 %v6737_v51  ;;  %1941 = vmatprep.subr.bf16.mxu1 %v6740_v52  ;;  %v6819_v51 = vld [vmem:[#allocation2 + $0x6e0] ss:$16 sps:$4 sm:$0xff]   ;;  %v6822_v52 = vld [vmem:[#allocation2 + $0x6e8] ss:$16 sps:$4 sm:$0xff]  }
  0xcf   :  { %1770 = vmatpush1.bf16.msra.mxu0 %v6735_v53  ;;  %1942 = vmatpush1.bf16.msra.mxu1 %v6738_v54  ;;  %v6827_v53 = vld [vmem:[#allocation2 + $0x704] ss:$16 sps:$4 sm:$0xff]   ;;  %v6830_v54 = vld [vmem:[#allocation2 + $0x70c] ss:$16 sps:$4 sm:$0xff]  }
  0xd0   :  { %1771 = vmatprep.subr.bf16.mxu0 %v6743_v55  ;;  %1943 = vmatprep.subr.bf16.mxu1 %v6746_v56  ;;  %v6825_v55 = vld [vmem:[#allocation2 + $0x700] ss:$16 sps:$4 sm:$0xff]   ;;  %v6828_v56 = vld [vmem:[#allocation2 + $0x708] ss:$16 sps:$4 sm:$0xff]  }
  0xd3   :  { %1772 = vmatpush1.bf16.msra.mxu0 %v6741_v57  ;;  %1944 = vmatpush1.bf16.msra.mxu1 %v6744_v58  ;;  %v6833_v57 = vld [vmem:[#allocation2 + $0x724] ss:$16 sps:$4 sm:$0xff]   ;;  %v6836_v58 = vld [vmem:[#allocation2 + $0x72c] ss:$16 sps:$4 sm:$0xff]  }
  0xd4   :  { %1773 = vmatprep.subr.bf16.mxu0 %v6749_v59  ;;  %1945 = vmatprep.subr.bf16.mxu1 %v6752_v60  ;;  %v6831_v59 = vld [vmem:[#allocation2 + $0x720] ss:$16 sps:$4 sm:$0xff]   ;;  %v6834_v60 = vld [vmem:[#allocation2 + $0x728] ss:$16 sps:$4 sm:$0xff]  }
  0xd7   :  { %1774 = vmatpush1.bf16.msra.mxu0 %v6747_v61  ;;  %1946 = vmatpush1.bf16.msra.mxu1 %v6750_v62  ;;  %v6839_v61 = vld [vmem:[#allocation2 + $0x744] ss:$16 sps:$4 sm:$0xff]   ;;  %v6842_v62 = vld [vmem:[#allocation2 + $0x74c] ss:$16 sps:$4 sm:$0xff]  }
  0xd8   :  { %1775 = vmatprep.subr.bf16.mxu0 %v6755_v63  ;;  %1947 = vmatprep.subr.bf16.mxu1 %v6758_v0  ;;  %v6837_v63 = vld [vmem:[#allocation2 + $0x740] ss:$16 sps:$4 sm:$0xff]   ;;  %v6840_v0 = vld [vmem:[#allocation2 + $0x748] ss:$16 sps:$4 sm:$0xff]  }
  0xdb   :  { %1776 = vmatpush1.bf16.msra.mxu0 %v6753_v1  ;;  %1948 = vmatpush1.bf16.msra.mxu1 %v6756_v2  ;;  %v6845_v1 = vld [vmem:[#allocation2 + $0x764] ss:$16 sps:$4 sm:$0xff]   ;;  %v6848_v2 = vld [vmem:[#allocation2 + $0x76c] ss:$16 sps:$4 sm:$0xff]  }
  0xdc   :  { %1777 = vmatprep.subr.bf16.mxu0 %v6761_v3  ;;  %1949 = vmatprep.subr.bf16.mxu1 %v6764_v4  ;;  %v6843_v3 = vld [vmem:[#allocation2 + $0x760] ss:$16 sps:$4 sm:$0xff]   ;;  %v6846_v4 = vld [vmem:[#allocation2 + $0x768] ss:$16 sps:$4 sm:$0xff]  }
  0xdf   :  { %1778 = vmatpush1.bf16.msra.mxu0 %v6759_v5  ;;  %1950 = vmatpush1.bf16.msra.mxu1 %v6762_v6  ;;  %v6851_v5 = vld [vmem:[#allocation2 + $0x784] ss:$16 sps:$4 sm:$0xff]   ;;  %v6854_v6 = vld [vmem:[#allocation2 + $0x78c] ss:$16 sps:$4 sm:$0xff]  }
  0xe0   :  { %1779 = vmatprep.subr.bf16.mxu0 %v6767_v7  ;;  %1951 = vmatprep.subr.bf16.mxu1 %v6770_v8  ;;  %v6849_v7 = vld [vmem:[#allocation2 + $0x780] ss:$16 sps:$4 sm:$0xff]   ;;  %v6852_v8 = vld [vmem:[#allocation2 + $0x788] ss:$16 sps:$4 sm:$0xff]  }
  0xe3   :  { %1780 = vmatpush1.bf16.msra.mxu0 %v6765_v9  ;;  %1952 = vmatpush1.bf16.msra.mxu1 %v6768_v10  ;;  %v6857_v9 = vld [vmem:[#allocation2 + $0x7a4] ss:$16 sps:$4 sm:$0xff]   ;;  %v6860_v10 = vld [vmem:[#allocation2 + $0x7ac] ss:$16 sps:$4 sm:$0xff]  }
  0xe4   :  { %1781 = vmatprep.subr.bf16.mxu0 %v6773_v11  ;;  %1953 = vmatprep.subr.bf16.mxu1 %v6776_v12  ;;  %v6855_v11 = vld [vmem:[#allocation2 + $0x7a0] ss:$16 sps:$4 sm:$0xff]   ;;  %v6858_v12 = vld [vmem:[#allocation2 + $0x7a8] ss:$16 sps:$4 sm:$0xff]  }
  0xe7   :  { %1782 = vmatpush1.bf16.msra.mxu0 %v6771_v13  ;;  %1954 = vmatpush1.bf16.msra.mxu1 %v6774_v14  ;;  %v6863_v13 = vld [vmem:[#allocation2 + $0x7c4] ss:$16 sps:$4 sm:$0xff]   ;;  %v6866_v14 = vld [vmem:[#allocation2 + $0x7cc] ss:$16 sps:$4 sm:$0xff]  }
  0xe8   :  { %1794 = vmatprep.subr.bf16.mxu0 %v6779_v15  ;;  %1966 = vmatprep.subr.bf16.mxu1 %v6782_v18  ;;  %v6861_v15 = vld [vmem:[#allocation2 + $0x7c0] ss:$16 sps:$4 sm:$0xff]   ;;  %v6872_v18 = vld [vmem:[#allocation2 + $0x7ec] ss:$16 sps:$4 sm:$0xff]  }
  0xea   :  { %1784 = vmatmul.mubr.bf16.vlgmr.msra.gmra.mrb[0].mxu0 %v103_v22  ;;  %1956 = vmatmul.mubr.bf16.vlgmr.msra.gmra.mrb[0].mxu1 %v103_v22  ;;  %v97_v22 = vld [vmem:[%s8209_s1 + $0x70] sm:$0xff] }
  0xeb   :  { %1795 = vmatpush1.bf16.msra.mxu0 %v6777_v19  ;;  %1967 = vmatpush1.bf16.msra.mxu1 %v6780_v20  ;;  %v6867_v19 = vld [vmem:[#allocation2 + $0x7e0] ss:$16 sps:$4 sm:$0xff]   ;;  %v6870_v20 = vld [vmem:[#allocation2 + $0x7e8] ss:$16 sps:$4 sm:$0xff]  }
  0xec   :  { %1796 = vmatprep.subr.bf16.mxu0 %v6785_v24  ;;  %1968 = vmatprep.subr.bf16.mxu1 %v6788_v25  ;;  %v6874_v24 = vld [vmem:[%s8214_s6 + $0xc0] sm:$0xff]  }
  0xed   :  { %1826 = vmatprep.mubr.bf16.mxu0 %v106_v27  ;;  %1998 = vmatprep.mubr.bf16.mxu1 %v106_v27  ;;  %v6875_v25 = vld [vmem:[%s8214_s6] sm:$0xff]   ;;  %v105_v27 = vpack.c.bf16 %v97_v22, %v89_v21 }
  0xef   :  { %1797 = vmatpush1.bf16.msra.mxu0 %v6783_v26  ;;  %1969 = vmatpush1.bf16.msra.mxu1 %v6786_v28  ;;  %v6876_v26 = vld [vmem:[%s8214_s6 + $0x80] sm:$0xff]   ;;  %v6877_v28 = vld [vmem:[%s8214_s6 + $0x48] sm:$0xff]  }
  0xf0   :  { %1798 = vmatprep.subr.bf16.mxu0 %v6791_v29  ;;  %1970 = vmatprep.subr.bf16.mxu1 %v6794_v30  ;;  %v6878_v29 = vld [vmem:[%s8214_s6 + $0xc8] sm:$0xff]  }
  0xf1   :  { %v6879_v30 = vld [vmem:[%s8214_s6 + $0x8] sm:$0xff]  }
  0xf3   :  { %1799 = vmatpush1.bf16.msra.mxu0 %v6789_v31  ;;  %1971 = vmatpush1.bf16.msra.mxu1 %v6792_v32  ;;  %v6880_v31 = vld [vmem:[%s8214_s6 + $0x88] sm:$0xff]   ;;  %v6881_v32 = vld [vmem:[%s8214_s6 + $0x50] sm:$0xff]  }
  0xf4   :  { %1800 = vmatprep.subr.bf16.mxu0 %v6797_v33  ;;  %1972 = vmatprep.subr.bf16.mxu1 %v6800_v34  ;;  %v6882_v33 = vld [vmem:[%s8214_s6 + $0xd0] sm:$0xff]  }
  0xf5   :  { %v6883_v34 = vld [vmem:[%s8214_s6 + $0x10] sm:$0xff]  }
  0xf7   :  { %1801 = vmatpush1.bf16.msra.mxu0 %v6795_v35  ;;  %1973 = vmatpush1.bf16.msra.mxu1 %v6798_v36  ;;  %v6884_v35 = vld [vmem:[%s8214_s6 + $0x90] sm:$0xff]   ;;  %v6885_v36 = vld [vmem:[%s8214_s6 + $0x58] sm:$0xff]  }
  0xf8   :  { %1802 = vmatprep.subr.bf16.mxu0 %v6803_v37  ;;  %1974 = vmatprep.subr.bf16.mxu1 %v6806_v38  ;;  %v6886_v37 = vld [vmem:[%s8214_s6 + $0xd8] sm:$0xff]  }
  0xf9   :  { %v6887_v38 = vld [vmem:[%s8214_s6 + $0x18] sm:$0xff]  }
  0xfb   :  { %1803 = vmatpush1.bf16.msra.mxu0 %v6801_v39  ;;  %1975 = vmatpush1.bf16.msra.mxu1 %v6804_v40  ;;  %v6888_v39 = vld [vmem:[%s8214_s6 + $0x98] sm:$0xff]   ;;  %v6889_v40 = vld [vmem:[%s8214_s6 + $0x60] sm:$0xff]  }
  0xfc   :  { %1804 = vmatprep.subr.bf16.mxu0 %v6809_v41  ;;  %1976 = vmatprep.subr.bf16.mxu1 %v6812_v42  ;;  %v6890_v41 = vld [vmem:[%s8214_s6 + $0xe0] sm:$0xff]  }
  0xfd   :  { %v6891_v42 = vld [vmem:[%s8214_s6 + $0x20] sm:$0xff]  }
  0xff   :  { %1805 = vmatpush1.bf16.msra.mxu0 %v6807_v43  ;;  %1977 = vmatpush1.bf16.msra.mxu1 %v6810_v44  ;;  %v6892_v43 = vld [vmem:[%s8214_s6 + $0xa0] sm:$0xff]   ;;  %v6893_v44 = vld [vmem:[%s8214_s6 + $0x68] sm:$0xff]  }
 0x100   :  { %1806 = vmatprep.subr.bf16.mxu0 %v6815_v45  ;;  %1978 = vmatprep.subr.bf16.mxu1 %v6818_v46  ;;  %v6894_v45 = vld [vmem:[%s8214_s6 + $0xe8] sm:$0xff]  }
 0x101   :  { %v6895_v46 = vld [vmem:[%s8214_s6 + $0x28] sm:$0xff]  }
 0x103   :  { %1807 = vmatpush1.bf16.msra.mxu0 %v6813_v47  ;;  %1979 = vmatpush1.bf16.msra.mxu1 %v6816_v48  ;;  %v6896_v47 = vld [vmem:[%s8214_s6 + $0xa8] sm:$0xff]   ;;  %v6897_v48 = vld [vmem:[%s8214_s6 + $0x70] sm:$0xff]  }
 0x104   :  { %1808 = vmatprep.subr.bf16.mxu0 %v6821_v49  ;;  %1980 = vmatprep.subr.bf16.mxu1 %v6824_v50  ;;  %v6898_v49 = vld [vmem:[%s8214_s6 + $0xf0] sm:$0xff]  }
 0x105   :  { %v6899_v50 = vld [vmem:[%s8214_s6 + $0x30] sm:$0xff]  }
 0x107   :  { %1809 = vmatpush1.bf16.msra.mxu0 %v6819_v51  ;;  %1981 = vmatpush1.bf16.msra.mxu1 %v6822_v52  ;;  %v6900_v51 = vld [vmem:[%s8214_s6 + $0xb0] sm:$0xff]   ;;  %v6901_v52 = vld [vmem:[%s8214_s6 + $0x78] sm:$0xff]  }
 0x108   :  { %1810 = vmatprep.subr.bf16.mxu0 %v6827_v53  ;;  %1982 = vmatprep.subr.bf16.mxu1 %v6830_v54  ;;  %v6902_v53 = vld [vmem:[%s8214_s6 + $0xf8] sm:$0xff]  }
 0x109   :  { %v6903_v54 = vld [vmem:[%s8214_s6 + $0x38] sm:$0xff]  }
 0x10b   :  { %1811 = vmatpush1.bf16.msra.mxu0 %v6825_v55  ;;  %1983 = vmatpush1.bf16.msra.mxu1 %v6828_v56  ;;  %v6904_v55 = vld [vmem:[%s8214_s6 + $0xb8] sm:$0xff]   ;;  %v6907_v56 = vld [vmem:[#allocation5 + $0x4] ss:$16 sps:$4 sm:$0xff]  }
 0x10c   :  { %1812 = vmatprep.subr.bf16.mxu0 %v6833_v57  ;;  %1984 = vmatprep.subr.bf16.mxu1 %v6836_v58  ;;  %v6910_v57 = vld [vmem:[#allocation5 + $0xc] ss:$16 sps:$4 sm:$0xff]   ;;  %v365_v58 = vlaneseq }
 0x10f   :  { %1813 = vmatpush1.bf16.msra.mxu0 %v6831_v59  ;;  %1985 = vmatpush1.bf16.msra.mxu1 %v6834_v60  ;;  %v7687_v59 = vshrl.u32 %v365_v58, 7 }
 0x110   :  { %1814 = vmatprep.subr.bf16.mxu0 %v6839_v61  ;;  %1986 = vmatprep.subr.bf16.mxu1 %v6842_v62  ;;  %v363_v62 = vld [vmem:[%s8213_s5] sm:$0xf] }
 0x111   :  { %v7690_v60 = vsub.s32 0, %v7687_v59  ;;  %v375_v61 = vsub.s32 2, %v7687_v59 }
 0x113   :  { %1815 = vmatpush1.bf16.msra.mxu0 %v6837_v63  ;;  %1987 = vmatpush1.bf16.msra.mxu1 %v6840_v0  ;;  %v7697_v63 = vsub.s32 1, %v7687_v59  ;;  %v379_v0 = vsub.s32 3, %v7687_v59 }
 0x114   :  { %1816 = vmatprep.subr.bf16.mxu0 %v6845_v1  ;;  %1988 = vmatprep.subr.bf16.mxu1 %v6848_v2  ;;  %v368_v1 = vrot.slane %v363_v62, %v7690_v60  ;;  %v376_v2 = vrot.slane %v363_v62, %v375_v61 }
 0x117   :  { %1817 = vmatpush1.bf16.msra.mxu0 %v6843_v3  ;;  %1989 = vmatpush1.bf16.msra.mxu1 %v6846_v4  ;;  %v372_v3 = vrot.slane %v363_v62, %v7697_v63  ;;  %v380_v4 = vrot.slane %v363_v62, %v379_v0  ;;  %v6943_v62 = vld [vmem:[#allocation5 + $0xc4] ss:$16 sps:$4 sm:$0xff]  }
 0x118   :  { %1818 = vmatprep.subr.bf16.mxu0 %v6851_v5  ;;  %1990 = vmatprep.subr.bf16.mxu1 %v6854_v6 }
 0x11b   :  { %1819 = vmatpush1.bf16.msra.mxu0 %v6849_v7  ;;  %1991 = vmatpush1.bf16.msra.mxu1 %v6852_v8 }
 0x11c   :  { %1820 = vmatprep.subr.bf16.mxu0 %v6857_v9  ;;  %1992 = vmatprep.subr.bf16.mxu1 %v6860_v10 }
 0x11f   :  { %1821 = vmatpush1.bf16.msra.mxu0 %v6855_v11  ;;  %1993 = vmatpush1.bf16.msra.mxu1 %v6858_v12 }
 0x120   :  { %1822 = vmatprep.subr.bf16.mxu0 %v6863_v13  ;;  %1994 = vmatprep.subr.bf16.mxu1 %v6866_v14 }
 0x123   :  { %1823 = vmatpush1.bf16.msra.mxu0 %v6861_v15  ;;  %1995 = vmatpush1.bf16.msra.mxu1 %v6864_v16 }
 0x124   :  { %1824 = vmatprep.subr.bf16.mxu0 %v6869_v17  ;;  %1996 = vmatprep.subr.bf16.mxu1 %v6872_v18 }
 0x127   :  { %1825 = vmatpush1.bf16.msra.mxu0 %v6867_v19  ;;  %1997 = vmatpush1.bf16.msra.mxu1 %v6870_v20 }
 0x128   :  { %6327 = vmatprep.subr.bf16.mxu0 %v6873_v23  ;;  %6349 = vmatprep.subr.bf16.mxu1 %v6874_v24 }
 0x12a   :  { %1827 = vmatmul.mubr.bf16.vlgmr.msra.gmra.mrb[0].mxu0 %v105_v27  ;;  %1999 = vmatmul.mubr.bf16.vlgmr.msra.gmra.mrb[0].mxu1 %v105_v27 }
 0x12b   :  { %6328 = vmatpush3.bf16.msra.mxu0 %v6875_v25  ;;  %6350 = vmatpush3.bf16.msra.mxu1 %v6876_v26 }
 0x12c   :  { %6329 = vmatprep.subr.bf16.mxu0 %v6877_v28  ;;  %6351 = vmatprep.subr.bf16.mxu1 %v6878_v29 }
 0x12f   :  { %6330 = vmatpush3.bf16.msra.mxu0 %v6879_v30  ;;  %6352 = vmatpush3.bf16.msra.mxu1 %v6880_v31  ;;  %v2367_v31 = vld [vmem:[%s8211_s3 + $0x8] sm:$0xff] }
 0x130   :  { %6331 = vmatprep.subr.bf16.mxu0 %v6881_v32  ;;  %6353 = vmatprep.subr.bf16.mxu1 %v6882_v33  ;;  %v2375_v32 = vld [vmem:[%s8211_s3 + $0x48] sm:$0xff] }
 0x133   :  { %6332 = vmatpush3.bf16.msra.mxu0 %v6883_v34  ;;  %6354 = vmatpush3.bf16.msra.mxu1 %v6884_v35  ;;  %v6905_v35 = vld [vmem:[#allocation5] ss:$16 sps:$4 sm:$0xff]  }
 0x134   :  { %6333 = vmatprep.subr.bf16.mxu0 %v6885_v36  ;;  %6355 = vmatprep.subr.bf16.mxu1 %v6886_v37  ;;  %v6908_v36 = vld [vmem:[#allocation5 + $0x8] ss:$16 sps:$4 sm:$0xff]   ;;  %v6913_v37 = vld [vmem:[#allocation5 + $0x24] ss:$16 sps:$4 sm:$0xff]  }
 0x137   :  { %6334 = vmatpush3.bf16.msra.mxu0 %v6887_v38  ;;  %6356 = vmatpush3.bf16.msra.mxu1 %v6888_v39  ;;  %v6916_v38 = vld [vmem:[#allocation5 + $0x2c] ss:$16 sps:$4 sm:$0xff]   ;;  %v2383_v39 = vpack.c.bf16 %v2375_v32, %v2367_v31  ;;  %v6986_v31 = vld [vmem:[#allocation5 + $0x1a8] ss:$16 sps:$4 sm:$0xff]   ;;  %v6991_v32 = vld [vmem:[#allocation5 + $0x1c4] ss:$16 sps:$4 sm:$0xff]  }
 0x138   :  { %6335 = vmatprep.subr.bf16.mxu0 %v6889_v40  ;;  %6357 = vmatprep.subr.bf16.mxu1 %v6890_v41  ;;  %v6911_v40 = vld [vmem:[#allocation5 + $0x20] ss:$16 sps:$4 sm:$0xff]   ;;  %v6914_v41 = vld [vmem:[#allocation5 + $0x28] ss:$16 sps:$4 sm:$0xff]  }
 0x13b   :  { %6336 = vmatpush3.bf16.msra.mxu0 %v6891_v42  ;;  %6358 = vmatpush3.bf16.msra.mxu1 %v6892_v43  ;;  %v6919_v42 = vld [vmem:[#allocation5 + $0x44] ss:$16 sps:$4 sm:$0xff]   ;;  %v6922_v43 = vld [vmem:[#allocation5 + $0x4c] ss:$16 sps:$4 sm:$0xff]  }
 0x13c   :  { %6337 = vmatprep.subr.bf16.mxu0 %v6893_v44  ;;  %6359 = vmatprep.subr.bf16.mxu1 %v6894_v45  ;;  %v6917_v44 = vld [vmem:[#allocation5 + $0x40] ss:$16 sps:$4 sm:$0xff]   ;;  %v6920_v45 = vld [vmem:[#allocation5 + $0x48] ss:$16 sps:$4 sm:$0xff]  }
 0x13f   :  { %6338 = vmatpush3.bf16.msra.mxu0 %v6895_v46  ;;  %6360 = vmatpush3.bf16.msra.mxu1 %v6896_v47  ;;  %v6925_v46 = vld [vmem:[#allocation5 + $0x64] ss:$16 sps:$4 sm:$0xff]   ;;  %v6928_v47 = vld [vmem:[#allocation5 + $0x6c] ss:$16 sps:$4 sm:$0xff]  }
 0x140   :  { %6339 = vmatprep.subr.bf16.mxu0 %v6897_v48  ;;  %6361 = vmatprep.subr.bf16.mxu1 %v6898_v49  ;;  %v6923_v48 = vld [vmem:[#allocation5 + $0x60] ss:$16 sps:$4 sm:$0xff]   ;;  %v6926_v49 = vld [vmem:[#allocation5 + $0x68] ss:$16 sps:$4 sm:$0xff]  }
 0x143   :  { %6340 = vmatpush3.bf16.msra.mxu0 %v6899_v50  ;;  %6362 = vmatpush3.bf16.msra.mxu1 %v6900_v51  ;;  %v6931_v50 = vld [vmem:[#allocation5 + $0x84] ss:$16 sps:$4 sm:$0xff]   ;;  %v6934_v51 = vld [vmem:[#allocation5 + $0x8c] ss:$16 sps:$4 sm:$0xff]  }
 0x144   :  { %6341 = vmatprep.subr.bf16.mxu0 %v6901_v52  ;;  %6363 = vmatprep.subr.bf16.mxu1 %v6902_v53  ;;  %v6929_v52 = vld [vmem:[#allocation5 + $0x80] ss:$16 sps:$4 sm:$0xff]   ;;  %v6932_v53 = vld [vmem:[#allocation5 + $0x88] ss:$16 sps:$4 sm:$0xff]  }
 0x147   :  { %6342 = vmatpush3.bf16.msra.mxu0 %v6903_v54  ;;  %6364 = vmatpush3.bf16.msra.mxu1 %v6904_v55  ;;  %v6937_v54 = vld [vmem:[#allocation5 + $0xa4] ss:$16 sps:$4 sm:$0xff]   ;;  %v6940_v55 = vld [vmem:[#allocation5 + $0xac] ss:$16 sps:$4 sm:$0xff]  }
 0x148   :  { %3948 = vmatprep.subr.bf16.mxu0 %v6907_v56  ;;  %4120 = vmatprep.subr.bf16.mxu1 %v6910_v57  ;;  %v6935_v56 = vld [vmem:[#allocation5 + $0xa0] ss:$16 sps:$4 sm:$0xff]   ;;  %v6938_v57 = vld [vmem:[#allocation5 + $0xa8] ss:$16 sps:$4 sm:$0xff]  }
 0x1fd   :  { %v1828_v5 = vpop.f32.mrb[0].mxu0  ;;  %v2000_v6 = vpop.f32.mrb[0].mxu1 }
 0x1fe   :  { %v6415_v7 = vadd.f32 %v1828_v5, %v368_v1  ;;  %v6419_v8 = vadd.f32 %v2000_v6, %v376_v2  ;;  %v1830_v9 = vpop.f32.mrb[1].mxu0  ;;  %v2002_v10 = vpop.f32.mrb[1].mxu1  ;;  %v6952_v5 = vld [vmem:[#allocation5 + $0xec] ss:$16 sps:$4 sm:$0xff]   ;;  %v6947_v6 = vld [vmem:[#allocation5 + $0xe0] ss:$16 sps:$4 sm:$0xff]  }
 0x1ff   :  { %v6416_v11 = vadd.f32 %v1830_v9, %v372_v3  ;;  %v6420_v12 = vadd.f32 %v2002_v10, %v380_v4  ;;  %v1832_v13 = vpop.f32.mrb[2].mxu0  ;;  %v2004_v14 = vpop.f32.mrb[2].mxu1  ;;  %v6958_v9 = vld [vmem:[#allocation5 + $0x10c] ss:$16 sps:$4 sm:$0xff]   ;;  %v6953_v10 = vld [vmem:[#allocation5 + $0x100] ss:$16 sps:$4 sm:$0xff]  }
 0x200   :  { %v6417_v15 = vadd.f32 %v1832_v13, %v368_v1  ;;  %v6421_v16 = vadd.f32 %v2004_v14, %v376_v2  ;;  %v1834_v17 = vpop.f32.mrb[3].mxu0  ;;  %v2006_v18 = vpop.f32.mrb[3].mxu1  ;;  %v2009_v21 = vmax.f32 %v6415_v7, 0.0  ;;  %v2011_v22 = vmax.f32 %v6419_v8, 0.0  ;;  %v6946_v1 = vld [vmem:[#allocation5 + $0xcc] ss:$16 sps:$4 sm:$0xff]  }
 0x201   :  { %v6418_v19 = vadd.f32 %v1834_v17, %v372_v3  ;;  %v6422_v20 = vadd.f32 %v2006_v18, %v380_v4  ;;  %v2010_v25 = vmax.f32 %v6416_v11, 0.0  ;;  %v2012_v26 = vmax.f32 %v6420_v12, 0.0  ;;  %v6941_v2 = vld [vmem:[#allocation5 + $0xc0] ss:$16 sps:$4 sm:$0xff]   ;;  %v6944_v3 = vld [vmem:[#allocation5 + $0xc8] ss:$16 sps:$4 sm:$0xff]  }
 0x202   :  { %v2013_v23 = vmax.f32 %v6417_v15, 0.0  ;;  %v2015_v24 = vmax.f32 %v6421_v16, 0.0  ;;  %v6949_v4 = vld [vmem:[#allocation5 + $0xe4] ss:$16 sps:$4 sm:$0xff]   ;;  %v6950_v7 = vld [vmem:[#allocation5 + $0xe8] ss:$16 sps:$4 sm:$0xff]  }
 0x203   :  { %v2014_v27 = vmax.f32 %v6418_v19, 0.0  ;;  %v2016_v28 = vmax.f32 %v6422_v20, 0.0  ;;  %v6955_v8 = vld [vmem:[#allocation5 + $0x104] ss:$16 sps:$4 sm:$0xff]   ;;  %v6956_v11 = vld [vmem:[#allocation5 + $0x108] ss:$16 sps:$4 sm:$0xff]  }
 0x204   :  { %v2017_v29 = vpack.c.bf16 %v2013_v23, %v2009_v21  ;;  %v2019_v30 = vpack.c.bf16 %v2015_v24, %v2011_v22  ;;  %v6961_v12 = vld [vmem:[#allocation5 + $0x124] ss:$16 sps:$4 sm:$0xff]   ;;  %v6964_v13 = vld [vmem:[#allocation5 + $0x12c] ss:$16 sps:$4 sm:$0xff]   ;;  %v6959_v14 = vld [vmem:[#allocation5 + $0x120] ss:$16 sps:$4 sm:$0xff]  }
 0x205   :  { %v2018_v33 = vpack.c.bf16 %v2014_v27, %v2010_v25  ;;  %v2020_v34 = vpack.c.bf16 %v2016_v28, %v2012_v26  ;;  %v6962_v15 = vld [vmem:[#allocation5 + $0x128] ss:$16 sps:$4 sm:$0xff]   ;;  %v6967_v16 = vld [vmem:[#allocation5 + $0x144] ss:$16 sps:$4 sm:$0xff]   ;;  %v6970_v17 = vld [vmem:[#allocation5 + $0x14c] ss:$16 sps:$4 sm:$0xff]  }
 0x206   :  { %v6965_v18 = vld [vmem:[#allocation5 + $0x140] ss:$16 sps:$4 sm:$0xff]   ;;  %v6968_v19 = vld [vmem:[#allocation5 + $0x148] ss:$16 sps:$4 sm:$0xff]   ;;  %v6973_v20 = vld [vmem:[#allocation5 + $0x164] ss:$16 sps:$4 sm:$0xff]  }
 0x207   :  { %2316 = vmatprep.mubr.bf16.mxu0 %v2018_v33  ;;  %2357 = vmatprep.mubr.bf16.mxu1 %v2020_v34  ;;  %v6976_v21 = vld [vmem:[#allocation5 + $0x16c] ss:$16 sps:$4 sm:$0xff]   ;;  %v6971_v22 = vld [vmem:[#allocation5 + $0x160] ss:$16 sps:$4 sm:$0xff]   ;;  %v6974_v23 = vld [vmem:[#allocation5 + $0x168] ss:$16 sps:$4 sm:$0xff]  }
 0x208   :  { %2317 = vmatmul.mubr.bf16.vlgmr.msra.gmra.mrb[4].mxu0 %v2017_v29  ;;  %2358 = vmatmul.mubr.bf16.vlgmr.msra.gmra.mrb[4].mxu1 %v2019_v30  ;;  %v6979_v24 = vld [vmem:[#allocation5 + $0x184] ss:$16 sps:$4 sm:$0xff]   ;;  %v6982_v25 = vld [vmem:[#allocation5 + $0x18c] ss:$16 sps:$4 sm:$0xff]   ;;  %v6977_v26 = vld [vmem:[#allocation5 + $0x180] ss:$16 sps:$4 sm:$0xff]  }
 0x209   :  { %3949 = vmatpush1.bf16.msra.mxu0 %v6905_v35  ;;  %4121 = vmatpush1.bf16.msra.mxu1 %v6908_v36  ;;  %v6980_v27 = vld [vmem:[#allocation5 + $0x188] ss:$16 sps:$4 sm:$0xff]   ;;  %v6985_v28 = vld [vmem:[#allocation5 + $0x1a4] ss:$16 sps:$4 sm:$0xff]   ;;  %v6988_v29 = vld [vmem:[#allocation5 + $0x1ac] ss:$16 sps:$4 sm:$0xff]  }
 0x20a   :  { %3950 = vmatprep.subr.bf16.mxu0 %v6913_v37  ;;  %4122 = vmatprep.subr.bf16.mxu1 %v6916_v38  ;;  %v6983_v30 = vld [vmem:[#allocation5 + $0x1a0] ss:$16 sps:$4 sm:$0xff]   ;;  %v6994_v33 = vld [vmem:[#allocation5 + $0x1cc] ss:$16 sps:$4 sm:$0xff]   ;;  %v6992_v35 = vld [vmem:[#allocation5 + $0x1c8] ss:$16 sps:$4 sm:$0xff]  }
 0x20b   :  { %3980 = vmatprep.mubr.bf16.mxu0 %v2383_v39  ;;  %4152 = vmatprep.mubr.bf16.mxu1 %v2383_v39  ;;  %v6989_v34 = vld [vmem:[#allocation5 + $0x1c0] ss:$16 sps:$4 sm:$0xff]   ;;  %v6997_v36 = vld [vmem:[#allocation5 + $0x1e4] ss:$16 sps:$4 sm:$0xff]   ;;  %v7000_v37 = vld [vmem:[#allocation5 + $0x1ec] ss:$16 sps:$4 sm:$0xff]  }
 0x20c   :  { %v6995_v38 = vld [vmem:[#allocation5 + $0x1e0] ss:$16 sps:$4 sm:$0xff]   ;;  %v6998_v39 = vld [vmem:[#allocation5 + $0x1e8] ss:$16 sps:$4 sm:$0xff]  }
 0x20d   :  { %3951 = vmatpush1.bf16.msra.mxu0 %v6911_v40  ;;  %4123 = vmatpush1.bf16.msra.mxu1 %v6914_v41  ;;  %v2366_v40 = vld [vmem:[%s8211_s3] sm:$0xff] }
 0x20e   :  { %3952 = vmatprep.subr.bf16.mxu0 %v6919_v42  ;;  %4124 = vmatprep.subr.bf16.mxu1 %v6922_v43  ;;  %v2374_v41 = vld [vmem:[%s8211_s3 + $0x40] sm:$0xff]  ;;  %v7006_v43 = vld [vmem:[#allocation5 + $0x20c] ss:$16 sps:$4 sm:$0xff]  }
 0x20f   :  { %v7003_v42 = vld [vmem:[#allocation5 + $0x204] ss:$16 sps:$4 sm:$0xff]  }
 0x211   :  { %3953 = vmatpush1.bf16.msra.mxu0 %v6917_v44  ;;  %4125 = vmatpush1.bf16.msra.mxu1 %v6920_v45  ;;  %v2382_v44 = vpack.c.bf16 %v2374_v41, %v2366_v40  ;;  %v2369_v45 = vld [vmem:[%s8211_s3 + $0x18] sm:$0xff]  ;;  %v7081_v40 = vld [vmem:[#allocation5 + $0x3a4] ss:$16 sps:$4 sm:$0xff]  }
 0x212   :  { %3954 = vmatprep.subr.bf16.mxu0 %v6925_v46  ;;  %4126 = vmatprep.subr.bf16.mxu1 %v6928_v47  ;;  %v2377_v46 = vld [vmem:[%s8211_s3 + $0x58] sm:$0xff]  ;;  %v7001_v47 = vld [vmem:[#allocation5 + $0x200] ss:$16 sps:$4 sm:$0xff]  }
 0x213   :  { %v7084_v41 = vld [vmem:[#allocation5 + $0x3ac] ss:$16 sps:$4 sm:$0xff]  }
 0x215   :  { %3955 = vmatpush1.bf16.msra.mxu0 %v6923_v48  ;;  %4127 = vmatpush1.bf16.msra.mxu1 %v6926_v49  ;;  %v7004_v48 = vld [vmem:[#allocation5 + $0x208] ss:$16 sps:$4 sm:$0xff]   ;;  %v7009_v49 = vld [vmem:[#allocation5 + $0x224] ss:$16 sps:$4 sm:$0xff]  }
 0x216   :  { %3956 = vmatprep.subr.bf16.mxu0 %v6931_v50  ;;  %4128 = vmatprep.subr.bf16.mxu1 %v6934_v51  ;;  %v7012_v50 = vld [vmem:[#allocation5 + $0x22c] ss:$16 sps:$4 sm:$0xff]   ;;  %v2385_v51 = vpack.c.bf16 %v2377_v46, %v2369_v45  ;;  %v7085_v46 = vld [vmem:[#allocation5 + $0x3c0] ss:$16 sps:$4 sm:$0xff]  }
 0x217   :  { %v7090_v45 = vld [vmem:[#allocation5 + $0x3cc] ss:$16 sps:$4 sm:$0xff]  }
 0x219   :  { %3957 = vmatpush1.bf16.msra.mxu0 %v6929_v52  ;;  %4129 = vmatpush1.bf16.msra.mxu1 %v6932_v53  ;;  %v7007_v52 = vld [vmem:[#allocation5 + $0x220] ss:$16 sps:$4 sm:$0xff]   ;;  %v7010_v53 = vld [vmem:[#allocation5 + $0x228] ss:$16 sps:$4 sm:$0xff]  }
 0x21a   :  { %3958 = vmatprep.subr.bf16.mxu0 %v6937_v54  ;;  %4130 = vmatprep.subr.bf16.mxu1 %v6940_v55  ;;  %v7015_v54 = vld [vmem:[#allocation5 + $0x244] ss:$16 sps:$4 sm:$0xff]   ;;  %v7018_v55 = vld [vmem:[#allocation5 + $0x24c] ss:$16 sps:$4 sm:$0xff]  }
 0x21d   :  { %3959 = vmatpush1.bf16.msra.mxu0 %v6935_v56  ;;  %4131 = vmatpush1.bf16.msra.mxu1 %v6938_v57  ;;  %v7013_v56 = vld [vmem:[#allocation5 + $0x240] ss:$16 sps:$4 sm:$0xff]   ;;  %v7016_v57 = vld [vmem:[#allocation5 + $0x248] ss:$16 sps:$4 sm:$0xff]  }
 0x21e   :  { %3960 = vmatprep.subr.bf16.mxu0 %v6943_v62  ;;  %4132 = vmatprep.subr.bf16.mxu1 %v6946_v1  ;;  %v7021_v62 = vld [vmem:[#allocation5 + $0x264] ss:$16 sps:$4 sm:$0xff]   ;;  %v7024_v1 = vld [vmem:[#allocation5 + $0x26c] ss:$16 sps:$4 sm:$0xff]  }
 0x221   :  { %3961 = vmatpush1.bf16.msra.mxu0 %v6941_v2  ;;  %4133 = vmatpush1.bf16.msra.mxu1 %v6944_v3  ;;  %v7019_v2 = vld [vmem:[#allocation5 + $0x260] ss:$16 sps:$4 sm:$0xff]   ;;  %v7022_v3 = vld [vmem:[#allocation5 + $0x268] ss:$16 sps:$4 sm:$0xff]  }
 0x222   :  { %3962 = vmatprep.subr.bf16.mxu0 %v6949_v4  ;;  %4134 = vmatprep.subr.bf16.mxu1 %v6952_v5  ;;  %v7027_v4 = vld [vmem:[#allocation5 + $0x284] ss:$16 sps:$4 sm:$0xff]   ;;  %v7030_v5 = vld [vmem:[#allocation5 + $0x28c] ss:$16 sps:$4 sm:$0xff]  }
 0x225   :  { %3963 = vmatpush1.bf16.msra.mxu0 %v6947_v6  ;;  %4135 = vmatpush1.bf16.msra.mxu1 %v6950_v7  ;;  %v7025_v6 = vld [vmem:[#allocation5 + $0x280] ss:$16 sps:$4 sm:$0xff]   ;;  %v7028_v7 = vld [vmem:[#allocation5 + $0x288] ss:$16 sps:$4 sm:$0xff]  }
 0x226   :  { %3964 = vmatprep.subr.bf16.mxu0 %v6955_v8  ;;  %4136 = vmatprep.subr.bf16.mxu1 %v6958_v9  ;;  %v7033_v8 = vld [vmem:[#allocation5 + $0x2a4] ss:$16 sps:$4 sm:$0xff]   ;;  %v7036_v9 = vld [vmem:[#allocation5 + $0x2ac] ss:$16 sps:$4 sm:$0xff]  }
 0x229   :  { %3965 = vmatpush1.bf16.msra.mxu0 %v6953_v10  ;;  %4137 = vmatpush1.bf16.msra.mxu1 %v6956_v11  ;;  %v7031_v10 = vld [vmem:[#allocation5 + $0x2a0] ss:$16 sps:$4 sm:$0xff]   ;;  %v7034_v11 = vld [vmem:[#allocation5 + $0x2a8] ss:$16 sps:$4 sm:$0xff]  }
 0x22a   :  { %3966 = vmatprep.subr.bf16.mxu0 %v6961_v12  ;;  %4138 = vmatprep.subr.bf16.mxu1 %v6964_v13  ;;  %v7039_v12 = vld [vmem:[#allocation5 + $0x2c4] ss:$16 sps:$4 sm:$0xff]   ;;  %v7042_v13 = vld [vmem:[#allocation5 + $0x2cc] ss:$16 sps:$4 sm:$0xff]  }
 0x22d   :  { %3967 = vmatpush1.bf16.msra.mxu0 %v6959_v14  ;;  %4139 = vmatpush1.bf16.msra.mxu1 %v6962_v15  ;;  %v7037_v14 = vld [vmem:[#allocation5 + $0x2c0] ss:$16 sps:$4 sm:$0xff]   ;;  %v7040_v15 = vld [vmem:[#allocation5 + $0x2c8] ss:$16 sps:$4 sm:$0xff]  }
 0x22e   :  { %3968 = vmatprep.subr.bf16.mxu0 %v6967_v16  ;;  %4140 = vmatprep.subr.bf16.mxu1 %v6970_v17  ;;  %v7045_v16 = vld [vmem:[#allocation5 + $0x2e4] ss:$16 sps:$4 sm:$0xff]   ;;  %v7048_v17 = vld [vmem:[#allocation5 + $0x2ec] ss:$16 sps:$4 sm:$0xff]  }
 0x231   :  { %3969 = vmatpush1.bf16.msra.mxu0 %v6965_v18  ;;  %4141 = vmatpush1.bf16.msra.mxu1 %v6968_v19  ;;  %v7043_v18 = vld [vmem:[#allocation5 + $0x2e0] ss:$16 sps:$4 sm:$0xff]   ;;  %v7046_v19 = vld [vmem:[#allocation5 + $0x2e8] ss:$16 sps:$4 sm:$0xff]  }
 0x232   :  { %3970 = vmatprep.subr.bf16.mxu0 %v6973_v20  ;;  %4142 = vmatprep.subr.bf16.mxu1 %v6976_v21  ;;  %v7051_v20 = vld [vmem:[#allocation5 + $0x304] ss:$16 sps:$4 sm:$0xff]   ;;  %v7054_v21 = vld [vmem:[#allocation5 + $0x30c] ss:$16 sps:$4 sm:$0xff]  }
 0x235   :  { %3971 = vmatpush1.bf16.msra.mxu0 %v6971_v22  ;;  %4143 = vmatpush1.bf16.msra.mxu1 %v6974_v23  ;;  %v7049_v22 = vld [vmem:[#allocation5 + $0x300] ss:$16 sps:$4 sm:$0xff]   ;;  %v7052_v23 = vld [vmem:[#allocation5 + $0x308] ss:$16 sps:$4 sm:$0xff]  }
 0x236   :  { %3972 = vmatprep.subr.bf16.mxu0 %v6979_v24  ;;  %4144 = vmatprep.subr.bf16.mxu1 %v6982_v25  ;;  %v7057_v24 = vld [vmem:[#allocation5 + $0x324] ss:$16 sps:$4 sm:$0xff]   ;;  %v7060_v25 = vld [vmem:[#allocation5 + $0x32c] ss:$16 sps:$4 sm:$0xff]  }
 0x239   :  { %3973 = vmatpush1.bf16.msra.mxu0 %v6977_v26  ;;  %4145 = vmatpush1.bf16.msra.mxu1 %v6980_v27  ;;  %v7055_v26 = vld [vmem:[#allocation5 + $0x320] ss:$16 sps:$4 sm:$0xff]   ;;  %v7058_v27 = vld [vmem:[#allocation5 + $0x328] ss:$16 sps:$4 sm:$0xff]  }
 0x23a   :  { %3974 = vmatprep.subr.bf16.mxu0 %v6985_v28  ;;  %4146 = vmatprep.subr.bf16.mxu1 %v6988_v29  ;;  %v7063_v28 = vld [vmem:[#allocation5 + $0x344] ss:$16 sps:$4 sm:$0xff]   ;;  %v7066_v29 = vld [vmem:[#allocation5 + $0x34c] ss:$16 sps:$4 sm:$0xff]  }
 0x23d   :  { %3975 = vmatpush1.bf16.msra.mxu0 %v6983_v30  ;;  %4147 = vmatpush1.bf16.msra.mxu1 %v6986_v31  ;;  %v7061_v30 = vld [vmem:[#allocation5 + $0x340] ss:$16 sps:$4 sm:$0xff]   ;;  %v7064_v31 = vld [vmem:[#allocation5 + $0x348] ss:$16 sps:$4 sm:$0xff]  }
 0x23e   :  { %3976 = vmatprep.subr.bf16.mxu0 %v6991_v32  ;;  %4148 = vmatprep.subr.bf16.mxu1 %v6994_v33  ;;  %v7069_v32 = vld [vmem:[#allocation5 + $0x364] ss:$16 sps:$4 sm:$0xff]   ;;  %v7072_v33 = vld [vmem:[#allocation5 + $0x36c] ss:$16 sps:$4 sm:$0xff]  }
 0x241   :  { %3977 = vmatpush1.bf16.msra.mxu0 %v6989_v34  ;;  %4149 = vmatpush1.bf16.msra.mxu1 %v6992_v35  ;;  %v7067_v34 = vld [vmem:[#allocation5 + $0x360] ss:$16 sps:$4 sm:$0xff]   ;;  %v7070_v35 = vld [vmem:[#allocation5 + $0x368] ss:$16 sps:$4 sm:$0xff]  }
 0x242   :  { %3978 = vmatprep.subr.bf16.mxu0 %v6997_v36  ;;  %4150 = vmatprep.subr.bf16.mxu1 %v7000_v37  ;;  %v7075_v36 = vld [vmem:[#allocation5 + $0x384] ss:$16 sps:$4 sm:$0xff]   ;;  %v7078_v37 = vld [vmem:[#allocation5 + $0x38c] ss:$16 sps:$4 sm:$0xff]  }
 0x245   :  { %3979 = vmatpush1.bf16.msra.mxu0 %v6995_v38  ;;  %4151 = vmatpush1.bf16.msra.mxu1 %v6998_v39  ;;  %v7073_v38 = vld [vmem:[#allocation5 + $0x380] ss:$16 sps:$4 sm:$0xff]   ;;  %v7076_v39 = vld [vmem:[#allocation5 + $0x388] ss:$16 sps:$4 sm:$0xff]  }
 0x246   :  { %3991 = vmatprep.subr.bf16.mxu0 %v7003_v42  ;;  %4163 = vmatprep.subr.bf16.mxu1 %v7006_v43  ;;  %v7079_v42 = vld [vmem:[#allocation5 + $0x3a0] ss:$16 sps:$4 sm:$0xff]   ;;  %v7082_v43 = vld [vmem:[#allocation5 + $0x3a8] ss:$16 sps:$4 sm:$0xff]  }
 0x248   :  { %3981 = vmatmul.mubr.bf16.vlgmr.msra.gmra.mrb[8].mxu0 %v2382_v44  ;;  %4153 = vmatmul.mubr.bf16.vlgmr.msra.gmra.mrb[8].mxu1 %v2382_v44  ;;  %v7087_v44 = vld [vmem:[#allocation5 + $0x3c4] ss:$16 sps:$4 sm:$0xff]  }
 0x249   :  { %3992 = vmatpush1.bf16.msra.mxu0 %v7001_v47  ;;  %4164 = vmatpush1.bf16.msra.mxu1 %v7004_v48  ;;  %v7088_v47 = vld [vmem:[#allocation5 + $0x3c8] ss:$16 sps:$4 sm:$0xff]   ;;  %v7093_v48 = vld [vmem:[#allocation5 + $0x3e4] ss:$16 sps:$4 sm:$0xff]  }
 0x24a   :  { %3993 = vmatprep.subr.bf16.mxu0 %v7009_v49  ;;  %4165 = vmatprep.subr.bf16.mxu1 %v7012_v50  ;;  %v7096_v49 = vld [vmem:[#allocation5 + $0x3ec] ss:$16 sps:$4 sm:$0xff]   ;;  %v7091_v50 = vld [vmem:[#allocation5 + $0x3e0] ss:$16 sps:$4 sm:$0xff]  }
 0x24b   :  { %4023 = vmatprep.mubr.bf16.mxu0 %v2385_v51  ;;  %4195 = vmatprep.mubr.bf16.mxu1 %v2385_v51  ;;  %v7094_v51 = vld [vmem:[#allocation5 + $0x3e8] ss:$16 sps:$4 sm:$0xff]  }
 0x24d   :  { %3994 = vmatpush1.bf16.msra.mxu0 %v7007_v52  ;;  %4166 = vmatpush1.bf16.msra.mxu1 %v7010_v53  ;;  %v2368_v52 = vld [vmem:[%s8211_s3 + $0x10] sm:$0xff] }
 0x24e   :  { %3995 = vmatprep.subr.bf16.mxu0 %v7015_v54  ;;  %4167 = vmatprep.subr.bf16.mxu1 %v7018_v55  ;;  %v2376_v53 = vld [vmem:[%s8211_s3 + $0x50] sm:$0xff]  ;;  %v7102_v55 = vld [vmem:[#allocation5 + $0x40c] ss:$16 sps:$4 sm:$0xff]  }
 0x24f   :  { %v7099_v54 = vld [vmem:[#allocation5 + $0x404] ss:$16 sps:$4 sm:$0xff]  }
 0x251   :  { %3996 = vmatpush1.bf16.msra.mxu0 %v7013_v56  ;;  %4168 = vmatpush1.bf16.msra.mxu1 %v7016_v57  ;;  %v2384_v56 = vpack.c.bf16 %v2376_v53, %v2368_v52  ;;  %v2371_v57 = vld [vmem:[%s8211_s3 + $0x28] sm:$0xff]  ;;  %v7177_v52 = vld [vmem:[#allocation5 + $0x5a4] ss:$16 sps:$4 sm:$0xff]  }
 0x252   :  { %3997 = vmatprep.subr.bf16.mxu0 %v7021_v62  ;;  %4169 = vmatprep.subr.bf16.mxu1 %v7024_v1  ;;  %v2379_v62 = vld [vmem:[%s8211_s3 + $0x68] sm:$0xff]  ;;  %v7097_v1 = vld [vmem:[#allocation5 + $0x400] ss:$16 sps:$4 sm:$0xff]  }
 0x253   :  { %v7180_v53 = vld [vmem:[#allocation5 + $0x5ac] ss:$16 sps:$4 sm:$0xff]  }
 0x255   :  { %3998 = vmatpush1.bf16.msra.mxu0 %v7019_v2  ;;  %4170 = vmatpush1.bf16.msra.mxu1 %v7022_v3  ;;  %v7100_v2 = vld [vmem:[#allocation5 + $0x408] ss:$16 sps:$4 sm:$0xff]   ;;  %v7105_v3 = vld [vmem:[#allocation5 + $0x424] ss:$16 sps:$4 sm:$0xff]  }
 0x256   :  { %3999 = vmatprep.subr.bf16.mxu0 %v7027_v4  ;;  %4171 = vmatprep.subr.bf16.mxu1 %v7030_v5  ;;  %v7108_v4 = vld [vmem:[#allocation5 + $0x42c] ss:$16 sps:$4 sm:$0xff]   ;;  %v2387_v5 = vpack.c.bf16 %v2379_v62, %v2371_v57  ;;  %v7181_v62 = vld [vmem:[#allocation5 + $0x5c0] ss:$16 sps:$4 sm:$0xff]  }
 0x257   :  { %v7186_v57 = vld [vmem:[#allocation5 + $0x5cc] ss:$16 sps:$4 sm:$0xff]  }
 0x259   :  { %4000 = vmatpush1.bf16.msra.mxu0 %v7025_v6  ;;  %4172 = vmatpush1.bf16.msra.mxu1 %v7028_v7  ;;  %v7103_v6 = vld [vmem:[#allocation5 + $0x420] ss:$16 sps:$4 sm:$0xff]   ;;  %v7106_v7 = vld [vmem:[#allocation5 + $0x428] ss:$16 sps:$4 sm:$0xff]  }
 0x25a   :  { %4001 = vmatprep.subr.bf16.mxu0 %v7033_v8  ;;  %4173 = vmatprep.subr.bf16.mxu1 %v7036_v9  ;;  %v7111_v8 = vld [vmem:[#allocation5 + $0x444] ss:$16 sps:$4 sm:$0xff]   ;;  %v7114_v9 = vld [vmem:[#allocation5 + $0x44c] ss:$16 sps:$4 sm:$0xff]  }
 0x25d   :  { %4002 = vmatpush1.bf16.msra.mxu0 %v7031_v10  ;;  %4174 = vmatpush1.bf16.msra.mxu1 %v7034_v11  ;;  %v7109_v10 = vld [vmem:[#allocation5 + $0x440] ss:$16 sps:$4 sm:$0xff]   ;;  %v7112_v11 = vld [vmem:[#allocation5 + $0x448] ss:$16 sps:$4 sm:$0xff]  }
 0x25e   :  { %4003 = vmatprep.subr.bf16.mxu0 %v7039_v12  ;;  %4175 = vmatprep.subr.bf16.mxu1 %v7042_v13  ;;  %v7117_v12 = vld [vmem:[#allocation5 + $0x464] ss:$16 sps:$4 sm:$0xff]   ;;  %v7120_v13 = vld [vmem:[#allocation5 + $0x46c] ss:$16 sps:$4 sm:$0xff]  }
 0x261   :  { %4004 = vmatpush1.bf16.msra.mxu0 %v7037_v14  ;;  %4176 = vmatpush1.bf16.msra.mxu1 %v7040_v15  ;;  %v7115_v14 = vld [vmem:[#allocation5 + $0x460] ss:$16 sps:$4 sm:$0xff]   ;;  %v7118_v15 = vld [vmem:[#allocation5 + $0x468] ss:$16 sps:$4 sm:$0xff]  }
 0x262   :  { %4005 = vmatprep.subr.bf16.mxu0 %v7045_v16  ;;  %4177 = vmatprep.subr.bf16.mxu1 %v7048_v17  ;;  %v7123_v16 = vld [vmem:[#allocation5 + $0x484] ss:$16 sps:$4 sm:$0xff]   ;;  %v7126_v17 = vld [vmem:[#allocation5 + $0x48c] ss:$16 sps:$4 sm:$0xff]  }
 0x265   :  { %4006 = vmatpush1.bf16.msra.mxu0 %v7043_v18  ;;  %4178 = vmatpush1.bf16.msra.mxu1 %v7046_v19  ;;  %v7121_v18 = vld [vmem:[#allocation5 + $0x480] ss:$16 sps:$4 sm:$0xff]   ;;  %v7124_v19 = vld [vmem:[#allocation5 + $0x488] ss:$16 sps:$4 sm:$0xff]  }
 0x266   :  { %4007 = vmatprep.subr.bf16.mxu0 %v7051_v20  ;;  %4179 = vmatprep.subr.bf16.mxu1 %v7054_v21  ;;  %v7129_v20 = vld [vmem:[#allocation5 + $0x4a4] ss:$16 sps:$4 sm:$0xff]   ;;  %v7132_v21 = vld [vmem:[#allocation5 + $0x4ac] ss:$16 sps:$4 sm:$0xff]  }
 0x269   :  { %4008 = vmatpush1.bf16.msra.mxu0 %v7049_v22  ;;  %4180 = vmatpush1.bf16.msra.mxu1 %v7052_v23  ;;  %v7127_v22 = vld [vmem:[#allocation5 + $0x4a0] ss:$16 sps:$4 sm:$0xff]   ;;  %v7130_v23 = vld [vmem:[#allocation5 + $0x4a8] ss:$16 sps:$4 sm:$0xff]  }
 0x26a   :  { %4009 = vmatprep.subr.bf16.mxu0 %v7057_v24  ;;  %4181 = vmatprep.subr.bf16.mxu1 %v7060_v25  ;;  %v7135_v24 = vld [vmem:[#allocation5 + $0x4c4] ss:$16 sps:$4 sm:$0xff]   ;;  %v7138_v25 = vld [vmem:[#allocation5 + $0x4cc] ss:$16 sps:$4 sm:$0xff]  }
 0x26d   :  { %4010 = vmatpush1.bf16.msra.mxu0 %v7055_v26  ;;  %4182 = vmatpush1.bf16.msra.mxu1 %v7058_v27  ;;  %v7133_v26 = vld [vmem:[#allocation5 + $0x4c0] ss:$16 sps:$4 sm:$0xff]   ;;  %v7136_v27 = vld [vmem:[#allocation5 + $0x4c8] ss:$16 sps:$4 sm:$0xff]  }
 0x26e   :  { %4011 = vmatprep.subr.bf16.mxu0 %v7063_v28  ;;  %4183 = vmatprep.subr.bf16.mxu1 %v7066_v29  ;;  %v7141_v28 = vld [vmem:[#allocation5 + $0x4e4] ss:$16 sps:$4 sm:$0xff]   ;;  %v7144_v29 = vld [vmem:[#allocation5 + $0x4ec] ss:$16 sps:$4 sm:$0xff]  }
 0x271   :  { %4012 = vmatpush1.bf16.msra.mxu0 %v7061_v30  ;;  %4184 = vmatpush1.bf16.msra.mxu1 %v7064_v31  ;;  %v7139_v30 = vld [vmem:[#allocation5 + $0x4e0] ss:$16 sps:$4 sm:$0xff]   ;;  %v7142_v31 = vld [vmem:[#allocation5 + $0x4e8] ss:$16 sps:$4 sm:$0xff]  }
 0x272   :  { %4013 = vmatprep.subr.bf16.mxu0 %v7069_v32  ;;  %4185 = vmatprep.subr.bf16.mxu1 %v7072_v33  ;;  %v7147_v32 = vld [vmem:[#allocation5 + $0x504] ss:$16 sps:$4 sm:$0xff]   ;;  %v7150_v33 = vld [vmem:[#allocation5 + $0x50c] ss:$16 sps:$4 sm:$0xff]  }
 0x275   :  { %4014 = vmatpush1.bf16.msra.mxu0 %v7067_v34  ;;  %4186 = vmatpush1.bf16.msra.mxu1 %v7070_v35  ;;  %v7145_v34 = vld [vmem:[#allocation5 + $0x500] ss:$16 sps:$4 sm:$0xff]   ;;  %v7148_v35 = vld [vmem:[#allocation5 + $0x508] ss:$16 sps:$4 sm:$0xff]  }
 0x276   :  { %4015 = vmatprep.subr.bf16.mxu0 %v7075_v36  ;;  %4187 = vmatprep.subr.bf16.mxu1 %v7078_v37  ;;  %v7153_v36 = vld [vmem:[#allocation5 + $0x524] ss:$16 sps:$4 sm:$0xff]   ;;  %v7156_v37 = vld [vmem:[#allocation5 + $0x52c] ss:$16 sps:$4 sm:$0xff]  }
 0x279   :  { %4016 = vmatpush1.bf16.msra.mxu0 %v7073_v38  ;;  %4188 = vmatpush1.bf16.msra.mxu1 %v7076_v39  ;;  %v7151_v38 = vld [vmem:[#allocation5 + $0x520] ss:$16 sps:$4 sm:$0xff]   ;;  %v7154_v39 = vld [vmem:[#allocation5 + $0x528] ss:$16 sps:$4 sm:$0xff]  }
 0x27a   :  { %4017 = vmatprep.subr.bf16.mxu0 %v7081_v40  ;;  %4189 = vmatprep.subr.bf16.mxu1 %v7084_v41  ;;  %v7159_v40 = vld [vmem:[#allocation5 + $0x544] ss:$16 sps:$4 sm:$0xff]   ;;  %v7162_v41 = vld [vmem:[#allocation5 + $0x54c] ss:$16 sps:$4 sm:$0xff]  }
 0x27d   :  { %4018 = vmatpush1.bf16.msra.mxu0 %v7079_v42  ;;  %4190 = vmatpush1.bf16.msra.mxu1 %v7082_v43  ;;  %v7157_v42 = vld [vmem:[#allocation5 + $0x540] ss:$16 sps:$4 sm:$0xff]   ;;  %v7160_v43 = vld [vmem:[#allocation5 + $0x548] ss:$16 sps:$4 sm:$0xff]  }
 0x27e   :  { %4019 = vmatprep.subr.bf16.mxu0 %v7087_v44  ;;  %4191 = vmatprep.subr.bf16.mxu1 %v7090_v45  ;;  %v7165_v44 = vld [vmem:[#allocation5 + $0x564] ss:$16 sps:$4 sm:$0xff]   ;;  %v7168_v45 = vld [vmem:[#allocation5 + $0x56c] ss:$16 sps:$4 sm:$0xff]  }
 0x281   :  { %4020 = vmatpush1.bf16.msra.mxu0 %v7085_v46  ;;  %4192 = vmatpush1.bf16.msra.mxu1 %v7088_v47  ;;  %v7163_v46 = vld [vmem:[#allocation5 + $0x560] ss:$16 sps:$4 sm:$0xff]   ;;  %v7166_v47 = vld [vmem:[#allocation5 + $0x568] ss:$16 sps:$4 sm:$0xff]  }
 0x282   :  { %4021 = vmatprep.subr.bf16.mxu0 %v7093_v48  ;;  %4193 = vmatprep.subr.bf16.mxu1 %v7096_v49  ;;  %v7171_v48 = vld [vmem:[#allocation5 + $0x584] ss:$16 sps:$4 sm:$0xff]   ;;  %v7174_v49 = vld [vmem:[#allocation5 + $0x58c] ss:$16 sps:$4 sm:$0xff]  }
 0x285   :  { %4022 = vmatpush1.bf16.msra.mxu0 %v7091_v50  ;;  %4194 = vmatpush1.bf16.msra.mxu1 %v7094_v51  ;;  %v7169_v50 = vld [vmem:[#allocation5 + $0x580] ss:$16 sps:$4 sm:$0xff]   ;;  %v7172_v51 = vld [vmem:[#allocation5 + $0x588] ss:$16 sps:$4 sm:$0xff]  }
 0x286   :  { %4034 = vmatprep.subr.bf16.mxu0 %v7099_v54  ;;  %4206 = vmatprep.subr.bf16.mxu1 %v7102_v55  ;;  %v7175_v54 = vld [vmem:[#allocation5 + $0x5a0] ss:$16 sps:$4 sm:$0xff]   ;;  %v7178_v55 = vld [vmem:[#allocation5 + $0x5a8] ss:$16 sps:$4 sm:$0xff]  }
 0x288   :  { %4024 = vmatmul.mubr.bf16.vlgmr.msra.gmra.mrb[8].mxu0 %v2384_v56  ;;  %4196 = vmatmul.mubr.bf16.vlgmr.msra.gmra.mrb[8].mxu1 %v2384_v56  ;;  %v7183_v56 = vld [vmem:[#allocation5 + $0x5c4] ss:$16 sps:$4 sm:$0xff]  }
 0x289   :  { %4035 = vmatpush1.bf16.msra.mxu0 %v7097_v1  ;;  %4207 = vmatpush1.bf16.msra.mxu1 %v7100_v2  ;;  %v7184_v1 = vld [vmem:[#allocation5 + $0x5c8] ss:$16 sps:$4 sm:$0xff]   ;;  %v7189_v2 = vld [vmem:[#allocation5 + $0x5e4] ss:$16 sps:$4 sm:$0xff]  }
 0x28a   :  { %4036 = vmatprep.subr.bf16.mxu0 %v7105_v3  ;;  %4208 = vmatprep.subr.bf16.mxu1 %v7108_v4  ;;  %v7192_v3 = vld [vmem:[#allocation5 + $0x5ec] ss:$16 sps:$4 sm:$0xff]   ;;  %v7187_v4 = vld [vmem:[#allocation5 + $0x5e0] ss:$16 sps:$4 sm:$0xff]  }
 0x28b   :  { %4066 = vmatprep.mubr.bf16.mxu0 %v2387_v5  ;;  %4238 = vmatprep.mubr.bf16.mxu1 %v2387_v5  ;;  %v7190_v5 = vld [vmem:[#allocation5 + $0x5e8] ss:$16 sps:$4 sm:$0xff]  }
 0x28d   :  { %4037 = vmatpush1.bf16.msra.mxu0 %v7103_v6  ;;  %4209 = vmatpush1.bf16.msra.mxu1 %v7106_v7  ;;  %v2370_v6 = vld [vmem:[%s8211_s3 + $0x20] sm:$0xff] }
 0x28e   :  { %4038 = vmatprep.subr.bf16.mxu0 %v7111_v8  ;;  %4210 = vmatprep.subr.bf16.mxu1 %v7114_v9  ;;  %v2378_v7 = vld [vmem:[%s8211_s3 + $0x60] sm:$0xff]  ;;  %v7198_v9 = vld [vmem:[#allocation5 + $0x60c] ss:$16 sps:$4 sm:$0xff]  }
 0x28f   :  { %v7195_v8 = vld [vmem:[#allocation5 + $0x604] ss:$16 sps:$4 sm:$0xff]  }
 0x291   :  { %4039 = vmatpush1.bf16.msra.mxu0 %v7109_v10  ;;  %4211 = vmatpush1.bf16.msra.mxu1 %v7112_v11  ;;  %v2386_v10 = vpack.c.bf16 %v2378_v7, %v2370_v6  ;;  %v2373_v11 = vld [vmem:[%s8211_s3 + $0x38] sm:$0xff]  ;;  %v7249_v7 = vld [vmem:[#allocation5 + $0x724] ss:$16 sps:$4 sm:$0xff]  }
 0x292   :  { %4040 = vmatprep.subr.bf16.mxu0 %v7117_v12  ;;  %4212 = vmatprep.subr.bf16.mxu1 %v7120_v13  ;;  %v2381_v12 = vld [vmem:[%s8211_s3 + $0x78] sm:$0xff]  ;;  %v7193_v13 = vld [vmem:[#allocation5 + $0x600] ss:$16 sps:$4 sm:$0xff]  }
 0x293   :  { %v7244_v6 = vld [vmem:[#allocation5 + $0x708] ss:$16 sps:$4 sm:$0xff]  }
 0x295   :  { %4041 = vmatpush1.bf16.msra.mxu0 %v7115_v14  ;;  %4213 = vmatpush1.bf16.msra.mxu1 %v7118_v15  ;;  %v7196_v14 = vld [vmem:[#allocation5 + $0x608] ss:$16 sps:$4 sm:$0xff]   ;;  %v7201_v15 = vld [vmem:[#allocation5 + $0x624] ss:$16 sps:$4 sm:$0xff]  }
 0x296   :  { %4042 = vmatprep.subr.bf16.mxu0 %v7123_v16  ;;  %4214 = vmatprep.subr.bf16.mxu1 %v7126_v17  ;;  %v7204_v16 = vld [vmem:[#allocation5 + $0x62c] ss:$16 sps:$4 sm:$0xff]   ;;  %v2389_v17 = vpack.c.bf16 %v2381_v12, %v2373_v11  ;;  %v7255_v11 = vld [vmem:[#allocation5 + $0x744] ss:$16 sps:$4 sm:$0xff]  }
 0x297   :  { %v7258_v12 = vld [vmem:[#allocation5 + $0x74c] ss:$16 sps:$4 sm:$0xff]  }
 0x299   :  { %4043 = vmatpush1.bf16.msra.mxu0 %v7121_v18  ;;  %4215 = vmatpush1.bf16.msra.mxu1 %v7124_v19  ;;  %v7199_v18 = vld [vmem:[#allocation5 + $0x620] ss:$16 sps:$4 sm:$0xff]   ;;  %v7202_v19 = vld [vmem:[#allocation5 + $0x628] ss:$16 sps:$4 sm:$0xff]  }
 0x29a   :  { %4044 = vmatprep.subr.bf16.mxu0 %v7129_v20  ;;  %4216 = vmatprep.subr.bf16.mxu1 %v7132_v21  ;;  %v7207_v20 = vld [vmem:[#allocation5 + $0x644] ss:$16 sps:$4 sm:$0xff]   ;;  %v7210_v21 = vld [vmem:[#allocation5 + $0x64c] ss:$16 sps:$4 sm:$0xff]  }
 0x29d   :  { %4045 = vmatpush1.bf16.msra.mxu0 %v7127_v22  ;;  %4217 = vmatpush1.bf16.msra.mxu1 %v7130_v23  ;;  %v7205_v22 = vld [vmem:[#allocation5 + $0x640] ss:$16 sps:$4 sm:$0xff]   ;;  %v7208_v23 = vld [vmem:[#allocation5 + $0x648] ss:$16 sps:$4 sm:$0xff]  }
 0x29e   :  { %4046 = vmatprep.subr.bf16.mxu0 %v7135_v24  ;;  %4218 = vmatprep.subr.bf16.mxu1 %v7138_v25  ;;  %v7213_v24 = vld [vmem:[#allocation5 + $0x664] ss:$16 sps:$4 sm:$0xff]   ;;  %v7216_v25 = vld [vmem:[#allocation5 + $0x66c] ss:$16 sps:$4 sm:$0xff]  }
 0x2a1   :  { %4047 = vmatpush1.bf16.msra.mxu0 %v7133_v26  ;;  %4219 = vmatpush1.bf16.msra.mxu1 %v7136_v27  ;;  %v7211_v26 = vld [vmem:[#allocation5 + $0x660] ss:$16 sps:$4 sm:$0xff]   ;;  %v7214_v27 = vld [vmem:[#allocation5 + $0x668] ss:$16 sps:$4 sm:$0xff]  }
 0x2a2   :  { %4048 = vmatprep.subr.bf16.mxu0 %v7141_v28  ;;  %4220 = vmatprep.subr.bf16.mxu1 %v7144_v29  ;;  %v7219_v28 = vld [vmem:[#allocation5 + $0x684] ss:$16 sps:$4 sm:$0xff]   ;;  %v7222_v29 = vld [vmem:[#allocation5 + $0x68c] ss:$16 sps:$4 sm:$0xff]  }
 0x2a5   :  { %4049 = vmatpush1.bf16.msra.mxu0 %v7139_v30  ;;  %4221 = vmatpush1.bf16.msra.mxu1 %v7142_v31  ;;  %v7217_v30 = vld [vmem:[#allocation5 + $0x680] ss:$16 sps:$4 sm:$0xff]   ;;  %v7220_v31 = vld [vmem:[#allocation5 + $0x688] ss:$16 sps:$4 sm:$0xff]  }
 0x2a6   :  { %4050 = vmatprep.subr.bf16.mxu0 %v7147_v32  ;;  %4222 = vmatprep.subr.bf16.mxu1 %v7150_v33  ;;  %v7225_v32 = vld [vmem:[#allocation5 + $0x6a4] ss:$16 sps:$4 sm:$0xff]   ;;  %v7228_v33 = vld [vmem:[#allocation5 + $0x6ac] ss:$16 sps:$4 sm:$0xff]  }
 0x2a9   :  { %4051 = vmatpush1.bf16.msra.mxu0 %v7145_v34  ;;  %4223 = vmatpush1.bf16.msra.mxu1 %v7148_v35  ;;  %v7223_v34 = vld [vmem:[#allocation5 + $0x6a0] ss:$16 sps:$4 sm:$0xff]   ;;  %v7226_v35 = vld [vmem:[#allocation5 + $0x6a8] ss:$16 sps:$4 sm:$0xff]  }
 0x2aa   :  { %4052 = vmatprep.subr.bf16.mxu0 %v7153_v36  ;;  %4224 = vmatprep.subr.bf16.mxu1 %v7156_v37  ;;  %v7231_v36 = vld [vmem:[#allocation5 + $0x6c4] ss:$16 sps:$4 sm:$0xff]   ;;  %v7234_v37 = vld [vmem:[#allocation5 + $0x6cc] ss:$16 sps:$4 sm:$0xff]  }
 0x2ad   :  { %4053 = vmatpush1.bf16.msra.mxu0 %v7151_v38  ;;  %4225 = vmatpush1.bf16.msra.mxu1 %v7154_v39 }
 0x2ae   :  { %4054 = vmatprep.subr.bf16.mxu0 %v7159_v40  ;;  %4226 = vmatprep.subr.bf16.mxu1 %v7162_v41  ;;  %v6004_v40 = vld [vmem:[%s8215_s7] ss:$0 sm:$0xff] }
 0x2b1   :  { %4055 = vmatpush1.bf16.msra.mxu0 %v7157_v42  ;;  %4227 = vmatpush1.bf16.msra.mxu1 %v7160_v43 }
 0x2b2   :  { %4056 = vmatprep.subr.bf16.mxu0 %v7165_v44  ;;  %4228 = vmatprep.subr.bf16.mxu1 %v7168_v45 }
 0x2b5   :  { %4057 = vmatpush1.bf16.msra.mxu0 %v7163_v46  ;;  %4229 = vmatpush1.bf16.msra.mxu1 %v7166_v47  ;;  %v7229_v47 = vld [vmem:[#allocation5 + $0x6c0] ss:$16 sps:$4 sm:$0xff]  }
 0x2b6   :  { %4058 = vmatprep.subr.bf16.mxu0 %v7171_v48  ;;  %4230 = vmatprep.subr.bf16.mxu1 %v7174_v49  ;;  %v7232_v48 = vld [vmem:[#allocation5 + $0x6c8] ss:$16 sps:$4 sm:$0xff]  }
 0x2b9   :  { %4059 = vmatpush1.bf16.msra.mxu0 %v7169_v50  ;;  %4231 = vmatpush1.bf16.msra.mxu1 %v7172_v51  ;;  %v7237_v51 = vld [vmem:[#allocation5 + $0x6e4] ss:$16 sps:$4 sm:$0xff]  }
 0x2ba   :  { %4060 = vmatprep.subr.bf16.mxu0 %v7177_v52  ;;  %4232 = vmatprep.subr.bf16.mxu1 %v7180_v53  ;;  %v7240_v52 = vld [vmem:[#allocation5 + $0x6ec] ss:$16 sps:$4 sm:$0xff]  }
 0x2bd   :  { %4061 = vmatpush1.bf16.msra.mxu0 %v7175_v54  ;;  %4233 = vmatpush1.bf16.msra.mxu1 %v7178_v55 }
 0x2be   :  { %4062 = vmatprep.subr.bf16.mxu0 %v7183_v56  ;;  %4234 = vmatprep.subr.bf16.mxu1 %v7186_v57 }
 0x2c1   :  { %4063 = vmatpush1.bf16.msra.mxu0 %v7181_v62  ;;  %4235 = vmatpush1.bf16.msra.mxu1 %v7184_v1  ;;  %v7235_v62 = vld [vmem:[#allocation5 + $0x6e0] ss:$16 sps:$4 sm:$0xff]   ;;  %v7238_v1 = vld [vmem:[#allocation5 + $0x6e8] ss:$16 sps:$4 sm:$0xff]  }
 0x2c2   :  { %4064 = vmatprep.subr.bf16.mxu0 %v7189_v2  ;;  %4236 = vmatprep.subr.bf16.mxu1 %v7192_v3  ;;  %v7243_v2 = vld [vmem:[#allocation5 + $0x704] ss:$16 sps:$4 sm:$0xff]   ;;  %v7246_v3 = vld [vmem:[#allocation5 + $0x70c] ss:$16 sps:$4 sm:$0xff]  }
 0x2c5   :  { %4065 = vmatpush1.bf16.msra.mxu0 %v7187_v4  ;;  %4237 = vmatpush1.bf16.msra.mxu1 %v7190_v5  ;;  %v7241_v5 = vld [vmem:[#allocation5 + $0x700] ss:$16 sps:$4 sm:$0xff]  }
 0x2c6   :  { %4077 = vmatprep.subr.bf16.mxu0 %v7195_v8  ;;  %4249 = vmatprep.subr.bf16.mxu1 %v7198_v9  ;;  %v7252_v8 = vld [vmem:[#allocation5 + $0x72c] ss:$16 sps:$4 sm:$0xff]   ;;  %v7247_v9 = vld [vmem:[#allocation5 + $0x720] ss:$16 sps:$4 sm:$0xff]  }
 0x2c8   :  { %4067 = vmatmul.mubr.bf16.vlgmr.msra.gmra.mrb[8].mxu0 %v2386_v10  ;;  %4239 = vmatmul.mubr.bf16.vlgmr.msra.gmra.mrb[8].mxu1 %v2386_v10  ;;  %v7250_v10 = vld [vmem:[#allocation5 + $0x728] ss:$16 sps:$4 sm:$0xff]  }
 0x2c9   :  { %4078 = vmatpush1.bf16.msra.mxu0 %v7193_v13  ;;  %4250 = vmatpush1.bf16.msra.mxu1 %v7196_v14  ;;  %v7253_v13 = vld [vmem:[#allocation5 + $0x740] ss:$16 sps:$4 sm:$0xff]   ;;  %v7256_v14 = vld [vmem:[#allocation5 + $0x748] ss:$16 sps:$4 sm:$0xff]  }
 0x2ca   :  { %4079 = vmatprep.subr.bf16.mxu0 %v7201_v15  ;;  %4251 = vmatprep.subr.bf16.mxu1 %v7204_v16  ;;  %v7261_v15 = vld [vmem:[#allocation5 + $0x764] ss:$16 sps:$4 sm:$0xff]   ;;  %v7264_v16 = vld [vmem:[#allocation5 + $0x76c] ss:$16 sps:$4 sm:$0xff]  }
 0x2cb   :  { %4109 = vmatprep.mubr.bf16.mxu0 %v2389_v17  ;;  %4281 = vmatprep.mubr.bf16.mxu1 %v2389_v17  ;;  %v7259_v17 = vld [vmem:[#allocation5 + $0x760] ss:$16 sps:$4 sm:$0xff]  }
 0x2cd   :  { %4080 = vmatpush1.bf16.msra.mxu0 %v7199_v18  ;;  %4252 = vmatpush1.bf16.msra.mxu1 %v7202_v19  ;;  %v7262_v18 = vld [vmem:[#allocation5 + $0x768] ss:$16 sps:$4 sm:$0xff]   ;;  %v7267_v19 = vld [vmem:[#allocation5 + $0x784] ss:$16 sps:$4 sm:$0xff]  }
 0x2ce   :  { %4081 = vmatprep.subr.bf16.mxu0 %v7207_v20  ;;  %4253 = vmatprep.subr.bf16.mxu1 %v7210_v21  ;;  %v7270_v20 = vld [vmem:[#allocation5 + $0x78c] ss:$16 sps:$4 sm:$0xff]   ;;  %v7265_v21 = vld [vmem:[#allocation5 + $0x780] ss:$16 sps:$4 sm:$0xff]  }
 0x2d1   :  { %4082 = vmatpush1.bf16.msra.mxu0 %v7205_v22  ;;  %4254 = vmatpush1.bf16.msra.mxu1 %v7208_v23  ;;  %v7268_v22 = vld [vmem:[#allocation5 + $0x788] ss:$16 sps:$4 sm:$0xff]   ;;  %v7273_v23 = vld [vmem:[#allocation5 + $0x7a4] ss:$16 sps:$4 sm:$0xff]  }
 0x2d2   :  { %4083 = vmatprep.subr.bf16.mxu0 %v7213_v24  ;;  %4255 = vmatprep.subr.bf16.mxu1 %v7216_v25  ;;  %v7276_v24 = vld [vmem:[#allocation5 + $0x7ac] ss:$16 sps:$4 sm:$0xff]   ;;  %v7271_v25 = vld [vmem:[#allocation5 + $0x7a0] ss:$16 sps:$4 sm:$0xff]  }
 0x2d5   :  { %4084 = vmatpush1.bf16.msra.mxu0 %v7211_v26  ;;  %4256 = vmatpush1.bf16.msra.mxu1 %v7214_v27  ;;  %v7274_v26 = vld [vmem:[#allocation5 + $0x7a8] ss:$16 sps:$4 sm:$0xff]   ;;  %v7279_v27 = vld [vmem:[#allocation5 + $0x7c4] ss:$16 sps:$4 sm:$0xff]  }
 0x2d6   :  { %4085 = vmatprep.subr.bf16.mxu0 %v7219_v28  ;;  %4257 = vmatprep.subr.bf16.mxu1 %v7222_v29  ;;  %v7282_v28 = vld [vmem:[#allocation5 + $0x7cc] ss:$16 sps:$4 sm:$0xff]   ;;  %v7277_v29 = vld [vmem:[#allocation5 + $0x7c0] ss:$16 sps:$4 sm:$0xff]  }
 0x2d9   :  { %4086 = vmatpush1.bf16.msra.mxu0 %v7217_v30  ;;  %4258 = vmatpush1.bf16.msra.mxu1 %v7220_v31  ;;  %v7280_v30 = vld [vmem:[#allocation5 + $0x7c8] ss:$16 sps:$4 sm:$0xff]   ;;  %v7285_v31 = vld [vmem:[#allocation5 + $0x7e4] ss:$16 sps:$4 sm:$0xff]  }
 0x2da   :  { %4087 = vmatprep.subr.bf16.mxu0 %v7225_v32  ;;  %4259 = vmatprep.subr.bf16.mxu1 %v7228_v33  ;;  %v7288_v32 = vld [vmem:[#allocation5 + $0x7ec] ss:$16 sps:$4 sm:$0xff]   ;;  %v7283_v33 = vld [vmem:[#allocation5 + $0x7e0] ss:$16 sps:$4 sm:$0xff]  }
 0x2db   :  { %v6343_v38 = vpop.f32.mrb[4].mxu0  ;;  %v6365_v39 = vpop.f32.mrb[4].mxu1 }
 0x2dc   :  { %v6344_v41 = vpop.f32.mrb[5].mxu0  ;;  %v6366_v42 = vpop.f32.mrb[5].mxu1 }
 0x2dd   :  { %v6345_v43 = vadd.f32 %v6344_v41, %v6343_v38  ;;  %v6367_v44 = vadd.f32 %v6366_v42, %v6365_v39  ;;  %4088 = vmatpush1.bf16.msra.mxu0 %v7223_v34  ;;  %4260 = vmatpush1.bf16.msra.mxu1 %v7226_v35  ;;  %v6346_v45 = vpop.f32.mrb[6].mxu0  ;;  %v6368_v46 = vpop.f32.mrb[6].mxu1  ;;  %v7286_v34 = vld [vmem:[#allocation5 + $0x7e8] ss:$16 sps:$4 sm:$0xff]   ;;  %v2372_v35 = vld [vmem:[%s8211_s3 + $0x30] sm:$0xff]  ;;  %v7290_v38 = vld [vmem:[%s8218_s10 + $0xc0] sm:$0xff]  }
 0x2de   :  { %v6347_v49 = vpop.f32.mrb[7].mxu0  ;;  %v6369_v50 = vpop.f32.mrb[7].mxu1  ;;  %4089 = vmatprep.subr.bf16.mxu0 %v7231_v36  ;;  %4261 = vmatprep.subr.bf16.mxu1 %v7234_v37  ;;  %v2380_v36 = vld [vmem:[%s8211_s3 + $0x70] sm:$0xff]  ;;  %v7289_v37 = vld [vmem:[%s8218_s10 + $0x40] sm:$0xff]   ;;  %v7293_v42 = vld [vmem:[%s8218_s10 + $0x48] sm:$0xff]   ;;  %s8227_s3 = sld [smem:[#allocation14_spill]] }
 0x2df   :  { %v2319_v53 = vadd.f32 %v6345_v43, %v6004_v40  ;;  %v6348_v54 = vadd.f32 %v6347_v49, %v6346_v45  ;;  %v6370_v55 = vadd.f32 %v6369_v50, %v6368_v46  ;;  %v2388_v39 = vpack.c.bf16 %v2380_v36, %v2372_v35  ;;  %v7292_v41 = vld [vmem:[%s8218_s10 + $0x80] sm:$0xff]   ;;  %v7294_v43 = vld [vmem:[%s8218_s10 + $0xc8] sm:$0xff]   ;;  %v7297_v46 = vld [vmem:[%s8218_s10 + $0x50] sm:$0xff]  }
 0x2e0   :  { %v7296_v45 = vld [vmem:[%s8218_s10 + $0x88] sm:$0xff]   ;;  %v7300_v49 = vld [vmem:[%s8218_s10 + $0x90] sm:$0xff]   ;;  %v7301_v50 = vld [vmem:[%s8218_s10 + $0x58] sm:$0xff]  }
 0x2e1   :  { %v7751_v56 = vadd.f32 %v6367_v44, %v2319_v53  ;;  %v2322_v57 = vadd.f32 %v6348_v54, %v6004_v40  ;;  %4090 = vmatpush1.bf16.msra.mxu0 %v7229_v47  ;;  %4262 = vmatpush1.bf16.msra.mxu1 %v7232_v48  ;;  %v7291_v40 = vld [vmem:[%s8218_s10] sm:$0xff]   ;;  %v7295_v44 = vld [vmem:[%s8218_s10 + $0x8] sm:$0xff]   ;;  %v7298_v47 = vld [vmem:[%s8218_s10 + $0xd0] sm:$0xff]  }
 0x2e2   :  { %4091 = vmatprep.subr.bf16.mxu0 %v7237_v51  ;;  %4263 = vmatprep.subr.bf16.mxu1 %v7240_v52  ;;  %v7299_v48 = vld [vmem:[%s8218_s10 + $0x10] sm:$0xff]   ;;  %v7302_v51 = vld [vmem:[%s8218_s10 + $0xd8] sm:$0xff]   ;;  %v7305_v54 = vld [vmem:[%s8218_s10 + $0x60] sm:$0xff]  }
 0x2e3   :  { %v7753_v4 = vadd.f32 %v6370_v55, %v2322_v57  ;;  %v7303_v52 = vld [vmem:[%s8218_s10 + $0x18] sm:$0xff]   ;;  %v7306_v55 = vld [vmem:[%s8218_s10 + $0xe0] sm:$0xff]  }
 0x2e4   :  { %v7304_v53 = vld [vmem:[%s8218_s10 + $0x98] sm:$0xff]   ;;  %v7307_v57 = vld [vmem:[%s8218_s10 + $0x20] sm:$0xff]  }
 0x2e5   :  { %4092 = vmatpush1.bf16.msra.mxu0 %v7235_v62  ;;  %4264 = vmatpush1.bf16.msra.mxu1 %v7238_v1  ;;  %v7308_v62 = vld [vmem:[%s8218_s10 + $0xa0] sm:$0xff]   ;;  %v7309_v1 = vld [vmem:[%s8218_s10 + $0x68] sm:$0xff]  }
 0x2e6   :  { %4093 = vmatprep.subr.bf16.mxu0 %v7243_v2  ;;  %4265 = vmatprep.subr.bf16.mxu1 %v7246_v3  ;;  %v7310_v2 = vld [vmem:[%s8218_s10 + $0xe8] sm:$0xff]  }
 0x2e7   :  { %v7311_v3 = vld [vmem:[%s8218_s10 + $0x28] sm:$0xff]  }
 0x2e9   :  { %4094 = vmatpush1.bf16.msra.mxu0 %v7241_v5  ;;  %4266 = vmatpush1.bf16.msra.mxu1 %v7244_v6  ;;  %v7312_v5 = vld [vmem:[%s8218_s10 + $0xa8] sm:$0xff]   ;;  %v7313_v6 = vld [vmem:[%s8218_s10 + $0x70] sm:$0xff]  }
 0x2ea   :  { %4095 = vmatprep.subr.bf16.mxu0 %v7249_v7  ;;  %4267 = vmatprep.subr.bf16.mxu1 %v7252_v8  ;;  %v7314_v7 = vld [vmem:[%s8218_s10 + $0xf0] sm:$0xff]  }
 0x2eb   :  { %v7315_v8 = vld [vmem:[%s8218_s10 + $0x30] sm:$0xff]  }
 0x2ed   :  { %4096 = vmatpush1.bf16.msra.mxu0 %v7247_v9  ;;  %4268 = vmatpush1.bf16.msra.mxu1 %v7250_v10  ;;  %v7316_v9 = vld [vmem:[%s8218_s10 + $0xb0] sm:$0xff]   ;;  %v7317_v10 = vld [vmem:[%s8218_s10 + $0x78] sm:$0xff]  }
 0x2ee   :  { %4097 = vmatprep.subr.bf16.mxu0 %v7255_v11  ;;  %4269 = vmatprep.subr.bf16.mxu1 %v7258_v12  ;;  %v7318_v11 = vld [vmem:[%s8218_s10 + $0xf8] sm:$0xff]  }
 0x2ef   :  { %v7319_v12 = vld [vmem:[%s8218_s10 + $0x38] sm:$0xff]  }
 0x2f1   :  { %4098 = vmatpush1.bf16.msra.mxu0 %v7253_v13  ;;  %4270 = vmatpush1.bf16.msra.mxu1 %v7256_v14  ;;  %v7320_v13 = vld [vmem:[%s8218_s10 + $0xb8] sm:$0xff]   ;;  %v2646_v14 = vld [vmem:[%s8217_s9] sm:$0xf] }
 0x2f2   :  { %4099 = vmatprep.subr.bf16.mxu0 %v7261_v15  ;;  %4271 = vmatprep.subr.bf16.mxu1 %v7264_v16  ;;  %v2651_v15 = vrot.slane %v2646_v14, %v7690_v60  ;;  %v2659_v16 = vrot.slane %v2646_v14, %v375_v61 }
 0x2f5   :  { %4100 = vmatpush1.bf16.msra.mxu0 %v7259_v17  ;;  %4272 = vmatpush1.bf16.msra.mxu1 %v7262_v18  ;;  %v2655_v17 = vrot.slane %v2646_v14, %v7697_v63  ;;  %v2663_v18 = vrot.slane %v2646_v14, %v379_v0 }
 0x2f6   :  { %4101 = vmatprep.subr.bf16.mxu0 %v7267_v19  ;;  %4273 = vmatprep.subr.bf16.mxu1 %v7270_v20 }
 0x2f9   :  { %4102 = vmatpush1.bf16.msra.mxu0 %v7265_v21  ;;  %4274 = vmatpush1.bf16.msra.mxu1 %v7268_v22 }
 0x2fa   :  { %4103 = vmatprep.subr.bf16.mxu0 %v7273_v23  ;;  %4275 = vmatprep.subr.bf16.mxu1 %v7276_v24 }
 0x2fd   :  { %4104 = vmatpush1.bf16.msra.mxu0 %v7271_v25  ;;  %4276 = vmatpush1.bf16.msra.mxu1 %v7274_v26 }
 0x2fe   :  { %4105 = vmatprep.subr.bf16.mxu0 %v7279_v27  ;;  %4277 = vmatprep.subr.bf16.mxu1 %v7282_v28 }
 0x301   :  { %4106 = vmatpush1.bf16.msra.mxu0 %v7277_v29  ;;  %4278 = vmatpush1.bf16.msra.mxu1 %v7280_v30 }
 0x302   :  { %4107 = vmatprep.subr.bf16.mxu0 %v7285_v31  ;;  %4279 = vmatprep.subr.bf16.mxu1 %v7288_v32 }
 0x305   :  { %4108 = vmatpush1.bf16.msra.mxu0 %v7283_v33  ;;  %4280 = vmatpush1.bf16.msra.mxu1 %v7286_v34 }
 0x306   :  { %6371 = vmatprep.subr.bf16.mxu0 %v7289_v37  ;;  %6393 = vmatprep.subr.bf16.mxu1 %v7290_v38 }
 0x308   :  { %4110 = vmatmul.mubr.bf16.vlgmr.msra.gmra.mrb[8].mxu0 %v2388_v39  ;;  %4282 = vmatmul.mubr.bf16.vlgmr.msra.gmra.mrb[8].mxu1 %v2388_v39 }
 0x309   :  { %6372 = vmatpush3.bf16.msra.mxu0 %v7291_v40  ;;  %6394 = vmatpush3.bf16.msra.mxu1 %v7292_v41 }
 0x30a   :  { %6373 = vmatprep.subr.bf16.mxu0 %v7293_v42  ;;  %6395 = vmatprep.subr.bf16.mxu1 %v7294_v43 }
 0x30d   :  { %6374 = vmatpush3.bf16.msra.mxu0 %v7295_v44  ;;  %6396 = vmatpush3.bf16.msra.mxu1 %v7296_v45 }
 0x30e   :  { %6375 = vmatprep.subr.bf16.mxu0 %v7297_v46  ;;  %6397 = vmatprep.subr.bf16.mxu1 %v7298_v47 }
 0x311   :  { %6376 = vmatpush3.bf16.msra.mxu0 %v7299_v48  ;;  %6398 = vmatpush3.bf16.msra.mxu1 %v7300_v49 }
 0x312   :  { %6377 = vmatprep.subr.bf16.mxu0 %v7301_v50  ;;  %6399 = vmatprep.subr.bf16.mxu1 %v7302_v51 }
 0x315   :  { %6378 = vmatpush3.bf16.msra.mxu0 %v7303_v52  ;;  %6400 = vmatpush3.bf16.msra.mxu1 %v7304_v53 }
 0x316   :  { %6379 = vmatprep.subr.bf16.mxu0 %v7305_v54  ;;  %6401 = vmatprep.subr.bf16.mxu1 %v7306_v55 }
 0x319   :  { %6380 = vmatpush3.bf16.msra.mxu0 %v7307_v57  ;;  %6402 = vmatpush3.bf16.msra.mxu1 %v7308_v62 }
 0x31a   :  { %6381 = vmatprep.subr.bf16.mxu0 %v7309_v1  ;;  %6403 = vmatprep.subr.bf16.mxu1 %v7310_v2 }
 0x31d   :  { %6382 = vmatpush3.bf16.msra.mxu0 %v7311_v3  ;;  %6404 = vmatpush3.bf16.msra.mxu1 %v7312_v5 }
 0x31e   :  { %6383 = vmatprep.subr.bf16.mxu0 %v7313_v6  ;;  %6405 = vmatprep.subr.bf16.mxu1 %v7314_v7 }
 0x321   :  { %6384 = vmatpush3.bf16.msra.mxu0 %v7315_v8  ;;  %6406 = vmatpush3.bf16.msra.mxu1 %v7316_v9 }
 0x322   :  { %6385 = vmatprep.subr.bf16.mxu0 %v7317_v10  ;;  %6407 = vmatprep.subr.bf16.mxu1 %v7318_v11 }
 0x325   :  { %6386 = vmatpush3.bf16.msra.mxu0 %v7319_v12  ;;  %6408 = vmatpush3.bf16.msra.mxu1 %v7320_v13 }
 0x3db   :  { %v4111_v19 = vpop.f32.mrb[8].mxu0  ;;  %v4283_v20 = vpop.f32.mrb[8].mxu1 }
 0x3dc   :  { %v6423_v21 = vadd.f32 %v4111_v19, %v2651_v15  ;;  %v6427_v22 = vadd.f32 %v4283_v20, %v2659_v16  ;;  %v4113_v23 = vpop.f32.mrb[9].mxu0  ;;  %v4285_v24 = vpop.f32.mrb[9].mxu1 }
 0x3dd   :  { %v6424_v25 = vadd.f32 %v4113_v23, %v2655_v17  ;;  %v6428_v26 = vadd.f32 %v4285_v24, %v2663_v18  ;;  %v4115_v27 = vpop.f32.mrb[10].mxu0  ;;  %v4287_v28 = vpop.f32.mrb[10].mxu1 }
 0x3de   :  { %v4292_v29 = vmax.f32 %v6423_v21, 0.0  ;;  %v4294_v30 = vmax.f32 %v6427_v22, 0.0  ;;  %v6425_v31 = vadd.f32 %v4115_v27, %v2651_v15  ;;  %v6429_v32 = vadd.f32 %v4287_v28, %v2659_v16  ;;  %v4117_v61 = vpop.f32.mrb[11].mxu0  ;;  %v4289_v33 = vpop.f32.mrb[11].mxu1 }
 0x3df   :  { %v4293_v34 = vmax.f32 %v6424_v25, 0.0  ;;  %v4295_v35 = vmax.f32 %v6428_v26, 0.0  ;;  %v6426_v36 = vadd.f32 %v4117_v61, %v2655_v17  ;;  %v6430_v0 = vadd.f32 %v4289_v33, %v2663_v18 }
 0x3e0   :  { %v4300_v37 = vrot.slane %v4292_v29, 4  ;;  %v4312_v38 = vrot.slane %v4294_v30, 4  ;;  %v4296_v39 = vmax.f32 %v6425_v31, 0.0  ;;  %v4298_v40 = vmax.f32 %v6429_v32, 0.0 }
 0x3e1   :  { %v4306_v41 = vrot.slane %v4293_v34, 4  ;;  %v4318_v42 = vrot.slane %v4295_v35, 4  ;;  %v4297_v43 = vmax.f32 %v6426_v36, 0.0  ;;  %v4299_v44 = vmax.f32 %v6430_v0, 0.0 }
 0x3e2   :  { %v4301_v45 = vadd.f32 %v4300_v37, %v4292_v29  ;;  %v4313_v46 = vadd.f32 %v4312_v38, %v4294_v30  ;;  %v4324_v47 = vrot.slane %v4296_v39, 4  ;;  %v4336_v48 = vrot.slane %v4298_v40, 4 }
 0x3e3   :  { %v4307_v49 = vadd.f32 %v4306_v41, %v4293_v34  ;;  %v4319_v50 = vadd.f32 %v4318_v42, %v4295_v35  ;;  %v4330_v51 = vrot.slane %v4297_v43, 4  ;;  %v4342_v52 = vrot.slane %v4299_v44, 4 }
 0x3e4   :  { %v4302_v53 = vrot.slane %v4301_v45, 2  ;;  %v4314_v54 = vrot.slane %v4313_v46, 2  ;;  %v4325_v55 = vadd.f32 %v4324_v47, %v4296_v39  ;;  %v4337_v57 = vadd.f32 %v4336_v48, %v4298_v40 }
 0x3e5   :  { %v4308_v62 = vrot.slane %v4307_v49, 2  ;;  %v4320_v1 = vrot.slane %v4319_v50, 2  ;;  %v4331_v2 = vadd.f32 %v4330_v51, %v4297_v43  ;;  %v4343_v3 = vadd.f32 %v4342_v52, %v4299_v44 }
 0x3e6   :  { %v4303_v5 = vadd.f32 %v4302_v53, %v4301_v45  ;;  %v4315_v6 = vadd.f32 %v4314_v54, %v4313_v46  ;;  %v4326_v7 = vrot.slane %v4325_v55, 2  ;;  %v4338_v8 = vrot.slane %v4337_v57, 2 }
 0x3e7   :  { %v4309_v9 = vadd.f32 %v4308_v62, %v4307_v49  ;;  %v4321_v10 = vadd.f32 %v4320_v1, %v4319_v50  ;;  %v4332_v11 = vrot.slane %v4331_v2, 2  ;;  %v4344_v12 = vrot.slane %v4343_v3, 2 }
 0x3e8   :  { %v4304_v13 = vrot.slane %v4303_v5, 1  ;;  %v4316_v14 = vrot.slane %v4315_v6, 1  ;;  %v4327_v15 = vadd.f32 %v4326_v7, %v4325_v55  ;;  %v4339_v16 = vadd.f32 %v4338_v8, %v4337_v57 }
 0x3e9   :  { %v4310_v17 = vrot.slane %v4309_v9, 1  ;;  %v4322_v18 = vrot.slane %v4321_v10, 1  ;;  %v4333_v19 = vadd.f32 %v4332_v11, %v4331_v2  ;;  %v4345_v20 = vadd.f32 %v4344_v12, %v4343_v3  ;;  %v6293_v12 = vld [vmem:[%s8219_s11] ss:$0 sm:$0xff] }
 0x3ea   :  { %v4305_v21 = vadd.f32 %v4304_v13, %v4303_v5  ;;  %v4317_v22 = vadd.f32 %v4316_v14, %v4315_v6  ;;  %v4328_v23 = vrot.slane %v4327_v15, 1  ;;  %v4340_v24 = vrot.slane %v4339_v16, 1 }
 0x3eb   :  { %v4311_v25 = vadd.f32 %v4310_v17, %v4309_v9  ;;  %v4323_v26 = vadd.f32 %v4322_v18, %v4321_v10  ;;  %v4334_v27 = vrot.slane %v4333_v19, 1  ;;  %v4346_v28 = vrot.slane %v4345_v20, 1 }
 0x3ec   :  { %v4349_v29 = vmul.f32 0.125, %v4305_v21  ;;  %v4351_v30 = vmul.f32 0.125, %v4317_v22  ;;  %v4329_v31 = vadd.f32 %v4328_v23, %v4327_v15  ;;  %v4341_v32 = vadd.f32 %v4340_v24, %v4339_v16 }
 0x3ed   :  { %v4350_v61 = vmul.f32 0.125, %v4311_v25  ;;  %v4352_v33 = vmul.f32 0.125, %v4323_v26  ;;  %v4335_v34 = vadd.f32 %v4334_v27, %v4333_v19  ;;  %v4347_v35 = vadd.f32 %v4346_v28, %v4345_v20 }
 0x3ee   :  { %v4357_v36 = vpack.c.bf16 %v4349_v29, %v4349_v29  ;;  %v4359_v0 = vpack.c.bf16 %v4351_v30, %v4351_v30  ;;  %v4353_v37 = vmul.f32 0.125, %v4329_v31  ;;  %v4355_v38 = vmul.f32 0.125, %v4341_v32 }
 0x3ef   :  { %v4358_v39 = vpack.c.bf16 %v4350_v61, %v4350_v61  ;;  %v4360_v40 = vpack.c.bf16 %v4352_v33, %v4352_v33  ;;  %v4354_v41 = vmul.f32 0.125, %v4335_v34  ;;  %v4356_v42 = vmul.f32 0.125, %v4347_v35 }
 0x3f0   :  { %v4361_v43 = vpack.c.bf16 %v4353_v37, %v4353_v37  ;;  %v4363_v44 = vpack.c.bf16 %v4355_v38, %v4355_v38  ;;  %v4444_v47 = vunpack.c.l.b16 %v4357_v36  ;;  %v4446_v48 = vunpack.c.l.b16 %v4359_v0 }
 0x3f1   :  { %v4362_v45 = vpack.c.bf16 %v4354_v41, %v4354_v41  ;;  %v4364_v46 = vpack.c.bf16 %v4356_v42, %v4356_v42  ;;  %v4445_v51 = vunpack.c.l.b16 %v4358_v39  ;;  %v4447_v52 = vunpack.c.l.b16 %v4360_v40 }
 0x3f2   :  { %v4448_v49 = vunpack.c.l.b16 %v4361_v43  ;;  %v4450_v50 = vunpack.c.l.b16 %v4363_v44  ;;  %v7429_v7 = vmov 1966171168   ;;  %v4782_v33 = vand.u32 127, %v365_v58 }
 0x3f3   :  { %v4449_v53 = vunpack.c.l.b16 %v4362_v45  ;;  %v4451_v54 = vunpack.c.l.b16 %v4364_v46  ;;  %v4739_v8 = vunpack.c.l.s4 %v7429_v7 }
 0x3f4   :  { %v4453_v55 = vsel %vm4452_vm0, %v4448_v49, %v4444_v47  ;;  %v4455_v57 = vsel %vm4452_vm0, %v4450_v50, %v4446_v48  ;;  %v7885_v35 = vsub.s32 %v4782_v33, %v7687_v59 }
 0x3f5   :  { %v4454_v62 = vsel %vm4452_vm0, %v4449_v53, %v4445_v51  ;;  %v4456_v1 = vsel %vm4452_vm0, %v4451_v54, %v4447_v52  ;;  %v4457_v5 = vpack.c.b16 %v4453_v55, %v4453_v55  ;;  %v4459_v6 = vpack.c.b16 %v4455_v57, %v4455_v57 }
 0x3f6   :  { %v4458_v2 = vpack.c.b16 %v4454_v62, %v4454_v62  ;;  %v4460_v3 = vpack.c.b16 %v4456_v1, %v4456_v1  ;;  %v4740_v9 = vunpack.c.0.s8 %v4739_v8  ;;  %v5148_v1 = vld [vmem:[%s8221_s13] sm:$0xff] }
 0x3f8   :  { %4689 = vmatprep.mubr.bf16.mxu0 %v4458_v2  ;;  %4729 = vmatprep.mubr.bf16.mxu1 %v4460_v3  ;;  %v7874_v21 = vsub.s32 %v4740_v9, %v7687_v59 }
 0x3f9   :  { %4690 = vmatmul.mubr.bf16.vlgmr.msra.gmra.mrb[12].mxu0 %v4457_v5  ;;  %4730 = vmatmul.mubr.bf16.vlgmr.msra.gmra.mrb[12].mxu1 %v4459_v6 }
 0x3fa   :  { %v5213_v2 = vrot.slane %v5148_v1, %v7874_v21 }
 0x3fc   :  { %v5221_v3 = vcombine.high %v5213_v2, %v5213_v2  ;;  %v5229_v5 = vrot.slane %v5213_v2, %v7874_v21 }
 0x3fe   :  { %v5243_v6 = vrot.slane %v5221_v3, %v7874_v21  ;;  %v5251_v7 = vcombine.high %v5229_v5, %v5229_v5 }
 0x400   :  { %5263 = vmatprep.subr.bf16.mxu0 %v5243_v6 }
 0x401   :  { %5264 = vmatpush1.bf16.xpose.msra.mxu0 %v5229_v5 }
 0x4cc   :  { %v6387_v10 = vpop.f32.mrb[12].mxu0  ;;  %v6409_v11 = vpop.f32.mrb[12].mxu1 }
 0x4cd   :  { %v6388_v13 = vpop.f32.mrb[13].mxu0  ;;  %v6410_v14 = vpop.f32.mrb[13].mxu1 }
 0x4ce   :  { %v6389_v15 = vadd.f32 %v6388_v13, %v6387_v10  ;;  %v6411_v16 = vadd.f32 %v6410_v14, %v6409_v11  ;;  %v6390_v17 = vpop.f32.mrb[14].mxu0  ;;  %v6412_v18 = vpop.f32.mrb[14].mxu1  ;;  %v4996_v13 = vld [vmem:[%s8210_s2 + $0x48] sm:$0xff] }
 0x4cf   :  { %v6391_v19 = vpop.f32.mrb[15].mxu0  ;;  %v6413_v20 = vpop.f32.mrb[15].mxu1  ;;  %v4998_v17 = vld [vmem:[%s8210_s2 + $0x58] sm:$0xff] }
 0x4d0   :  { %v4692_v22 = vadd.f32 %v6389_v15, %v6293_v12  ;;  %v4988_v12 = vld [vmem:[%s8210_s2 + $0x8] sm:$0xff]  ;;  %v5057_v15 = vrot.slane %v4996_v13, 4  ;;  %v5069_v19 = vrot.slane %v4998_v17, 4 }
 0x4d1   :  { %v5009_v14 = vrot.slane %v4988_v12, 4 }
 0x4d2   :  { %v4732_v23 = vadd.f32 %v6411_v16, %v4692_v22  ;;  %v4990_v16 = vld [vmem:[%s8210_s2 + $0x18] sm:$0xff]  ;;  %v5058_v22 = vadd.f32 %v5057_v15, %v4996_v13 }
 0x4d3   :  { %v5021_v18 = vrot.slane %v4990_v16, 4  ;;  %v5010_v20 = vadd.f32 %v5009_v14, %v4988_v12 }
 0x4d4   :  { %v4744_v24 = vrot.slane %v4732_v23, %v7874_v21  ;;  %v4987_v23 = vld [vmem:[%s8210_s2] sm:$0xff] }
 0x4d6   :  { %v4745_v25 = vcombine.high %v4744_v24, %v4744_v24  ;;  %v4752_v26 = vrot.slane %v4744_v24, %v7874_v21  ;;  %v4995_v24 = vld [vmem:[%s8210_s2 + $0x40] sm:$0xff] }
 0x4d8   :  { %v4763_v27 = vrot.slane %v4752_v26, %v7690_v60  ;;  %v4759_v28 = vrot.slane %v4745_v25, %v7874_v21  ;;  %v5022_v25 = vadd.f32 %v5021_v18, %v4990_v16  ;;  %v5070_v26 = vadd.f32 %v5069_v19, %v4998_v17  ;;  %v4999_v16 = vld [vmem:[%s8210_s2 + $0x60] sm:$0xff] }
 0x4da   :  { %v4770_v29 = vmul.f32 %v4763_v27, %v7751_v56  ;;  %v4767_v30 = vrot.slane %v4759_v28, %v7690_v60  ;;  %v5003_v27 = vrot.slane %v4987_v23, 4  ;;  %v5051_v28 = vrot.slane %v4995_v24, 4 }
 0x4db   :  { %v5023_v33 = vrot.slane %v5022_v25, 2 }
 0x4dc   :  { %v4773_v31 = vsel %vm4772_vm1, %v4770_v29, 0.0  ;;  %v4771_v32 = vmul.f32 %v4767_v30, %v7753_v4  ;;  %v7430_v4 = vmov 0   ;;  %v5011_v29 = vrot.slane %v5010_v20, 2 }
 0x4dd   :  { %4774 = vadd.xlane.f32.xlu0 %v4773_v31  ;;  %6487 = vset.pattern.permute.xlu1 %v7430_v4  ;;  %v5059_v30 = vrot.slane %v5058_v22, 2  ;;  %v4989_v31 = vld [vmem:[%s8210_s2 + $0x10] sm:$0xff] }
 0x4de   :  { %v4776_v61 = vsel %vm4772_vm1, %v4771_v32, 0.0  ;;  %6488 = vset.pattern.permute.xlu0 %v7430_v4  ;;  %v4997_v32 = vld [vmem:[%s8210_s2 + $0x50] sm:$0xff] }
 0x4df   :  { %v5063_v4 = vrot.slane %v4997_v32, 4 }
 0x4e1   :  { %4777 = vadd.xlane.f32.xlu0 %v4776_v61  ;;  %v5131_v61 = vld [vmem:[%s8220_s12] sm:$0xff] }
 0x56a   :  { %v4775_v34 = vpop.xlane.xlu0 %4774 }
 0x56b   :  { %v4786_v0 = vrot.slane %v4775_v34, %v7885_v35 }
 0x56e   :  { %v4778_v36 = vpop.xlane.xlu0 %4777 }
 0x56f   :  { %v4790_v37 = vrot.slane %v4778_v36, %v7885_v35 }
 0x571   :  { %v4791_v56 = vsel %vm4452_vm0, %v4790_v37, %v4786_v0  ;;  %v5052_v0 = vadd.f32 %v5051_v28, %v4995_v24  ;;  %v5012_v37 = vadd.f32 %v5011_v29, %v5010_v20  ;;  %v5075_v29 = vrot.slane %v4999_v16, 4 }
 0x572   :  { %v4794_v38 = vsel %vm4793_vm2, %v4791_v56, -inf  ;;  %v5060_v56 = vadd.f32 %v5059_v30, %v5058_v22  ;;  %v4993_v30 = vld [vmem:[%s8210_s2 + $0x30] sm:$0xff] }
 0x573   :  { %4795 = vmax.xlane.f32.xlu1 %v4794_v38  ;;  %v5015_v38 = vrot.slane %v4989_v31, 4 }
 0x600   :  { %v4796_v39 = vpop.xlane.xlu1 %4795 }
 0x601   :  { %v4801_v58 = vrot.slane %v4796_v39, %v7690_v60  ;;  %v4805_v59 = vrot.slane %v4796_v39, %v7697_v63  ;;  %v5487_v39 = vrot.slane %v5131_v61, %v7874_v21 }
 0x603   :  { %v4808_v40 = vsub.f32 %v4775_v34, %v4801_v58  ;;  %v4809_v41 = vsub.f32 %v4778_v36, %v4805_v59  ;;  %v5071_v34 = vrot.slane %v5070_v26, 2  ;;  %v5004_v36 = vadd.f32 %v5003_v27, %v4987_v23 }
 0x604   :  { %v5024_v58 = vadd.f32 %v5023_v33, %v5022_v25 }
 0x605   :  { %v4810_v42 = vmul.f32 1.442695, %v4808_v40  ;;  %v4812_v43 = vmul.f32 1.442695, %v4809_v41  ;;  %v5072_v59 = vadd.f32 %v5071_v34, %v5070_v26  ;;  %v5005_v40 = vrot.slane %v5004_v36, 2  ;;  %v5001_v34 = vld [vmem:[%s8210_s2 + $0x70] sm:$0xff] }
 0x606   :  { %v5053_v41 = vrot.slane %v5052_v0, 2 }
 0x607   :  { %7323 = vpow2.f32 %v4810_v42  ;;  %v4992_v42 = vld [vmem:[%s8210_s2 + $0x28] sm:$0xff] }
 0x608   :  { %7325 = vpow2.f32 %v4812_v43  ;;  %v5013_v43 = vrot.slane %v5012_v37, 1 }
 0x611   :  { %v7324_v44 = vpop.eup %7323 }
 0x612   :  { %v7326_v45 = vpop.eup %7325  ;;  %4817 = vperm.xlu1 %6487, %v7324_v44  }
 0x613   :  { %4820 = vperm.xlu0 %6488, %v7326_v45  }
 0x691   :  { %v4818_v46 = vpop.permute.xlu1 %4817 }
 0x692   :  { %v4821_v47 = vpop.permute.xlu0 %4820  ;;  %v4825_v48 = vrot.slane %v4818_v46, %v7885_v35  ;;  %v5064_v46 = vadd.f32 %v5063_v4, %v4997_v32 }
 0x693   :  { %v4829_v49 = vrot.slane %v4821_v47, %v7885_v35 }
 0x694   :  { %v5065_v3 = vrot.slane %v5064_v46, 2 }
 0x695   :  { %v4830_v50 = vsel %vm4452_vm0, %v4829_v49, %v4825_v48  ;;  %v5495_v48 = vcombine.high %v5487_v39, %v5487_v39  ;;  %v5000_v49 = vld [vmem:[%s8210_s2 + $0x68] sm:$0xff] }
 0x696   :  { %v4832_v51 = vsel %vm4793_vm2, %v4830_v50, 0.0  ;;  %v5033_v50 = vrot.slane %v4992_v42, 4  ;;  %v5066_v20 = vadd.f32 %v5065_v3, %v5064_v46 }
 0x697   :  { %4833 = vadd.xlane.f32.xlu1 %v4832_v51  ;;  %v4994_v51 = vld [vmem:[%s8210_s2 + $0x38] sm:$0xff] }
 0x724   :  { %v4834_v52 = vpop.xlane.xlu1 %4833 }
 0x725   :  { %7327 = vrcp.f32 %v4834_v52  ;;  %v5025_v52 = vrot.slane %v5024_v58, 1 }
 0x727   :  { %v5026_v12 = vadd.f32 %v5025_v52, %v5024_v58  ;;  %v5039_v58 = vrot.slane %v4993_v30, 4 }
 0x72f   :  { %v7328_v53 = vpop.eup %7327 }
 0x730   :  { %v4840_v54 = vrot.slane %v7328_v53, %v7690_v60  ;;  %v4844_v57 = vrot.slane %v7328_v53, %v7697_v63  ;;  %v5253_v60 = vcombine.high %v5243_v6, %v5243_v6  ;;  %v5206_v63 = vcombine.high %v5148_v1, %v5148_v1 }
 0x731   :  { %v5073_v53 = vrot.slane %v5072_v59, 1  ;;  %v7953_v6 = vrot.slane %v5495_v48, %v7874_v21 }
 0x732   :  { %v4847_v55 = vmul.f32 %v7324_v44, %v4840_v54  ;;  %v4848_v62 = vmul.f32 %v7326_v45, %v4844_v57  ;;  %5303 = vmatprep.subr.bf16.mxu1 %v5253_v60  ;;  %v5220_v8 = vrot.slane %v5206_v63, %v7874_v21  ;;  %v5061_v44 = vrot.slane %v5060_v56, 1  ;;  %v5002_v57 = vld [vmem:[%s8210_s2 + $0x78] sm:$0xff] }
 0x733   :  { %5304 = vmatpush1.bf16.xpose.msra.mxu1 %v5251_v7  ;;  %v5016_v45 = vadd.f32 %v5015_v38, %v4989_v31  ;;  %v5006_v54 = vadd.f32 %v5005_v40, %v5004_v36  ;;  %v5081_v7 = vrot.slane %v5000_v49, 4  ;;  %v5045_v60 = vrot.slane %v4994_v51, 4 }
 0x734   :  { %4867 = vperm.xlu0 %6488, %v4847_v55   ;;  %v5222_v9 = vcombine.high %v5220_v8, %v5220_v8  ;;  %v7939_v47 = vrot.slane %v5220_v8, %v7874_v21  ;;  %v5054_v55 = vadd.f32 %v5053_v41, %v5052_v0  ;;  %v5062_v1 = vadd.f32 %v5061_v44, %v5060_v56 }
 0x735   :  { %v5017_v2 = vrot.slane %v5016_v45, 2  ;;  %v7956_v63 = vrot.slane %v5487_v39, %v7874_v21  ;;  %v5480_v8 = vcombine.high %v5131_v61, %v5131_v61  ;;  %v5074_v13 = vadd.f32 %v5073_v53, %v5072_v59 }
 0x736   :  { %v5250_v10 = vrot.slane %v5222_v9, %v7874_v21  ;;  %v5034_v9 = vadd.f32 %v5033_v50, %v4992_v42  ;;  %v5007_v14 = vrot.slane %v5006_v54, 1  ;;  %v5055_v15 = vrot.slane %v5054_v55, 1 }
 0x737   :  { %v5108_v18 = vmul.f32 0.125, %v5062_v1  ;;  %v5018_v19 = vadd.f32 %v5017_v2, %v5016_v45  ;;  %v5082_v23 = vadd.f32 %v5081_v7, %v5000_v49  ;;  %v5046_v24 = vadd.f32 %v5045_v60, %v4994_v51 }
 0x738   :  { %4872 = vperm.xlu0 %6488, %v4848_v62   ;;  %5343 = vmatprep.subr.bf16.mxu0 %v5250_v10  ;;  %v5254_v11 = vcombine.high %v5250_v10, %v5250_v10  ;;  %v5014_v62 = vadd.f32 %v5013_v43, %v5012_v37  ;;  %v5093_v10 = vrot.slane %v5002_v57, 4  ;;  %v7967_v26 = vrot.slane %v5480_v8, %v7874_v21 }
 0x739   :  { %v5035_v27 = vrot.slane %v5034_v9, 2  ;;  %v5102_v31 = vmul.f32 0.125, %v5026_v12  ;;  %v5110_v32 = vmul.f32 0.125, %v5074_v13  ;;  %v5008_v61 = vadd.f32 %v5007_v14, %v5006_v54 }
 0x73a   :  { %5383 = vmatprep.subr.bf16.mxu1 %v5254_v11  ;;  %v4991_v11 = vld [vmem:[%s8210_s2 + $0x20] sm:$0xff]  ;;  %v5100_v17 = vmul.f32 0.125, %v5014_v62  ;;  %v5094_v28 = vadd.f32 %v5093_v10, %v5002_v57  ;;  %v5056_v33 = vadd.f32 %v5055_v15, %v5054_v55  ;;  %v5124_v0 = vpack.c.bf16 %v5108_v18, %v5108_v18 }
 0x73b   :  { %v5027_v25 = vrot.slane %v4991_v11, 4  ;;  %v5019_v37 = vrot.slane %v5018_v19, 1  ;;  %v5067_v56 = vrot.slane %v5066_v20, 1  ;;  %v5083_v38 = vrot.slane %v5082_v23, 2 }
 0x73c   :  { %v5116_v36 = vpack.c.bf16 %v5100_v17, %v5100_v17  ;;  %v5047_v4 = vrot.slane %v5046_v24, 2  ;;  %v5036_v59 = vadd.f32 %v5035_v27, %v5034_v9  ;;  %v5095_v40 = vrot.slane %v5094_v28, 2 }
 0x73d   :  { %v5028_v39 = vadd.f32 %v5027_v25, %v4991_v11  ;;  %v5076_v41 = vadd.f32 %v5075_v29, %v4999_v16  ;;  %v5087_v42 = vrot.slane %v5001_v34, 4  ;;  %v5118_v43 = vpack.c.bf16 %v5102_v31, %v5102_v31  ;;  %v4851_v31 = vld [vmem:[%s8227_s3 + $0x10] sm:$0xff] }
 0x73e   :  { %v5126_v44 = vpack.c.bf16 %v5110_v32, %v5110_v32  ;;  %v5099_v45 = vmul.f32 0.125, %v5008_v61  ;;  %v5107_v46 = vmul.f32 0.125, %v5056_v33  ;;  %v5440_v48 = vunpack.c.l.b16 %v5116_v36  ;;  %v4854_v32 = vld [vmem:[%s8227_s3 + $0x28] sm:$0xff] }
 0x73f   :  { %v5448_v49 = vunpack.c.l.b16 %v5124_v0  ;;  %v5020_v50 = vadd.f32 %v5019_v37, %v5018_v19  ;;  %v5068_v51 = vadd.f32 %v5067_v56, %v5066_v20  ;;  %v5084_v52 = vadd.f32 %v5083_v38, %v5082_v23  ;;  %v4850_v23 = vld [vmem:[%s8227_s3 + $0x8] sm:$0xff]  ;;  %v4856_v0 = vld [vmem:[%s8227_s3 + $0x38] sm:$0xff]  ;;  %v4853_v37 = vld [vmem:[%s8227_s3 + $0x20] sm:$0xff] }
 0x740   :  { %v5048_v53 = vadd.f32 %v5047_v4, %v5046_v24  ;;  %v5029_v54 = vrot.slane %v5028_v39, 2  ;;  %v5040_v55 = vadd.f32 %v5039_v58, %v4993_v30  ;;  %v5037_v57 = vrot.slane %v5036_v59, 1  ;;  %v4852_v24 = vld [vmem:[%s8227_s3 + $0x18] sm:$0xff]  ;;  %v4849_v30 = vld [vmem:[%s8227_s3] sm:$0xff]  ;;  %v4855_v56 = vld [vmem:[%s8227_s3 + $0x30] sm:$0xff] }
 0x741   :  { %v5096_v62 = vadd.f32 %v5095_v40, %v5094_v28  ;;  %v5077_v1 = vrot.slane %v5076_v41, 2  ;;  %v5088_v2 = vadd.f32 %v5087_v42, %v5001_v34  ;;  %v5442_v3 = vunpack.c.l.b16 %v5118_v43 }
 0x742   :  { %v5450_v7 = vunpack.c.l.b16 %v5126_v44  ;;  %v5496_v60 = vcombine.high %v7967_v26, %v7967_v26  ;;  %v5115_v8 = vpack.c.bf16 %v5099_v45, %v5099_v45  ;;  %v7978_v9 = vsel %vm4452_vm0, %v5448_v49, %v5440_v48  ;;  %v4858_v49 = vld [vmem:[%s8227_s3 + $0x48] sm:$0xff] }
 0x743   :  { %v5123_v10 = vpack.c.bf16 %v5107_v46, %v5107_v46  ;;  %v7980_v11 = vmul.f32 0.125, %v5020_v50  ;;  %v7982_v12 = vmul.f32 0.125, %v5068_v51  ;;  %v5085_v13 = vrot.slane %v5084_v52, 1  ;;  %v4860_v50 = vld [vmem:[%s8227_s3 + $0x58] sm:$0xff] }
 0x744   :  { %v5049_v14 = vrot.slane %v5048_v53, 1  ;;  %v7984_v15 = vadd.f32 %v5029_v54, %v5028_v39  ;;  %v5041_v16 = vrot.slane %v5040_v55, 2  ;;  %v5038_v17 = vadd.f32 %v5037_v57, %v5036_v59 }
 0x745   :  { %v5097_v18 = vrot.slane %v5096_v62, 1  ;;  %v7986_v19 = vadd.f32 %v5077_v1, %v5076_v41  ;;  %v5089_v20 = vrot.slane %v5088_v2, 2  ;;  %v7999_v28 = vrot.slane %v5496_v60, %v7874_v21 }
 0x746   :  { %v8001_v29 = vunpack.c.l.b16 %v5115_v8  ;;  %v8013_v61 = vsel %vm4452_vm0, %v5450_v7, %v5442_v3  ;;  %v8015_v33 = vunpack.c.l.b16 %v5123_v10  ;;  %v8030_v38 = vadd.f32 %v5085_v13, %v5084_v52 }
 0x747   :  { %v8032_v4 = vadd.f32 %v5049_v14, %v5048_v53  ;;  %v8035_v58 = vadd.f32 %v5041_v16, %v5040_v55  ;;  %v8039_v40 = vmul.f32 0.125, %v5038_v17  ;;  %v8041_v41 = vadd.f32 %v5097_v18, %v5096_v62  ;;  %v4857_v62 = vld [vmem:[%s8227_s3 + $0x40] sm:$0xff] }
 0x748   :  { %v8044_v43 = vadd.f32 %v5089_v20, %v5088_v2  ;;  %v4859_v2 = vld [vmem:[%s8227_s3 + $0x50] sm:$0xff] }
 0x7b3   :  { %v8037_v59 = vpop.permute.xlu0 %4867 }
 0x7b4   :  { %v4876_v44 = vmul.f32 %v8037_v59, %v4850_v23  ;;  %v4878_v45 = vmul.f32 %v8037_v59, %v4852_v24  ;;  %v4875_v46 = vmul.f32 %v8037_v59, %v4849_v30  ;;  %v4877_v48 = vmul.f32 %v8037_v59, %v4851_v31 }
 0x7b5   :  { %v8057_v51 = vmul.f32 %v8037_v59, %v4854_v32  ;;  %v8060_v52 = vmul.f32 %v8037_v59, %v4856_v0  ;;  %v8063_v53 = vmul.f32 %v8037_v59, %v4853_v37  ;;  %v8066_v54 = vmul.f32 %v8037_v59, %v4855_v56 }
 0x7b6   :  { %v4897_v55 = vrot.slane %v4876_v44, 4  ;;  %v4909_v57 = vrot.slane %v4878_v45, 4  ;;  %v4891_v1 = vrot.slane %v4875_v46, 4  ;;  %v4903_v3 = vrot.slane %v4877_v48, 4 }
 0x7b7   :  { %v8074_v7 = vpop.permute.xlu0 %4872  ;;  %v4921_v60 = vrot.slane %v8057_v51, 4 }
 0x7b8   :  { %v4884_v14 = vmul.f32 %v8074_v7, %v4858_v49  ;;  %v4898_v16 = vadd.f32 %v4897_v55, %v4876_v44  ;;  %v4886_v17 = vmul.f32 %v8074_v7, %v4860_v50  ;;  %v4910_v18 = vadd.f32 %v4909_v57, %v4878_v45 }
 0x7b9   :  { %v4883_v20 = vmul.f32 %v8074_v7, %v4857_v62  ;;  %v4892_v23 = vadd.f32 %v4891_v1, %v4875_v46  ;;  %v4885_v24 = vmul.f32 %v8074_v7, %v4859_v2  ;;  %v4904_v30 = vadd.f32 %v4903_v3, %v4877_v48 }
 0x7ba   :  { %v4899_v31 = vrot.slane %v4898_v16, 2  ;;  %v4945_v32 = vrot.slane %v4884_v14, 4  ;;  %v4911_v0 = vrot.slane %v4910_v18, 2  ;;  %v4957_v37 = vrot.slane %v4886_v17, 4 }
 0x7bb   :  { %v4893_v56 = vrot.slane %v4892_v23, 2  ;;  %v4939_v25 = vrot.slane %v4883_v20, 4  ;;  %v4905_v27 = vrot.slane %v4904_v30, 2  ;;  %v4951_v36 = vrot.slane %v4885_v24, 4 }
 0x7bc   :  { %v4900_v34 = vadd.f32 %v4899_v31, %v4898_v16  ;;  %v4946_v49 = vadd.f32 %v4945_v32, %v4884_v14  ;;  %v4912_v44 = vadd.f32 %v4911_v0, %v4910_v18  ;;  %v4958_v55 = vadd.f32 %v4957_v37, %v4886_v17  ;;  %v4862_v32 = vld [vmem:[%s8227_s3 + $0x68] sm:$0xff] }
 0x7bd   :  { %v4894_v50 = vadd.f32 %v4893_v56, %v4892_v23  ;;  %v4940_v45 = vadd.f32 %v4939_v25, %v4883_v20  ;;  %v4906_v57 = vadd.f32 %v4905_v27, %v4904_v30  ;;  %v4952_v62 = vadd.f32 %v4951_v36, %v4885_v24 }
 0x7be   :  { %v4901_v46 = vrot.slane %v4900_v34, 1  ;;  %v4947_v1 = vrot.slane %v4946_v49, 2  ;;  %v4913_v2 = vrot.slane %v4912_v44, 1  ;;  %v4959_v48 = vrot.slane %v4958_v55, 2 }
 0x7bf   :  { %v4895_v3 = vrot.slane %v4894_v50, 1  ;;  %v4941_v42 = vrot.slane %v4940_v45, 2  ;;  %v4907_v39 = vrot.slane %v4906_v57, 1  ;;  %v4953_v22 = vrot.slane %v4952_v62, 2 }
 0x7c0   :  { %v4902_v13 = vadd.f32 %v4901_v46, %v4900_v34  ;;  %v4948_v5 = vadd.f32 %v4947_v1, %v4946_v49  ;;  %v4914_v10 = vadd.f32 %v4913_v2, %v4912_v44  ;;  %v4960_v8 = vadd.f32 %v4959_v48, %v4958_v55 }
 0x7c1   :  { %v4896_v16 = vadd.f32 %v4895_v3, %v4894_v50  ;;  %v4942_v14 = vadd.f32 %v4941_v42, %v4940_v45  ;;  %v4908_v18 = vadd.f32 %v4907_v39, %v4906_v57  ;;  %v4954_v17 = vadd.f32 %v4953_v22, %v4952_v62  ;;  %v4864_v22 = vld [vmem:[%s8227_s3 + $0x78] sm:$0xff] }
 0x7c2   :  { %v4949_v23 = vrot.slane %v4948_v5, 1  ;;  %v5133_v25 = vpack.c.bf16 %v4902_v13, %v4902_v13  ;;  %v4961_v27 = vrot.slane %v4960_v8, 1  ;;  %v5135_v36 = vpack.c.bf16 %v4914_v10, %v4914_v10 }
 0x7c3   :  { %v4943_v20 = vrot.slane %v4942_v14, 1  ;;  %v5132_v24 = vpack.c.bf16 %v4896_v16, %v4896_v16  ;;  %v4955_v30 = vrot.slane %v4954_v17, 1  ;;  %v5134_v31 = vpack.c.bf16 %v4908_v18, %v4908_v18 }
 0x7c4   :  { %v4950_v34 = vadd.f32 %v4949_v23, %v4948_v5  ;;  %v5166_v0 = vunpack.c.l.b16 %v5133_v25  ;;  %v4962_v37 = vadd.f32 %v4961_v27, %v4960_v8  ;;  %v5168_v56 = vunpack.c.l.b16 %v5135_v36  ;;  %v4861_v25 = vld [vmem:[%s8227_s3 + $0x60] sm:$0xff] }
 0x7c5   :  { %v4944_v39 = vadd.f32 %v4943_v20, %v4942_v14  ;;  %v5165_v42 = vunpack.c.l.b16 %v5132_v24  ;;  %v4956_v13 = vadd.f32 %v4955_v30, %v4954_v17  ;;  %v5167_v10 = vunpack.c.l.b16 %v5134_v31 }
 0x7c6   :  { %v5141_v49 = vpack.c.bf16 %v4950_v34, %v4950_v34  ;;  %v5143_v44 = vpack.c.bf16 %v4962_v37, %v4962_v37  ;;  %v4888_v55 = vmul.f32 %v8074_v7, %v4862_v32  ;;  %v4922_v50 = vadd.f32 %v4921_v60, %v8057_v51  ;;  %v4863_v34 = vld [vmem:[%s8227_s3 + $0x70] sm:$0xff]  ;;  %s7431_s3 = smov [#allocation8]  }
 0x7c7   :  { %v5140_v5 = vpack.c.bf16 %v4944_v39, %v4944_v39  ;;  %v5142_v45 = vpack.c.bf16 %v4956_v13, %v4956_v13  ;;  %v4890_v8 = vmul.f32 %v8074_v7, %v4864_v22  ;;  %v8228_v57 = vrot.slane %v8060_v52, 4  ;;  %s5734_s27 = sshll.u32 %s7431_s3, 4  ;;  %s5735_s27 = int_to_ptr.vmem [resolvable:$true] %s5734_s27 }
 0x7c8   :  { %v5174_v46 = vunpack.c.l.b16 %v5141_v49  ;;  %v5176_v1 = vunpack.c.l.b16 %v5143_v44  ;;  %v4923_v2 = vrot.slane %v4922_v50, 2  ;;  %v4969_v48 = vrot.slane %v4888_v55, 4  ;;  %s7373_s28 = scalar_lea.vmem %s5735_s27, 32  ;;  %p7378_p3 = scmp.lt.s32.totalorder %s5735_s27, %s5735_s27 }
 0x7c9   :  { %v4934_v62 = vadd.f32 %v8228_v57, %v8060_v52  ;;  %v5173_v3 = vunpack.c.l.b16 %v5140_v5  ;;  %v5175_v16 = vunpack.c.l.b16 %v5142_v45  ;;  %v4981_v18 = vrot.slane %v4890_v8, 4  ;;  %p7374_p2 = scmp.ne.s32.totalorder %s5735_s27, %s7373_s28  ;;  %p7379_p4 = scmp.lt.s32.totalorder %s7373_s28, %s7373_s28 }
 0x7ca   :  { %v5182_v17 = vsel %vm4452_vm0, %v5174_v46, %v5166_v0  ;;  %v5184_v51 = vsel %vm4452_vm0, %v5176_v1, %v5168_v56  ;;  %v4924_v60 = vadd.f32 %v4923_v2, %v4922_v50  ;;  %v4970_v23 = vadd.f32 %v4969_v48, %v4888_v55 }
 0x7cb   :  { %v4935_v14 = vrot.slane %v4934_v62, 2  ;;  %v5190_v27 = vpack.c.b16 %v5182_v17, %v5182_v17  ;;  %v5192_v52 = vpack.c.b16 %v5184_v51, %v5184_v51  ;;  %v5181_v36 = vsel %vm4452_vm0, %v5173_v3, %v5165_v42  ;;  %p7380_p5 = por %p7379_p4, %p7378_p3 }
 0x7cc   :  { %v5183_v20 = vsel %vm4452_vm0, %v5175_v16, %v5167_v10  ;;  %v5189_v24 = vpack.c.b16 %v5181_v36, %v5181_v36  ;;  %v4925_v31 = vrot.slane %v4924_v60, 1  ;;  %v4971_v32 = vrot.slane %v4970_v23, 2 }
 0x7cd   :  { %v5191_v30 = vpack.c.b16 %v5183_v20, %v5183_v20  ;;  %5295 = vmatprep.mubr.bf16.mxu0 %v5190_v27  ;;  %5335 = vmatprep.mubr.bf16.mxu1 %v5192_v52  ;;  %v4936_v0 = vadd.f32 %v4935_v14, %v4934_v62  ;;  %v4982_v37 = vadd.f32 %v4981_v18, %v4890_v8  ;;  %v8110_v22 = vmul.f32 0.125, %v8030_v38  ;;  %p7381_p6 = pnand %p7380_p5, %p7374_p2 }
 0x7ce   :  { %v4887_v56 = vmul.f32 %v8074_v7, %v4861_v25  ;;  %5296 = vmatmul.mubr.bf16.vlgmr.msra.gmra.mrb[16].mxu0 %v5189_v24  ;;  %v4926_v39 = vadd.f32 %v4925_v31, %v4924_v60  ;;  %v4972_v42 = vadd.f32 %v4971_v32, %v4970_v23  ;;  %v8229_v13 = vrot.slane %v8063_v53, 4 }
 0x7cf   :  { %5336 = vmatmul.mubr.bf16.vlgmr.msra.gmra.mrb[16].mxu1 %v5191_v30  ;;  %v5043_v49 = vrot.slane %v8035_v58, 1  ;;  %5344 = vmatpush1.bf16.xpose.msra.mxu0 %v7939_v47  ;;  %v8230_v44 = vcombine.high %v7939_v47, %v7939_v47  ;;  %v4937_v55 = vrot.slane %v4936_v0, 1  ;;  %v4983_v50 = vrot.slane %v4982_v37, 2 }
 0x7d0   :  { %v4916_v10 = vadd.f32 %v8229_v13, %v8063_v53  ;;  %v4963_v38 = vrot.slane %v4887_v56, 4  ;;  %v4889_v5 = vmul.f32 %v8074_v7, %v4863_v34  ;;  %v4973_v45 = vrot.slane %v4972_v42, 1  ;;  %5537 = vmatprep.subr.bf16.mxu0 %v7953_v6 }
 0x7d1   :  { %5384 = vmatpush1.bf16.xpose.msra.mxu1 %v8230_v44  ;;  %v5137_v8 = vpack.c.bf16 %v4926_v39, %v4926_v39  ;;  %v8231_v53 = vrot.slane %v8066_v54, 4  ;;  %v8232_v46 = vcombine.high %v7953_v6, %v7953_v6  ;;  %v4938_v47 = vadd.f32 %v4937_v55, %v4936_v0 }
 0x7d2   :  { %v4917_v57 = vrot.slane %v4916_v10, 2  ;;  %v4984_v1 = vadd.f32 %v4983_v50, %v4982_v37  ;;  %v4964_v2 = vadd.f32 %v4963_v38, %v4887_v56  ;;  %v4975_v48 = vrot.slane %v4889_v5, 4 }
 0x7d3   :  { %v4928_v62 = vadd.f32 %v8231_v53, %v8066_v54  ;;  %5577 = vmatprep.subr.bf16.mxu1 %v8232_v46  ;;  %v4974_v3 = vadd.f32 %v4973_v45, %v4972_v42  ;;  %v5091_v18 = vrot.slane %v8044_v43, 1  ;;  %v5139_v51 = vpack.c.bf16 %v4938_v47, %v4938_v47 }
 0x7d4   :  { %v4918_v16 = vadd.f32 %v4917_v57, %v4916_v10  ;;  %v4985_v17 = vrot.slane %v4984_v1, 1  ;;  %v4965_v60 = vrot.slane %v4964_v2, 2  ;;  %v4976_v23 = vadd.f32 %v4975_v48, %v4889_v5 }
 0x7d5   :  { %v4929_v14 = vrot.slane %v4928_v62, 2  ;;  %v5145_v25 = vpack.c.bf16 %v4974_v3, %v4974_v3  ;;  %v5170_v27 = vunpack.c.l.b16 %v5137_v8  ;;  %v5710_v24 = vrot.slane %v8037_v59, %v7885_v35 }
 0x7d6   :  { %v4919_v54 = vrot.slane %v4918_v16, 1  ;;  %v4986_v36 = vadd.f32 %v4985_v17, %v4984_v1  ;;  %v4966_v6 = vadd.f32 %v4965_v60, %v4964_v2  ;;  %v4977_v20 = vrot.slane %v4976_v23, 2 }
 0x7d7   :  { %v4930_v52 = vadd.f32 %v4929_v14, %v4928_v62  ;;  %v5178_v30 = vunpack.c.l.b16 %v5145_v25  ;;  %v5714_v34 = vrot.slane %v8074_v7, %v7885_v35  ;;  %v5172_v37 = vunpack.c.l.b16 %v5139_v51 }
 0x7d8   :  { %v4920_v31 = vadd.f32 %v4919_v54, %v4918_v16  ;;  %v5147_v0 = vpack.c.bf16 %v4986_v36, %v4986_v36  ;;  %v4967_v56 = vrot.slane %v4966_v6, 1  ;;  %v4978_v39 = vadd.f32 %v4977_v20, %v4976_v23 }
 0x7d9   :  { %v4931_v32 = vrot.slane %v4930_v52, 1  ;;  %v5186_v42 = vsel %vm4452_vm0, %v5178_v30, %v5170_v27  ;;  %v5715_v44 = vsel %vm4452_vm0, %v5714_v34, %v5710_v24  ;;  %v5106_v5 = vmul.f32 0.125, %v8032_v4 }
 0x7da   :  { %v5136_v13 = vpack.c.bf16 %v4920_v31, %v4920_v31  ;;  %v5194_v55 = vpack.c.b16 %v5186_v42, %v5186_v42  ;;  %v5180_v50 = vunpack.c.l.b16 %v5147_v0  ;;  %v4968_v38 = vadd.f32 %v4967_v56, %v4966_v6  ;;  %5717 = vst.msk [vmem:[#allocation8] sm:$0x3] %vm4793_vm2, %v5715_v44 }
 0x7db   :  { %v4932_v10 = vadd.f32 %v4931_v32, %v4930_v52  ;;  %v4979_v59 = vrot.slane %v4978_v39, 1  ;;  %v5114_v35 = vmul.f32 0.125, %v8041_v41  ;;  %v8233_v7 = vrot.slane %v7984_v15, 1 }
 0x7dc   :  { %v8234_v8 = vrot.slane %v7986_v19, 1  ;;  %5375 = vmatprep.mubr.bf16.mxu0 %v5194_v55  ;;  %v5188_v53 = vsel %vm4452_vm0, %v5180_v50, %v5172_v37  ;;  %v5144_v62 = vpack.c.bf16 %v4968_v38, %v4968_v38  ;;  %v5120_v4 = vpack.c.bf16 %v8039_v40, %v8039_v40 }
 0x7dd   :  { %v5032_v45 = vadd.f32 %v8233_v7, %v7984_v15  ;;  %v4980_v46 = vadd.f32 %v4979_v59, %v4978_v39  ;;  %v5138_v47 = vpack.c.bf16 %v4932_v10, %v4932_v10  ;;  %v5196_v1 = vpack.c.b16 %v5188_v53, %v5188_v53 }
 0x7de   :  { %v5080_v57 = vadd.f32 %v8234_v8, %v7986_v19  ;;  %v5128_v41 = vpack.c.bf16 %v8110_v22, %v8110_v22  ;;  %v5044_v2 = vadd.f32 %v5043_v49, %v8035_v58  ;;  %v5169_v15 = vunpack.c.l.b16 %v5136_v13 }
 0x7df   :  { %v5177_v48 = vunpack.c.l.b16 %v5144_v62  ;;  %v5146_v3 = vpack.c.bf16 %v4980_v46, %v4980_v46  ;;  %v5092_v19 = vadd.f32 %v5091_v18, %v8044_v43  ;;  %5415 = vmatprep.mubr.bf16.mxu1 %v5196_v1  ;;  %v5466_v16 = vpack.c.b16 %v8013_v61, %v8013_v61 }
 0x7e0   :  { %v5122_v14 = vpack.c.bf16 %v5106_v5, %v5106_v5  ;;  %v5130_v17 = vpack.c.bf16 %v5114_v35, %v5114_v35  ;;  %v5103_v51 = vmul.f32 0.125, %v5032_v45  ;;  %v5171_v40 = vunpack.c.l.b16 %v5138_v47 }
 0x7e1   :  { %v5185_v60 = vsel %vm4452_vm0, %v5177_v48, %v5169_v15  ;;  %v5179_v23 = vunpack.c.l.b16 %v5146_v3  ;;  %v5111_v25 = vmul.f32 0.125, %v5080_v57  ;;  %v8235_v58 = vpack.c.bf16 %v7980_v11, %v7980_v11 }
 0x7e2   :  { %v5193_v22 = vpack.c.b16 %v5185_v60, %v5185_v60  ;;  %v5444_v27 = vunpack.c.l.b16 %v5120_v4  ;;  %v5452_v54 = vunpack.c.l.b16 %v5128_v41  ;;  %v8236_v61 = vpack.c.bf16 %v7982_v12, %v7982_v12 }
 0x7e3   :  { %v5441_v49 = vunpack.c.l.b16 %v8235_v58  ;;  %v5187_v43 = vsel %vm4452_vm0, %v5179_v23, %v5171_v40  ;;  %v5105_v52 = vmul.f32 0.125, %v5044_v2  ;;  %v5113_v36 = vmul.f32 0.125, %v5092_v19 }
 0x7e4   :  { %v5449_v18 = vunpack.c.l.b16 %v8236_v61  ;;  %5376 = vmatmul.mubr.bf16.vlgmr.msra.gmra.mrb[20].mxu0 %v5193_v22  ;;  %v5195_v6 = vpack.c.b16 %v5187_v43, %v5187_v43  ;;  %v5528_v20 = vcombine.high %v7999_v28, %v7999_v28  ;;  %v5446_v24 = vunpack.c.l.b16 %v5122_v14 }
 0x7e5   :  { %v5454_v30 = vunpack.c.l.b16 %v5130_v17  ;;  %5538 = vmatpush1.bf16.xpose.msra.mxu0 %v7956_v63  ;;  %v8237_v11 = vpack.c.b16 %v7978_v9, %v7978_v9  ;;  %v5455_v12 = vsel %vm4452_vm0, %v8015_v33, %v8001_v29  ;;  %v5119_v31 = vpack.c.bf16 %v5103_v51, %v5103_v51 }
 0x7e6   :  { %v5127_v32 = vpack.c.bf16 %v5111_v25, %v5111_v25  ;;  %5416 = vmatmul.mubr.bf16.vlgmr.msra.gmra.mrb[20].mxu1 %v5195_v6  ;;  %5617 = vmatprep.subr.bf16.mxu0 %v7999_v28  ;;  %v5510_v34 = vrot.slane %v7967_v26, %v7874_v21  ;;  %v5460_v0 = vsel %vm4452_vm0, %v5452_v54, %v5444_v27 }
 0x7e7   :  { %5569 = vmatprep.mubr.bf16.mxu0 %v8237_v11  ;;  %v8238_v37 = vcombine.high %v7956_v63, %v7956_v63  ;;  %5609 = vmatprep.mubr.bf16.mxu1 %v5466_v16  ;;  %v5457_v9 = vsel %vm4452_vm0, %v5449_v18, %v5441_v49  ;;  %v5121_v56 = vpack.c.bf16 %v5105_v52, %v5105_v52  ;;  %v5443_v28 = vunpack.c.l.b16 %v5119_v31 }
 0x7e8   :  { %v5129_v39 = vpack.c.bf16 %v5113_v36, %v5113_v36  ;;  %v5463_v29 = vpack.c.b16 %v5455_v12, %v5455_v12  ;;  %v5462_v33 = vsel %vm4452_vm0, %v5454_v30, %v5446_v24  ;;  %v5468_v42 = vpack.c.b16 %v5460_v0, %v5460_v0 }
 0x7e9   :  { %5578 = vmatpush1.bf16.xpose.msra.mxu1 %v8238_v37  ;;  %v5451_v13 = vunpack.c.l.b16 %v5127_v32  ;;  %v5465_v10 = vpack.c.b16 %v5457_v9, %v5457_v9  ;;  %v5526_v21 = vcombine.high %v5510_v34, %v5510_v34  ;;  %v5470_v26 = vpack.c.b16 %v5462_v33, %v5462_v33 }
 0x7ea   :  { %5657 = vmatprep.subr.bf16.mxu1 %v5528_v20  ;;  %v5445_v44 = vunpack.c.l.b16 %v5121_v56  ;;  %v5453_v55 = vunpack.c.l.b16 %v5129_v39 }
 0x7eb   :  { %v5459_v63 = vsel %vm4452_vm0, %v5451_v13, %v5443_v28 }
 0x7ec   :  { %5570 = vmatmul.mubr.bf16.vlgmr.msra.gmra.mrb[24].mxu0 %v5463_v29  ;;  %v5461_v50 = vsel %vm4452_vm0, %v5453_v55, %v5445_v44  ;;  %v5467_v38 = vpack.c.b16 %v5459_v63, %v5459_v63 }
 0x7ed   :  { %5618 = vmatpush1.bf16.xpose.msra.mxu0 %v5510_v34  ;;  %5649 = vmatprep.mubr.bf16.mxu0 %v5468_v42  ;;  %v5469_v59 = vpack.c.b16 %v5461_v50, %v5461_v50 }
 0x7f0   :  { %5610 = vmatmul.mubr.bf16.vlgmr.msra.gmra.mrb[24].mxu1 %v5465_v10 }
 0x7f1   :  { %5658 = vmatpush1.bf16.xpose.msra.mxu1 %v5526_v21  ;;  %5689 = vmatprep.mubr.bf16.mxu1 %v5470_v26 }
 0x7f4   :  { %5650 = vmatmul.mubr.bf16.vlgmr.msra.gmra.mrb[28].mxu0 %v5467_v38 }
 0x7f8   :  { %5690 = vmatmul.mubr.bf16.vlgmr.msra.gmra.mrb[28].mxu1 %v5469_v59 }
 0x7f9   :  { %7384 = shalt.err (!%p7381_p6)
}
 0x7fa   :  { %s7385_s4 = scalar_lea.hbm %s8224_s16, 32 }
 0x7fb   :  { %p7386_p7 = scmp.ne.s32.totalorder %s8224_s16, %s7385_s4  ;;  %p7389_p8 = scmp.lt.u32.totalorder %s7385_s4, %s8224_s16 }
 0x7fd   :  { %p7391_p9 = pnand %p7389_p8, %p7386_p7 }
 0x7ff   :  { %7394 = shalt.err (!%p7391_p9)
}
 0x800   :  { %5737 = dma.vmem_to_hbm [thread:$0]  %s5735_s27, 32, %s8224_s16, [#allocation9]   ;;  %v6326_v18 = vld [vmem:[%s8222_s14] ss:$0 sm:$0xff]  ;;  %vm5705_vm3 = vcmask 9216  }
 0x801   :  { %s7432_s10 = smov [#allocation7]  }
 0x802   :  { %s5724_s11 = sshll.u32 %s7432_s10, 4  ;;  %s5725_s11 = int_to_ptr.vmem [resolvable:$true] %s5724_s11 }
 0x803   :  { %s7395_s18 = scalar_lea.vmem %s5725_s11, 32  ;;  %p7400_p11 = scmp.lt.s32.totalorder %s5725_s11, %s5725_s11 }
 0x804   :  { %p7396_p10 = scmp.ne.s32.totalorder %s5725_s11, %s7395_s18  ;;  %p7401_p12 = scmp.lt.s32.totalorder %s7395_s18, %s7395_s18 }
 0x806   :  { %p7402_p13 = por %p7401_p12, %p7400_p11 }
 0x808   :  { %p7403_p0 = pnand %p7402_p13, %p7396_p10 }
 0x8a1   :  { %v5297_v5 = vpop.f32.mrb[16].mxu0 }
 0x8a2   :  { %v5337_v35 = vpop.f32.mrb[16].mxu1  ;;  %v5299_v45 = vpop.f32.mrb[17].mxu0 }
 0x8a3   :  { %v5338_v7 = vadd.f32 %v5337_v35, %v5297_v5  ;;  %v5339_v8 = vpop.f32.mrb[17].mxu1  ;;  %v5300_v57 = vpop.f32.mrb[18].mxu0 }
 0x8a4   :  { %v5340_v53 = vpop.f32.mrb[18].mxu1  ;;  %v5301_v62 = vpop.f32.mrb[19].mxu0 }
 0x8a5   :  { %v5341_v46 = vpop.f32.mrb[19].mxu1 }
 0x8b7   :  { %v5377_v47 = vpop.f32.mrb[20].mxu0 }
 0x8b8   :  { %v5378_v1 = vadd.f32 %v5377_v47, %v5338_v7  ;;  %v5379_v4 = vpop.f32.mrb[21].mxu0 }
 0x8b9   :  { %v5417_v41 = vpop.f32.mrb[20].mxu1  ;;  %v5380_v2 = vpop.f32.mrb[22].mxu0 }
 0x8ba   :  { %v5418_v15 = vadd.f32 %v5417_v41, %v5378_v1  ;;  %v5419_v48 = vpop.f32.mrb[21].mxu1  ;;  %v5381_v3 = vpop.f32.mrb[23].mxu0 }
 0x8bb   :  { %v5420_v19 = vpop.f32.mrb[22].mxu1 }
 0x8bc   :  { %v5421_v16 = vpop.f32.mrb[23].mxu1 }
 0x8bf   :  { %v5571_v14 = vpop.f32.mrb[24].mxu0 }
 0x8c0   :  { %v5572_v17 = vadd.f32 %v5571_v14, %v5418_v15  ;;  %v5573_v51 = vpop.f32.mrb[25].mxu0 }
 0x8c1   :  { %v5574_v40 = vpop.f32.mrb[26].mxu0 }
 0x8c2   :  { %v5575_v22 = vpop.f32.mrb[27].mxu0 }
 0x8c3   :  { %v5611_v60 = vpop.f32.mrb[24].mxu1 }
 0x8c4   :  { %v5612_v23 = vadd.f32 %v5611_v60, %v5572_v17  ;;  %v5613_v25 = vpop.f32.mrb[25].mxu1 }
 0x8c5   :  { %v5614_v58 = vpop.f32.mrb[26].mxu1 }
 0x8c6   :  { %v5615_v49 = vpop.f32.mrb[27].mxu1 }
 0x8c7   :  { %v5651_v27 = vpop.f32.mrb[28].mxu0 }
 0x8c8   :  { %v5652_v54 = vadd.f32 %v5651_v27, %v5612_v23  ;;  %v5653_v43 = vpop.f32.mrb[29].mxu0 }
 0x8c9   :  { %v5654_v52 = vpop.f32.mrb[30].mxu0 }
 0x8ca   :  { %v5655_v20 = vpop.f32.mrb[31].mxu0 }
 0x8cb   :  { %v5691_v61 = vpop.f32.mrb[28].mxu1 }
 0x8cc   :  { %v5692_v36 = vadd.f32 %v5691_v61, %v5652_v54  ;;  %v5693_v6 = vpop.f32.mrb[29].mxu1 }
 0x8cd   :  { %v5694_v24 = vpop.f32.mrb[30].mxu1 }
 0x8ce   :  { %v5704_v30 = vadd.f32 %v6326_v18, %v5692_v36  ;;  %v5695_v11 = vpop.f32.mrb[31].mxu1 }
 0x8d0   :  { %5706 = vst.msk [vmem:[#allocation7] sm:$0x3] %vm5705_vm3, %v5704_v30 }
 0x8d1   :  { %7406 = shalt.err (!%p7403_p0)
}
 0x8d2   :  { %s7407_s19 = scalar_lea.hbm %s8223_s15, 32 }
 0x8d3   :  { %p7408_p1 = scmp.ne.s32.totalorder %s8223_s15, %s7407_s19  ;;  %p7411_p2 = scmp.lt.u32.totalorder %s7407_s19, %s8223_s15 }
 0x8d5   :  { %p7413_p3 = pnand %p7411_p2, %p7408_p1 }
 0x8d7   :  { %7416 = shalt.err (!%p7413_p3)
}
 0x8d8   :  { %5727 = dma.vmem_to_hbm [thread:$0]  %s5725_s11, 32, %s8223_s15, [#allocation4]  }
 0x8d9   :  { %7421 = dma.done.wait [#allocation4], 32  }
 0x8da   :  { %7422 = vsyncadd [#allocation4], 4294967264 }
 0x8db   :  { %7423 = dma.done.wait [#allocation9], 32  }
 0x8dc   :  { %7424 = vsyncadd [#allocation9], 4294967264 }
 0x8dd   :  { %5744 = vsyncpa [#allocation3], 1 }
 0x8de   :  { %5745 = vsyncpa [#allocation6], 1 }
 0x8df   :  { %5746 = vsyncpa [#allocation4], 1 }
 0x8e0   :  { %5747 = vsyncpa [#allocation9], 1 }

</bundles_post_ra>
